<compile_context>
chip_gen: v5e
topology: v5e:2x2
jax: 0.10.0
libtpu: 0.0.40
codegen_flags: <defaults>
</compile_context>

<pallas_src>
import math

import jax
import jax.numpy as jnp
import numpy as np
from jax.experimental import pallas as pl
from jax.experimental.pallas import tpu as pltpu

_LANE = 128
_VMEM_BUDGET = 14 * 1024 * 1024  # stay under v5e's 16 MiB scoped-VMEM default


def _round_up(a: int, m: int) -> int:
    return (a + m - 1) // m * m


def _pick_sublane_tile(NR: int, row_bytes_2buf: int, max_tile: int) -> int:
    """Largest sublane tile (multiple of 8, or the full extent) within budget."""
    ts = min(max_tile, NR)
    ts -= ts % 8
    ts = max(ts, 8)
    while ts > 8 and ts * row_bytes_2buf > _VMEM_BUDGET:
        ts //= 2
        ts -= ts % 8
        ts = max(ts, 8)
    if ts >= NR:
        return NR  # single full-extent block (legal even if NR % 8 != 0)
    return ts


def _make_kernel(C: int, nf: int, w_vals, use_double_angle: bool):
    sin_base = C
    cos_base = C + C * nf

    def kernel(x_ref, o_ref):
        for c in range(C):                     # C, nf are tiny compile-time consts
            xc = x_ref[c]                      # (TS, 128) dense tile, input dtype
            o_ref[c] = xc.astype(o_ref.dtype)  # identity channel (full-vreg store)
            xf = xc.astype(jnp.float32)        # per-channel f32 (accuracy; cheap)
            if use_double_angle:
                # sin/cos only for the base frequency; derive octaves on the VPU.
                h = xf * w_vals[0]
                s = jnp.sin(h)
                co = jnp.cos(h)
                o_ref[sin_base + c * nf] = s.astype(o_ref.dtype)
                o_ref[cos_base + c * nf] = co.astype(o_ref.dtype)
                for f in range(1, nf):
                    s, co = 2.0 * s * co, 1.0 - 2.0 * s * s
                    o_ref[sin_base + c * nf + f] = s.astype(o_ref.dtype)
                    o_ref[cos_base + c * nf + f] = co.astype(o_ref.dtype)
            else:
                for f in range(nf):
                    h = xf * w_vals[f]                     # scalar-const mul (VPU)
                    # Direct per-slab stores: each is a dense (TS,128) store,
                    # no stack/copy temporaries; EUP pushes overlap with vst.
                    o_ref[sin_base + c * nf + f] = jnp.sin(h).astype(o_ref.dtype)
                    o_ref[cos_base + c * nf + f] = jnp.cos(h).astype(o_ref.dtype)

    return kernel


def fourier_features(x: jax.Array, start: int = 6, stop: int = 8, step: int = 1,
                     *, sublane_tile: int = 512, use_double_angle: bool = False,
                     out_dtype=None) -> jax.Array:
    """x: [B, C, T, H, W] -> [B, (1 + 2*num_freqs)*C, T, H, W]"""
    assert x.ndim == 5
    B, C, T, H, W = x.shape
    freqs = list(range(start, stop, step))
    nf = len(freqs)
    assert nf > 0
    C_out = (1 + 2 * nf) * C
    out_dtype = x.dtype if out_dtype is None else jnp.dtype(out_dtype)
    if use_double_angle:
        assert step == 1, "double-angle recurrence requires step == 1"
    # w constants match the reference's float32 arithmetic: (2**f) * (2*pi).
    w_vals = [float(np.float32(2.0 ** f) * np.float32(2.0 * np.pi)) for f in freqs]

    N = T * H * W
    N128 = _round_up(N, _LANE)                 # minimal pad only for the reshape
    NR = N128 // _LANE                         # rows of 128 lanes

    x2 = x.reshape(B, C, N)
    if N128 != N:
        x2 = jnp.pad(x2, ((0, 0), (0, 0), (0, N128 - N)))
    x4 = x2.reshape(B, C, NR, _LANE)

    in_bytes = jnp.dtype(x.dtype).itemsize
    out_bytes = jnp.dtype(out_dtype).itemsize
    # Double-buffered VMEM bytes per sublane row for input + output blocks.
    row_bytes_2buf = 2 * _LANE * (C * in_bytes + C_out * out_bytes)
    TS = _pick_sublane_tile(NR, row_bytes_2buf, sublane_tile)

    n_trans = 2 if use_double_angle else 2 * nf
    cost = pl.CostEstimate(
        flops=B * C * N * (nf + (5 * (nf - 1) if use_double_angle else 0)),
        transcendentals=B * C * N * n_trans,
        bytes_accessed=B * N * (C * in_bytes + C_out * out_bytes),
    )

    kernel = _make_kernel(C, nf, w_vals, use_double_angle)
    out = pl.pallas_call(
        kernel,
        out_shape=jax.ShapeDtypeStruct((B, C_out, NR, _LANE), out_dtype),
        grid_spec=pltpu.PrefetchScalarGridSpec(
            num_scalar_prefetch=0,
            grid=(B, pl.cdiv(NR, TS)),         # ragged NR -> partial last block
            in_specs=[pl.BlockSpec((None, C, TS, _LANE),
                                   lambda b, n: (b, 0, n, 0))],
            out_specs=pl.BlockSpec((None, C_out, TS, _LANE),
                                   lambda b, n: (b, 0, n, 0)),
        ),
        compiler_params=pltpu.CompilerParams(
            dimension_semantics=("parallel", "parallel")),
        cost_estimate=cost,
    )(x4)

    out = out.reshape(B, C_out, N128)
    if N128 != N:
        out = out[:, :, :N]
    return out.reshape(B, C_out, T, H, W)


def fourier_features_ref(x, start=6, stop=8, step=1):
    """Plain-JAX reference mirroring the PyTorch code."""
    freqs = jnp.arange(start, stop, step, dtype=x.dtype)
    C = x.shape[1]
    nf = freqs.shape[0]
    w = (2.0 ** freqs) * (2.0 * jnp.pi)                       # (nf,)
    w = jnp.tile(w, C)[None, :, None, None, None]             # w.repeat(C)
    h = jnp.repeat(x, nf, axis=1)                             # repeat_interleave(dim=1)
    h = w * h
    return jnp.concatenate([x, jnp.sin(h), jnp.cos(h)], axis=1)


if __name__ == "__main__":
    key = jax.random.PRNGKey(0)

    # Case 1: lane-aligned N (N = 8*16*16 = 2048), default tiling.
    B, C, T, H, W = 2, 4, 8, 16, 16
    x = jax.random.normal(key, (B, C, T, H, W), dtype=jnp.float32)
    out = jax.block_until_ready(fourier_features(x))
    ref = fourier_features_ref(x)
    assert out.shape == (B, (1 + 2 * 2) * C, T, H, W), out.shape
    assert jnp.allclose(out, ref, atol=1e-4, rtol=1e-4)

    # Case 2: ragged N (N = 3*7*11 = 231): pads only to the next 128, single
    # full-extent block, real Mochi-like C=3.
    x2 = jax.random.normal(jax.random.PRNGKey(1), (1, 3, 3, 7, 11), jnp.float32)
    out2 = jax.block_until_ready(fourier_features(x2))
    ref2 = fourier_features_ref(x2)
    assert out2.shape == (1, 15, 3, 7, 11), out2.shape
    assert jnp.allclose(out2, ref2, atol=1e-4, rtol=1e-4)

    # Case 3: NR = 22 rows with sublane_tile=16 -> 2 grid steps along NR with a
    # partial last block (exercises the no-pad partial-block path).
    x3 = jax.random.normal(jax.random.PRNGKey(2), (1, 2, 2, 16, 88), jnp.float32)
    out3 = jax.block_until_ready(fourier_features(x3, sublane_tile=16))
    ref3 = fourier_features_ref(x3)
    assert out3.shape == (1, 10, 2, 16, 88), out3.shape
    assert jnp.allclose(out3, ref3, atol=1e-4, rtol=1e-4)

    # Case 4: double-angle recurrence (halves EUP transcendentals, v7x win);
    # not bit-identical to the reference formulation -> loose tolerance.
    out4 = jax.block_until_ready(fourier_features(x, use_double_angle=True))
    assert out4.shape == ref.shape
    assert jnp.allclose(out4, ref, atol=5e-3, rtol=0.0)

    print("KERNEL_OK")
</pallas_src>

<mosaic_0001>
module attributes {stable_mosaic.version = 11 : i64} {
  func.func @kernel(%arg0: i32, %arg1: i32, %arg2: memref<1x4x16x128xf32, #tpu.memory_space<vmem>>, %arg3: memref<1x20x16x128xf32, #tpu.memory_space<vmem>>) attributes {dimension_semantics = [#tpu.dimension_semantics<parallel>, #tpu.dimension_semantics<parallel>], iteration_bounds = array<i64: 2, 1>, scalar_prefetch = 0 : i64, scratch_operands = 0 : i64, tpu.core_type = #tpu.core_type<tc>, window_params = [{transform_indices = @transform_0, window_bounds = array<i64: 1, 4, 16, 128>}, {transform_indices = @transform_1, window_bounds = array<i64: 1, 20, 16, 128>}]} {
    %c0 = arith.constant 0 : index
    %c0_0 = arith.constant 0 : index
    %c0_1 = arith.constant 0 : index
    %c0_2 = arith.constant 0 : index
    %0 = vector.load %arg2[%c0, %c0_0, %c0_1, %c0_2] : memref<1x4x16x128xf32, #tpu.memory_space<vmem>>, vector<1x1x16x128xf32>
    %1 = vector.shape_cast %0 : vector<1x1x16x128xf32> to vector<16x128xf32>
    %c0_3 = arith.constant 0 : index
    %c0_4 = arith.constant 0 : index
    %c0_5 = arith.constant 0 : index
    %c0_6 = arith.constant 0 : index
    %2 = vector.load %arg3[%c0_3, %c0_4, %c0_5, %c0_6] : memref<1x20x16x128xf32, #tpu.memory_space<vmem>>, vector<1x1x16x128xf32>
    %3 = vector.shape_cast %2 : vector<1x1x16x128xf32> to vector<16x128xf32>
    %4 = vector.shape_cast %1 : vector<16x128xf32> to vector<1x1x16x128xf32>
    tpu.vector_store %arg3[%c0_3, %c0_4, %c0_5, %c0_6], %4 {strides = array<i32>} : memref<1x20x16x128xf32, #tpu.memory_space<vmem>>, vector<1x1x16x128xf32>,
    %cst = arith.constant 402.123871 : f32
    %5 = vector.broadcast %cst : f32 to vector<16x128xf32>
    %6 = arith.mulf %1, %5 : vector<16x128xf32>
    %7 = math.sin %6 : vector<16x128xf32>
    %c0_7 = arith.constant 0 : index
    %c4 = arith.constant 4 : index
    %c0_8 = arith.constant 0 : index
    %c0_9 = arith.constant 0 : index
    %8 = vector.load %arg3[%c0_7, %c4, %c0_8, %c0_9] : memref<1x20x16x128xf32, #tpu.memory_space<vmem>>, vector<1x1x16x128xf32>
    %9 = vector.shape_cast %8 : vector<1x1x16x128xf32> to vector<16x128xf32>
    %10 = vector.shape_cast %7 : vector<16x128xf32> to vector<1x1x16x128xf32>
    tpu.vector_store %arg3[%c0_7, %c4, %c0_8, %c0_9], %10 {strides = array<i32>} : memref<1x20x16x128xf32, #tpu.memory_space<vmem>>, vector<1x1x16x128xf32>,
    %11 = math.cos %6 : vector<16x128xf32>
    %c0_10 = arith.constant 0 : index
    %c12 = arith.constant 12 : index
    %c0_11 = arith.constant 0 : index
    %c0_12 = arith.constant 0 : index
    %12 = vector.load %arg3[%c0_10, %c12, %c0_11, %c0_12] : memref<1x20x16x128xf32, #tpu.memory_space<vmem>>, vector<1x1x16x128xf32>
    %13 = vector.shape_cast %12 : vector<1x1x16x128xf32> to vector<16x128xf32>
    %14 = vector.shape_cast %11 : vector<16x128xf32> to vector<1x1x16x128xf32>
    tpu.vector_store %arg3[%c0_10, %c12, %c0_11, %c0_12], %14 {strides = array<i32>} : memref<1x20x16x128xf32, #tpu.memory_space<vmem>>, vector<1x1x16x128xf32>,
    %cst_13 = arith.constant 804.247741 : f32
    %15 = vector.broadcast %cst_13 : f32 to vector<16x128xf32>
    %16 = arith.mulf %1, %15 : vector<16x128xf32>
    %17 = math.sin %16 : vector<16x128xf32>
    %c0_14 = arith.constant 0 : index
    %c5 = arith.constant 5 : index
    %c0_15 = arith.constant 0 : index
    %c0_16 = arith.constant 0 : index
    %18 = vector.load %arg3[%c0_14, %c5, %c0_15, %c0_16] : memref<1x20x16x128xf32, #tpu.memory_space<vmem>>, vector<1x1x16x128xf32>
    %19 = vector.shape_cast %18 : vector<1x1x16x128xf32> to vector<16x128xf32>
    %20 = vector.shape_cast %17 : vector<16x128xf32> to vector<1x1x16x128xf32>
    tpu.vector_store %arg3[%c0_14, %c5, %c0_15, %c0_16], %20 {strides = array<i32>} : memref<1x20x16x128xf32, #tpu.memory_space<vmem>>, vector<1x1x16x128xf32>,
    %21 = math.cos %16 : vector<16x128xf32>
    %c0_17 = arith.constant 0 : index
    %c13 = arith.constant 13 : index
    %c0_18 = arith.constant 0 : index
    %c0_19 = arith.constant 0 : index
    %22 = vector.load %arg3[%c0_17, %c13, %c0_18, %c0_19] : memref<1x20x16x128xf32, #tpu.memory_space<vmem>>, vector<1x1x16x128xf32>
    %23 = vector.shape_cast %22 : vector<1x1x16x128xf32> to vector<16x128xf32>
    %24 = vector.shape_cast %21 : vector<16x128xf32> to vector<1x1x16x128xf32>
    tpu.vector_store %arg3[%c0_17, %c13, %c0_18, %c0_19], %24 {strides = array<i32>} : memref<1x20x16x128xf32, #tpu.memory_space<vmem>>, vector<1x1x16x128xf32>,
    %c0_20 = arith.constant 0 : index
    %c1 = arith.constant 1 : index
    %c0_21 = arith.constant 0 : index
    %c0_22 = arith.constant 0 : index
    %25 = vector.load %arg2[%c0_20, %c1, %c0_21, %c0_22] : memref<1x4x16x128xf32, #tpu.memory_space<vmem>>, vector<1x1x16x128xf32>
    %26 = vector.shape_cast %25 : vector<1x1x16x128xf32> to vector<16x128xf32>
    %c0_23 = arith.constant 0 : index
    %c1_24 = arith.constant 1 : index
    %c0_25 = arith.constant 0 : index
    %c0_26 = arith.constant 0 : index
    %27 = vector.load %arg3[%c0_23, %c1_24, %c0_25, %c0_26] : memref<1x20x16x128xf32, #tpu.memory_space<vmem>>, vector<1x1x16x128xf32>
    %28 = vector.shape_cast %27 : vector<1x1x16x128xf32> to vector<16x128xf32>
    %29 = vector.shape_cast %26 : vector<16x128xf32> to vector<1x1x16x128xf32>
    tpu.vector_store %arg3[%c0_23, %c1_24, %c0_25, %c0_26], %29 {strides = array<i32>} : memref<1x20x16x128xf32, #tpu.memory_space<vmem>>, vector<1x1x16x128xf32>,
    %cst_27 = arith.constant 402.123871 : f32
    %30 = vector.broadcast %cst_27 : f32 to vector<16x128xf32>
    %31 = arith.mulf %26, %30 : vector<16x128xf32>
    %32 = math.sin %31 : vector<16x128xf32>
    %c0_28 = arith.constant 0 : index
    %c6 = arith.constant 6 : index
    %c0_29 = arith.constant 0 : index
    %c0_30 = arith.constant 0 : index
    %33 = vector.load %arg3[%c0_28, %c6, %c0_29, %c0_30] : memref<1x20x16x128xf32, #tpu.memory_space<vmem>>, vector<1x1x16x128xf32>
    %34 = vector.shape_cast %33 : vector<1x1x16x128xf32> to vector<16x128xf32>
    %35 = vector.shape_cast %32 : vector<16x128xf32> to vector<1x1x16x128xf32>
    tpu.vector_store %arg3[%c0_28, %c6, %c0_29, %c0_30], %35 {strides = array<i32>} : memref<1x20x16x128xf32, #tpu.memory_space<vmem>>, vector<1x1x16x128xf32>,
    %36 = math.cos %31 : vector<16x128xf32>
    %c0_31 = arith.constant 0 : index
    %c14 = arith.constant 14 : index
    %c0_32 = arith.constant 0 : index
    %c0_33 = arith.constant 0 : index
    %37 = vector.load %arg3[%c0_31, %c14, %c0_32, %c0_33] : memref<1x20x16x128xf32, #tpu.memory_space<vmem>>, vector<1x1x16x128xf32>
    %38 = vector.shape_cast %37 : vector<1x1x16x128xf32> to vector<16x128xf32>
    %39 = vector.shape_cast %36 : vector<16x128xf32> to vector<1x1x16x128xf32>
    tpu.vector_store %arg3[%c0_31, %c14, %c0_32, %c0_33], %39 {strides = array<i32>} : memref<1x20x16x128xf32, #tpu.memory_space<vmem>>, vector<1x1x16x128xf32>,
    %cst_34 = arith.constant 804.247741 : f32
    %40 = vector.broadcast %cst_34 : f32 to vector<16x128xf32>
    %41 = arith.mulf %26, %40 : vector<16x128xf32>
    %42 = math.sin %41 : vector<16x128xf32>
    %c0_35 = arith.constant 0 : index
    %c7 = arith.constant 7 : index
    %c0_36 = arith.constant 0 : index
    %c0_37 = arith.constant 0 : index
    %43 = vector.load %arg3[%c0_35, %c7, %c0_36, %c0_37] : memref<1x20x16x128xf32, #tpu.memory_space<vmem>>, vector<1x1x16x128xf32>
    %44 = vector.shape_cast %43 : vector<1x1x16x128xf32> to vector<16x128xf32>
    %45 = vector.shape_cast %42 : vector<16x128xf32> to vector<1x1x16x128xf32>
    tpu.vector_store %arg3[%c0_35, %c7, %c0_36, %c0_37], %45 {strides = array<i32>} : memref<1x20x16x128xf32, #tpu.memory_space<vmem>>, vector<1x1x16x128xf32>,
    %46 = math.cos %41 : vector<16x128xf32>
    %c0_38 = arith.constant 0 : index
    %c15 = arith.constant 15 : index
    %c0_39 = arith.constant 0 : index
    %c0_40 = arith.constant 0 : index
    %47 = vector.load %arg3[%c0_38, %c15, %c0_39, %c0_40] : memref<1x20x16x128xf32, #tpu.memory_space<vmem>>, vector<1x1x16x128xf32>
    %48 = vector.shape_cast %47 : vector<1x1x16x128xf32> to vector<16x128xf32>
    %49 = vector.shape_cast %46 : vector<16x128xf32> to vector<1x1x16x128xf32>
    tpu.vector_store %arg3[%c0_38, %c15, %c0_39, %c0_40], %49 {strides = array<i32>} : memref<1x20x16x128xf32, #tpu.memory_space<vmem>>, vector<1x1x16x128xf32>,
    %c0_41 = arith.constant 0 : index
    %c2 = arith.constant 2 : index
    %c0_42 = arith.constant 0 : index
    %c0_43 = arith.constant 0 : index
    %50 = vector.load %arg2[%c0_41, %c2, %c0_42, %c0_43] : memref<1x4x16x128xf32, #tpu.memory_space<vmem>>, vector<1x1x16x128xf32>
    %51 = vector.shape_cast %50 : vector<1x1x16x128xf32> to vector<16x128xf32>
    %c0_44 = arith.constant 0 : index
    %c2_45 = arith.constant 2 : index
    %c0_46 = arith.constant 0 : index
    %c0_47 = arith.constant 0 : index
    %52 = vector.load %arg3[%c0_44, %c2_45, %c0_46, %c0_47] : memref<1x20x16x128xf32, #tpu.memory_space<vmem>>, vector<1x1x16x128xf32>
    %53 = vector.shape_cast %52 : vector<1x1x16x128xf32> to vector<16x128xf32>
    %54 = vector.shape_cast %51 : vector<16x128xf32> to vector<1x1x16x128xf32>
    tpu.vector_store %arg3[%c0_44, %c2_45, %c0_46, %c0_47], %54 {strides = array<i32>} : memref<1x20x16x128xf32, #tpu.memory_space<vmem>>, vector<1x1x16x128xf32>,
    %cst_48 = arith.constant 402.123871 : f32
    %55 = vector.broadcast %cst_48 : f32 to vector<16x128xf32>
    %56 = arith.mulf %51, %55 : vector<16x128xf32>
    %57 = math.sin %56 : vector<16x128xf32>
    %c0_49 = arith.constant 0 : index
    %c8 = arith.constant 8 : index
    %c0_50 = arith.constant 0 : index
    %c0_51 = arith.constant 0 : index
    %58 = vector.load %arg3[%c0_49, %c8, %c0_50, %c0_51] : memref<1x20x16x128xf32, #tpu.memory_space<vmem>>, vector<1x1x16x128xf32>
    %59 = vector.shape_cast %58 : vector<1x1x16x128xf32> to vector<16x128xf32>
    %60 = vector.shape_cast %57 : vector<16x128xf32> to vector<1x1x16x128xf32>
    tpu.vector_store %arg3[%c0_49, %c8, %c0_50, %c0_51], %60 {strides = array<i32>} : memref<1x20x16x128xf32, #tpu.memory_space<vmem>>, vector<1x1x16x128xf32>,
    %61 = math.cos %56 : vector<16x128xf32>
    %c0_52 = arith.constant 0 : index
    %c16 = arith.constant 16 : index
    %c0_53 = arith.constant 0 : index
    %c0_54 = arith.constant 0 : index
    %62 = vector.load %arg3[%c0_52, %c16, %c0_53, %c0_54] : memref<1x20x16x128xf32, #tpu.memory_space<vmem>>, vector<1x1x16x128xf32>
    %63 = vector.shape_cast %62 : vector<1x1x16x128xf32> to vector<16x128xf32>
    %64 = vector.shape_cast %61 : vector<16x128xf32> to vector<1x1x16x128xf32>
    tpu.vector_store %arg3[%c0_52, %c16, %c0_53, %c0_54], %64 {strides = array<i32>} : memref<1x20x16x128xf32, #tpu.memory_space<vmem>>, vector<1x1x16x128xf32>,
    %cst_55 = arith.constant 804.247741 : f32
    %65 = vector.broadcast %cst_55 : f32 to vector<16x128xf32>
    %66 = arith.mulf %51, %65 : vector<16x128xf32>
    %67 = math.sin %66 : vector<16x128xf32>
    %c0_56 = arith.constant 0 : index
    %c9 = arith.constant 9 : index
    %c0_57 = arith.constant 0 : index
    %c0_58 = arith.constant 0 : index
    %68 = vector.load %arg3[%c0_56, %c9, %c0_57, %c0_58] : memref<1x20x16x128xf32, #tpu.memory_space<vmem>>, vector<1x1x16x128xf32>
    %69 = vector.shape_cast %68 : vector<1x1x16x128xf32> to vector<16x128xf32>
    %70 = vector.shape_cast %67 : vector<16x128xf32> to vector<1x1x16x128xf32>
    tpu.vector_store %arg3[%c0_56, %c9, %c0_57, %c0_58], %70 {strides = array<i32>} : memref<1x20x16x128xf32, #tpu.memory_space<vmem>>, vector<1x1x16x128xf32>,
    %71 = math.cos %66 : vector<16x128xf32>
    %c0_59 = arith.constant 0 : index
    %c17 = arith.constant 17 : index
    %c0_60 = arith.constant 0 : index
    %c0_61 = arith.constant 0 : index
    %72 = vector.load %arg3[%c0_59, %c17, %c0_60, %c0_61] : memref<1x20x16x128xf32, #tpu.memory_space<vmem>>, vector<1x1x16x128xf32>
    %73 = vector.shape_cast %72 : vector<1x1x16x128xf32> to vector<16x128xf32>
    %74 = vector.shape_cast %71 : vector<16x128xf32> to vector<1x1x16x128xf32>
    tpu.vector_store %arg3[%c0_59, %c17, %c0_60, %c0_61], %74 {strides = array<i32>} : memref<1x20x16x128xf32, #tpu.memory_space<vmem>>, vector<1x1x16x128xf32>,
    %c0_62 = arith.constant 0 : index
    %c3 = arith.constant 3 : index
    %c0_63 = arith.constant 0 : index
    %c0_64 = arith.constant 0 : index
    %75 = vector.load %arg2[%c0_62, %c3, %c0_63, %c0_64] : memref<1x4x16x128xf32, #tpu.memory_space<vmem>>, vector<1x1x16x128xf32>
    %76 = vector.shape_cast %75 : vector<1x1x16x128xf32> to vector<16x128xf32>
    %c0_65 = arith.constant 0 : index
    %c3_66 = arith.constant 3 : index
    %c0_67 = arith.constant 0 : index
    %c0_68 = arith.constant 0 : index
    %77 = vector.load %arg3[%c0_65, %c3_66, %c0_67, %c0_68] : memref<1x20x16x128xf32, #tpu.memory_space<vmem>>, vector<1x1x16x128xf32>
    %78 = vector.shape_cast %77 : vector<1x1x16x128xf32> to vector<16x128xf32>
    %79 = vector.shape_cast %76 : vector<16x128xf32> to vector<1x1x16x128xf32>
    tpu.vector_store %arg3[%c0_65, %c3_66, %c0_67, %c0_68], %79 {strides = array<i32>} : memref<1x20x16x128xf32, #tpu.memory_space<vmem>>, vector<1x1x16x128xf32>,
    %cst_69 = arith.constant 402.123871 : f32
    %80 = vector.broadcast %cst_69 : f32 to vector<16x128xf32>
    %81 = arith.mulf %76, %80 : vector<16x128xf32>
    %82 = math.sin %81 : vector<16x128xf32>
    %c0_70 = arith.constant 0 : index
    %c10 = arith.constant 10 : index
    %c0_71 = arith.constant 0 : index
    %c0_72 = arith.constant 0 : index
    %83 = vector.load %arg3[%c0_70, %c10, %c0_71, %c0_72] : memref<1x20x16x128xf32, #tpu.memory_space<vmem>>, vector<1x1x16x128xf32>
    %84 = vector.shape_cast %83 : vector<1x1x16x128xf32> to vector<16x128xf32>
    %85 = vector.shape_cast %82 : vector<16x128xf32> to vector<1x1x16x128xf32>
    tpu.vector_store %arg3[%c0_70, %c10, %c0_71, %c0_72], %85 {strides = array<i32>} : memref<1x20x16x128xf32, #tpu.memory_space<vmem>>, vector<1x1x16x128xf32>,
    %86 = math.cos %81 : vector<16x128xf32>
    %c0_73 = arith.constant 0 : index
    %c18 = arith.constant 18 : index
    %c0_74 = arith.constant 0 : index
    %c0_75 = arith.constant 0 : index
    %87 = vector.load %arg3[%c0_73, %c18, %c0_74, %c0_75] : memref<1x20x16x128xf32, #tpu.memory_space<vmem>>, vector<1x1x16x128xf32>
    %88 = vector.shape_cast %87 : vector<1x1x16x128xf32> to vector<16x128xf32>
    %89 = vector.shape_cast %86 : vector<16x128xf32> to vector<1x1x16x128xf32>
    tpu.vector_store %arg3[%c0_73, %c18, %c0_74, %c0_75], %89 {strides = array<i32>} : memref<1x20x16x128xf32, #tpu.memory_space<vmem>>, vector<1x1x16x128xf32>,
    %cst_76 = arith.constant 804.247741 : f32
    %90 = vector.broadcast %cst_76 : f32 to vector<16x128xf32>
    %91 = arith.mulf %76, %90 : vector<16x128xf32>
    %92 = math.sin %91 : vector<16x128xf32>
    %c0_77 = arith.constant 0 : index
    %c11 = arith.constant 11 : index
    %c0_78 = arith.constant 0 : index
    %c0_79 = arith.constant 0 : index
    %93 = vector.load %arg3[%c0_77, %c11, %c0_78, %c0_79] : memref<1x20x16x128xf32, #tpu.memory_space<vmem>>, vector<1x1x16x128xf32>
    %94 = vector.shape_cast %93 : vector<1x1x16x128xf32> to vector<16x128xf32>
    %95 = vector.shape_cast %92 : vector<16x128xf32> to vector<1x1x16x128xf32>
    tpu.vector_store %arg3[%c0_77, %c11, %c0_78, %c0_79], %95 {strides = array<i32>} : memref<1x20x16x128xf32, #tpu.memory_space<vmem>>, vector<1x1x16x128xf32>,
    %96 = math.cos %91 : vector<16x128xf32>
    %c0_80 = arith.constant 0 : index
    %c19 = arith.constant 19 : index
    %c0_81 = arith.constant 0 : index
    %c0_82 = arith.constant 0 : index
    %97 = vector.load %arg3[%c0_80, %c19, %c0_81, %c0_82] : memref<1x20x16x128xf32, #tpu.memory_space<vmem>>, vector<1x1x16x128xf32>
    %98 = vector.shape_cast %97 : vector<1x1x16x128xf32> to vector<16x128xf32>
    %99 = vector.shape_cast %96 : vector<16x128xf32> to vector<1x1x16x128xf32>
    tpu.vector_store %arg3[%c0_80, %c19, %c0_81, %c0_82], %99 {strides = array<i32>} : memref<1x20x16x128xf32, #tpu.memory_space<vmem>>, vector<1x1x16x128xf32>,
    return
  }
  func.func @transform_0(%arg0: i32, %arg1: i32) -> (i32, i32, i32, i32) {
    %c0_i32 = arith.constant 0 : i32
    %c0_i32_0 = arith.constant 0 : i32
    %c0_i32_1 = arith.constant 0 : i32
    return %arg0, %c0_i32, %arg1, %c0_i32_0 : i32, i32, i32, i32
  }
  func.func @transform_1(%arg0: i32, %arg1: i32) -> (i32, i32, i32, i32) {
    %c0_i32 = arith.constant 0 : i32
    %c0_i32_0 = arith.constant 0 : i32
    %c0_i32_1 = arith.constant 0 : i32
    return %arg0, %c0_i32, %arg1, %c0_i32_0 : i32, i32, i32, i32
  }
}

</mosaic_0001>

<bundles_post_ra>
// kernel: tpu_custom_call.1
= control target key start
LH: loop header
LB: loop body
LE: loop exit
PB: predicated region body
PF: predicated region fallthrough
CT: control target
= control target key end

     0   :  { %6 = vsyncpa [#allocation3], 0  ;;  %s8020_s0 = inlined_call_operand.hbm [shape: f32[2,4,16,128], index: 0, kind: input, shape index: {}]   ;;  %s8021_s1 = inlined_call_operand.hbm [shape: f32[2,20,16,128], index: 1, kind: output, shape index: {}]  }
   0x1   :  { %8 = vsyncpa [#allocation3 + $0x1], 0 }
   0x2   :  { %9 = vsyncpa [#allocation4], 0 }
   0x3   :  { %11 = vsyncpa [#allocation4 + $0x1], 0  ;;  %s5655_s6 = smov 0   ;;  %s5657_s7 = smov 0  }
   0x4   :  { %s5659_s8 = smov 0   ;;  %s5661_s9 = smov 0  }
   0x5   :  { %s5663_s10 = smov 0   ;;  %s5665_s11 = smov 0  }
   0x6 LB: > { %s5292_s12 = sadd.s32 4294967295, %s5632_s11   ;;  %s5293_s13 = sadd.s32 4294967294, %s5632_s11   ;;  %s5632_s11 = sphi %s5665_s11, %s17_s11   ;;  %s5628_s10 = sphi %s5663_s10, %s8056_s10   ;;  %s5624_s9 = sphi %s5661_s9, %s8055_s9   ;;  %s5620_s8 = sphi %s5659_s8, %s8054_s8   ;;  %s5616_s7 = sphi %s5657_s7, %s8053_s7   ;;  %s5612_s6 = sphi %s5655_s6, %s8052_s6  }
   0x7   : > { %s29_s14 = sadd.s32 1, %s5628_s10  ;;  %s38_s15 = sadd.s32 1, %s5620_s8 }
   0x8   : > { %p31_p0 = scmp.ge.s32.totalorder %s29_s14, 2  ;;  %p45_p1 = scmp.ne.s32.totalorder %s5620_s8, %s5616_s7 }
   0x9   : > { %p46_p2 = scmp.eq.s32.totalorder %s5632_s11, 0  ;;  %p51_p3 = scmp.ne.s32.totalorder %s5616_s7, %s5612_s6 }
   0xa   : > { %s8058_s14 = smov (%p31_p0, %s29_s14), 0  ;;  %p52_p5 = scmp.eq.s32.totalorder %s5292_s12, 0 }
   0xb   : > { %p5696_p4 = por %p46_p2, %p45_p1  ;;  %s33_s17 = ssub.s32 %s5628_s10, %s8058_s14 }
   0xc   : > { %p77_p6 = scmp.eq.s32.totalorder %s5292_s12, 1  ;;  %p36_p7 = scmp.eq.s32.totalorder %s33_s17, 0 }
   0xd   : > { %p5702_p8 = por %p52_p5, %p51_p3  ;;  %p83_p10 = scmp.eq.s32.totalorder %s5293_s13, 1 }
   0xe   : > { %p5706_p9 = por %p77_p6, %p45_p1  ;;  %p5295_p12 = scmp.ge.s32.totalorder %s5632_s11, 2 }
   0xf   : > { %s5711_s20 = scalar_select %p36_p7, %s5620_s8, %s38_s15  }
  0x10   : > { %p5713_p11 = por %p83_p10, %p51_p3  ;;  %p5459_p13 = scmp.lt.s32.totalorder %s5632_s11, 2 }
  0x11   : > { %s103_s22 = sand.u32 1, %s5620_s8   ;;  %s5444_s24 = sshll.u32 %s5628_s10, 6 }
  0x12   : > { %s5296_s23 = sshll.u32 %s103_s22, 6  ;;  %s114_s27 = scalar_lea.hbm %s8020_s0, %s5444_s24 }
  0x13   : > { %s107_s28 = scalar_lea.vmem [#allocation2], %s5296_s23  ;;  %s115_s30 = sshll.u32 %s114_s27, 4  ;;  %s116_s30 = int_to_ptr.hbm [resolvable:$true] %s115_s30 }
  0x14   : > { %s117_s29 = sshll.u32 %s107_s28, 4  ;;  %p5452_p0 = pnand %p5459_p13, %p5696_p4  ;;  %s118_s29 = int_to_ptr.vmem [resolvable:$true] %s117_s29 }
  0x15   : > { %p5299_p1 = scmp.ge.s32.totalorder %s5632_s11, 1  ;;  %s104_s2 = scalar_lea.sflag [#allocation3], %s103_s22 }
  0x16   : > { %s5634_s3 = smov 128   ;;  %s5635_s4 = smov 8  }
  0x17   : > { %5454 = dma.hbm_to_vmem [thread:$0]  (!%p5452_p0), %s116_s30, 1024, %s118_s29, %s104_s2, %s5634_s3, %s5634_s3, %s5635_s4  }
  0x18   : > { %p125_p2 = scmp.lt.s32.totalorder %s5632_s11, 3 }
  0x1a   : > { %p126_p3 = pnand %p5299_p1, %p125_p2 }
  0x1b   : > { %s5729_s5 = sand.u32 (!%p126_p3), 1, %s5616_s7  }
  0x1c   : > { %129 = sbr.rel (%p126_p3) target bundleno = 708 (0x2c4), region = 24  ;;  %s5300_s12 = sshll.u32 (!%p126_p3), %s5729_s5, 6 }
  0x1d   : > { %s132_s13 = scalar_lea.sflag (!%p126_p3), [#allocation3], %s5729_s5  ;;  %s5733_s15 = scalar_lea.vmem (!%p126_p3), [#allocation2], %s5300_s12 }
  0x21   : > { %5603 = dma.done.wait (%p5702_p8), %s132_s13, 1024  }
  0x22   : > { %5605 = vsyncadd (%p5702_p8), %s132_s13, 4294966272  ;;  %s5445_s16 = smul.u32 320, %s5729_s5  ;;  %v157_v0 = vld [vmem:[%s5733_s15] sm:$0xff]  ;;  %v158_v1 = vld [vmem:[%s5733_s15 + $0x8] sm:$0xff]  ;;  %v5636_v34 = vmov 683565275  }
  0x23   : > { %v5745_v2 = vmul.f32 402.12387, %v157_v0  ;;  %v5747_v3 = vmul.f32 804.24774, %v157_v0  ;;  %v5749_v4 = vmul.f32 402.12387, %v158_v1 }
  0x24   : > { %s5742_s17 = scalar_lea.vmem [#allocation5], %s5445_s16  ;;  %v5752_v5 = vmul.f32 804.24774, %v158_v1  ;;  %v5637_v36 = vmov 2475754826   ;;  %s5446_s18 = smul.u32 320, %s5624_s9 }
  0x25   : > { %159 = vst [vmem:[%s5742_s17] sm:$0xff] %v157_v0  ;;  %v166_v6 = vand.u32 2139095040, %v5745_v2  ;;  %v792_v7 = vand.u32 2139095040, %v5747_v3  ;;  %v321_v8 = vand.u32 2139095040, %v5749_v4  ;;  %v163_v9 = vand.u32 2147483647, %v5745_v2  ;;  %s5202_s9 = sshll.u32 %s5742_s17, 4  ;;  %s5203_s9 = int_to_ptr.vmem [resolvable:$true] %s5202_s9 }
  0x26   : > { %160 = vst [vmem:[%s5742_s17 + $0x8] sm:$0xff] %v158_v1  ;;  %v947_v12 = vand.u32 2139095040, %v5752_v5  ;;  %v318_v17 = vand.u32 2147483647, %v5749_v4  ;;  %v5638_v38 = vmov 2131351028   ;;  %s5201_s24 = scalar_lea.hbm %s8021_s1, %s5446_s18 }
  0x27   : > { %v167_v10 = vshrl.u32 %v166_v6, 23  ;;  %v322_v11 = vshrl.u32 %v321_v8, 23  ;;  %v170_v13 = vand.u32 8388607, %v163_v9  ;;  %v793_v15 = vshrl.u32 %v792_v7, 23  ;;  %s5204_s25 = sshll.u32 %s5201_s24, 4  ;;  %s5205_s25 = int_to_ptr.hbm [resolvable:$true] %s5204_s25 }
  0x28   : > { %v948_v21 = vshrl.u32 %v947_v12, 23  ;;  %v325_v23 = vand.u32 8388607, %v318_v17  ;;  %v5639_v44 = vmov 2102212464   ;;  %s5188_s26 = scalar_lea.sflag [#allocation4], %s5729_s5 }
  0x29   : > { %v5301_v14 = vadd.s32 4294967169, %v167_v10  ;;  %v5304_v16 = vadd.s32 4294967169, %v322_v11  ;;  %v171_v20 = vor.u32 8388608, %v170_v13  ;;  %v5317_v22 = vadd.s32 4294967169, %v793_v15  ;;  %s5564_s27 = sshra.s32 %s5205_s25, 4  ;;  %s5570_s2 = scalar_lea.hbm %s8021_s1, 640  ;;  %s5565_s27 = int_to_ptr.hbm [resolvable:$true] %s5564_s27 }
  0x2a   : > { %v5766_v28 = vadd.s32 4294967169, %v948_v21  ;;  %v326_v32 = vor.u32 8388608, %v325_v23  ;;  %v5640_v47 = vmov 920167782   ;;  %v5641_v52 = vmov 1326507024   ;;  %p5571_p7 = scmp.lt.s32.totalorder %s5565_s27, %s8021_s1 }
  0x2b   : > { %v173_v18 = vadd.s32 1, %v5301_v14  ;;  %v328_v19 = vadd.s32 1, %v5304_v16  ;;  %v5764_v27 = vshll.u32 %v171_v20, 8  ;;  %v5768_v31 = vadd.s32 1, %v5317_v22  ;;  %s5566_s28 = scalar_lea.hbm %s5565_s27, 320 }
  0x2c   : > { %v5791_v11 = vshll.u32 %v326_v32, 8  ;;  %p5567_p4 = scmp.ne.s32.totalorder %s5565_s27, %s5566_s28  ;;  %p5572_p8 = scmp.lt.s32.totalorder %s5570_s2, %s5566_s28 }
  0x2d   : > { %vm174_vm0 = vcmp.gt.s32.totalorder %v173_v18, 0  ;;  %vm329_vm1 = vcmp.gt.s32.totalorder %v328_v19, 0  ;;  %v212_v43 = vand.u32 65535, %v5764_v27  ;;  %v213_v6 = vshrl.u32 %v5764_v27, 16 }
  0x2e   : > { %v175_v24 = vsel %vm174_vm0, %v173_v18, 0  ;;  %v330_v26 = vsel %vm329_vm1, %v328_v19, 0  ;;  %vm800_vm14 = vcmp.gt.s32.totalorder %v5768_v31, 0  ;;  %p5568_p5 = pnand %p5567_p4, %p5706_p9  ;;  %p5573_p10 = por %p5572_p8, %p5571_p7 }
  0x2f   : > { %v177_v25 = vand.u32 31, %v175_v24  ;;  %v176_v29 = vshrl.u32 %v175_v24, 5  ;;  %v5770_v33 = vand.u32 31, %v330_v26  ;;  %v5788_v7 = vshrl.u32 %v330_v26, 5 }
  0x30   : > { %p5569_p6 = pneg %p5568_p5 }
  0x31   : > { %v178_v30 = vsub.s32 32, %v177_v25  ;;  %v180_v35 = vshll.u32 %v5636_v34, %v177_v25  ;;  %v183_v37 = vshll.u32 %v5637_v36, %v177_v25  ;;  %v186_v39 = vshll.u32 %v5638_v38, %v177_v25 }
  0x32   : > { %v189_v46 = vshll.u32 %v5639_v44, %v177_v25  ;;  %v192_v49 = vshll.u32 %v5640_v47, %v177_v25  ;;  %vm195_vm2 = vcmp.lt.s32.totalorder %v176_v29, 1  ;;  %v5785_v54 = vsub.s32 32, %v5770_v33  ;;  %p5574_p13 = pnand %p5573_p10, %p5569_p6 }
  0x33   : > { %v179_v40 = vshrl.u32 %v5636_v34, %v178_v30  ;;  %v181_v41 = vshrl.u32 %v5637_v36, %v178_v30  ;;  %v184_v42 = vshrl.u32 %v5638_v38, %v178_v30  ;;  %v187_v45 = vshrl.u32 %v5639_v44, %v178_v30 }
  0x34   : > { %v190_v48 = vshrl.u32 %v5640_v47, %v178_v30  ;;  %v193_v53 = vshrl.u32 %v5641_v52, %v178_v30  ;;  %vm197_vm3 = vcmp.lt.s32.totalorder %v176_v29, 3  ;;  %vm196_vm4 = vcmp.lt.s32.totalorder %v176_v29, 2 }
  0x35   : > { %v182_v50 = vor.u32 %v181_v41, %v180_v35  ;;  %v185_v51 = vor.u32 %v184_v42, %v183_v37  ;;  %v188_v55 = vor.u32 %v187_v45, %v186_v39  ;;  %vm198_vm5 = vcmp.lt.s32.totalorder %v176_v29, 4 }
  0x36   : > { %v191_v56 = vor.u32 %v190_v48, %v189_v46  ;;  %v194_v57 = vor.u32 %v193_v53, %v192_v49  ;;  %v335_v19 = vshll.u32 %v5636_v34, %v5770_v33  ;;  %v336_v20 = vshrl.u32 %v5637_v36, %v5785_v54 }
  0x37   : > { %v203_v58 = vsel %vm195_vm2, %v182_v50, %v185_v51  ;;  %v199_v59 = vsel %vm195_vm2, %v179_v40, %v182_v50  ;;  %v200_v60 = vsel %vm198_vm5, %v188_v55, 2102212464  ;;  %v207_v62 = vsel %vm195_vm2, %v185_v51, %v188_v55 }
  0x38   : > { %v204_v61 = vsel %vm198_vm5, %v191_v56, 920167782  ;;  %v201_v63 = vsel %vm197_vm3, %v185_v51, %v200_v60  ;;  %v208_v1 = vsel %vm198_vm5, %v194_v57, 1326507024  ;;  %v338_v24 = vshll.u32 %v5637_v36, %v5770_v33 }
  0x39   : > { %v205_v0 = vsel %vm197_vm3, %v188_v55, %v204_v61  ;;  %v209_v10 = vsel %vm197_vm3, %v191_v56, %v208_v1  ;;  %v5794_v12 = vsel %vm196_vm4, %v199_v59, %v201_v63  ;;  %v339_v49 = vshrl.u32 %v5638_v38, %v5785_v54 }
  0x3a   : > { %v206_v8 = vsel %vm196_vm4, %v203_v58, %v205_v0  ;;  %v210_v13 = vsel %vm196_vm4, %v207_v62, %v209_v10  ;;  %v5642_v51 = vmov 0   ;;  %v5806_v53 = vor.u32 %v336_v20, %v335_v19 }
  0x3b   : > { %v236_v14 = vand.u32 65535, %v206_v8  ;;  %v237_v15 = vshrl.u32 %v206_v8, 16  ;;  %v214_v16 = vand.u32 65535, %v210_v13  ;;  %v215_v18 = vshrl.u32 %v210_v13, 16 }
  0x3c   : > { %v341_v57 = vshll.u32 %v5638_v38, %v5770_v33  ;;  %v5812_v60 = vor.u32 %v339_v49, %v338_v24  ;;  %v342_v63 = vshrl.u32 %v5639_v44, %v5785_v54  ;;  %v344_v0 = vshll.u32 %v5639_v44, %v5770_v33 }
  0x3d   : > { %v238_v21 = vmul.u32 %v236_v14, %v212_v43  ;;  %v239_v22 = vmul.u32 %v237_v15, %v212_v43  ;;  %v240_v23 = vmul.u32 %v236_v14, %v213_v6  ;;  %v216_v25 = vmul.u32 %v214_v16, %v212_v43 }
  0x3e   : > { %v217_v26 = vmul.u32 %v215_v18, %v212_v43  ;;  %v218_v29 = vmul.u32 %v214_v16, %v213_v6  ;;  %v241_v30 = vmul.u32 %v237_v15, %v213_v6  ;;  %v219_v32 = vmul.u32 %v215_v18, %v213_v6 }
  0x3f   : > { %v242_v35 = vshll.u32 %v239_v22, 16  ;;  %v243_v37 = vshrl.u32 %v239_v22, 16  ;;  %v244_v39 = vshll.u32 %v240_v23, 16  ;;  %v245_v45 = vshrl.u32 %v240_v23, 16 }
  0x40   : > { %v220_v40 = vshll.u32 %v217_v26, 16  ;;  %v221_v41 = vshrl.u32 %v217_v26, 16  ;;  %v222_v42 = vshll.u32 %v218_v29, 16  ;;  %v223_v46 = vshrl.u32 %v218_v29, 16 }
  0x41   : > { %vm246_vm6 = vc.u32 %v238_v21, %v242_v35  ;;  %v248_v48 = vadd.s32 %v242_v35, %v238_v21  ;;  %v345_v6 = vshrl.u32 %v5640_v47, %v5785_v54  ;;  %v347_v8 = vshll.u32 %v5640_v47, %v5770_v33 }
  0x42   : > { %vm224_vm7 = vc.u32 %v216_v25, %v220_v40  ;;  %v226_v50 = vadd.s32 %v220_v40, %v216_v25  ;;  %v247_v43 = vsel %vm246_vm6, 1, %v5642_v51  ;;  %v348_v10 = vshrl.u32 %v5641_v52, %v5785_v54 }
  0x43   : > { %v225_v55 = vsel %vm224_vm7, 1, %v5642_v51  ;;  %v249_v56 = vadd.s32 %v247_v43, %v241_v30  ;;  %vm250_vm8 = vc.u32 %v248_v48, %v244_v39  ;;  %v5825_v13 = vadd.s32 %v248_v48, %v244_v39 }
  0x44   : > { %v227_v58 = vadd.s32 %v225_v55, %v219_v32  ;;  %vm228_vm9 = vc.u32 %v226_v50, %v222_v42  ;;  %v251_v59 = vsel %vm250_vm8, 1, %v5642_v51  ;;  %v343_v15 = vor.u32 %v342_v63, %v341_v57 }
  0x45   : > { %v229_v61 = vsel %vm228_vm9, 1, %v5642_v51  ;;  %v253_v62 = vadd.s32 %v251_v59, %v249_v56  ;;  %vm350_vm10 = vcmp.lt.s32.totalorder %v5788_v7, 1  ;;  %v346_v18 = vor.u32 %v345_v6, %v344_v0 }
  0x46   : > { %v231_v1 = vadd.s32 %v229_v61, %v227_v58  ;;  %v349_v19 = vor.u32 %v348_v10, %v347_v8  ;;  %vm352_vm11 = vcmp.lt.s32.totalorder %v5788_v7, 3  ;;  %vm351_vm12 = vcmp.lt.s32.totalorder %v5788_v7, 2 }
  0x47   : > { %v254_v14 = vadd.s32 %v253_v62, %v243_v37  ;;  %vm353_vm13 = vcmp.lt.s32.totalorder %v5788_v7, 4  ;;  %v358_v33 = vsel %vm350_vm10, %v5806_v53, %v5812_v60  ;;  %v256_v22 = vmul.u32 %v5764_v27, %v5794_v12 }
  0x48   : > { %v232_v16 = vadd.s32 %v231_v1, %v221_v41  ;;  %v359_v23 = vsel %vm353_vm13, %v346_v18, 920167782  ;;  %v362_v26 = vsel %vm350_vm10, %v5812_v60, %v343_v15  ;;  %v363_v29 = vsel %vm353_vm13, %v349_v19, 1326507024 }
  0x49   : > { %v255_v20 = vadd.s32 %v254_v14, %v245_v45  ;;  %v360_v25 = vsel %vm352_vm11, %v343_v15, %v359_v23  ;;  %v954_v30 = vadd.s32 1, %v5766_v28  ;;  %v364_v32 = vsel %vm352_vm11, %v346_v18, %v363_v29 }
  0x4a   : > { %v5835_v21 = vadd.s32 %v232_v16, %v223_v46  ;;  %v361_v27 = vsel %vm351_vm12, %v358_v33, %v360_v25  ;;  %v367_v35 = vand.u32 65535, %v5791_v11  ;;  %v368_v37 = vshrl.u32 %v5791_v11, 16 }
  0x4b   : > { %v259_v24 = vadd.s32 1, %v255_v20  ;;  %v365_v40 = vsel %vm351_vm12, %v362_v26, %v364_v32  ;;  %v391_v41 = vand.u32 65535, %v361_v27  ;;  %v392_v28 = vshrl.u32 %v361_v27, 16 }
  0x4c   : > { %vm258_vm15 = vc.u32 %v5835_v21, %v5825_v13  ;;  %v801_v42 = vsel %vm800_vm14, %v5768_v31, 0  ;;  %v369_v45 = vand.u32 65535, %v365_v40  ;;  %v370_v46 = vshrl.u32 %v365_v40, 16 }
  0x4d   : > { %v260_v12 = vsel %vm258_vm15, %v259_v24, %v255_v20  ;;  %v789_v48 = vand.u32 2147483647, %v5747_v3  ;;  %vm955_vm0 = vcmp.gt.s32.totalorder %v954_v30, 0  ;;  %v334_v50 = vshrl.u32 %v5636_v34, %v5785_v54 }
  0x4e   : > { %v261_v39 = vadd.s32 %v260_v12, %v256_v22  ;;  %v394_v43 = vmul.u32 %v392_v28, %v367_v35  ;;  %v371_v55 = vmul.u32 %v369_v45, %v367_v35  ;;  %v372_v56 = vmul.u32 %v370_v46, %v367_v35 }
  0x4f   : > { %v373_v57 = vmul.u32 %v369_v45, %v368_v37  ;;  %v393_v58 = vmul.u32 %v391_v41, %v367_v35  ;;  %v5864_v59 = vand.u32 31, %v801_v42  ;;  %v395_v62 = vmul.u32 %v391_v41, %v368_v37 }
  0x50   : > { %v262_v49 = vadd.s32 536870912, %v261_v39  ;;  %v397_v31 = vshll.u32 %v394_v43, 16  ;;  %v355_v63 = vsel %vm353_vm13, %v343_v15, 2102212464  ;;  %v374_v0 = vmul.u32 %v370_v46, %v368_v37 }
  0x51   : > { %v375_v1 = vshll.u32 %v372_v56, 16  ;;  %v377_v6 = vshll.u32 %v373_v57, 16  ;;  %v5871_v8 = vsel %vm955_vm0, %v954_v30, 0  ;;  %v354_v10 = vsel %vm350_vm10, %v334_v50, %v5806_v53 }
  0x52   : > { %v5866_v61 = vshrl.u32 %v262_v49, 30  ;;  %v396_v14 = vmul.u32 %v392_v28, %v368_v37  ;;  %v399_v18 = vshll.u32 %v395_v62, 16  ;;  %vm401_vm2 = vc.u32 %v393_v58, %v397_v31 }
  0x53   : > { %vm379_vm1 = vc.u32 %v371_v55, %v375_v1  ;;  %v381_v16 = vadd.s32 %v375_v1, %v371_v55  ;;  %v356_v15 = vsel %vm352_vm11, %v5812_v60, %v355_v63  ;;  %v402_v33 = vsel %vm401_vm2, 1, %v5642_v51 }
  0x54   : > { %v264_v54 = vshll.u32 %v5866_v61, 30  ;;  %v380_v20 = vsel %vm379_vm1, 1, %v5642_v51  ;;  %v376_v22 = vshrl.u32 %v372_v56, 16  ;;  %v403_v24 = vadd.s32 %v397_v31, %v393_v58 }
  0x55   : > { %v382_v23 = vadd.s32 %v380_v20, %v374_v0  ;;  %vm383_vm3 = vc.u32 %v381_v16, %v377_v6  ;;  %v404_v26 = vadd.s32 %v402_v33, %v396_v14  ;;  %v378_v29 = vshrl.u32 %v373_v57, 16 }
  0x56   : > { %v265_v19 = vsub.s32 %v261_v39, %v264_v54  ;;  %v384_v25 = vsel %vm383_vm3, 1, %v5642_v51  ;;  %v398_v27 = vshrl.u32 %v394_v43, 16  ;;  %vm405_vm5 = vc.u32 %v403_v24, %v399_v18 }
  0x57   : > { %v386_v30 = vadd.s32 %v384_v25, %v382_v23  ;;  %v5884_v12 = vsub.s32 32, %v5864_v59  ;;  %v357_v32 = vsel %vm351_vm12, %v354_v10, %v356_v15  ;;  %v406_v35 = vsel %vm405_vm5, 1, %v5642_v51 }
  0x58   : > { %vm266_vm4 = vcmp.lt.s32.totalorder %v265_v19, 0  ;;  %v267_v53 = vsub.s32 0, %v265_v19  ;;  %v400_v40 = vshrl.u32 %v395_v62, 16  ;;  %v408_v41 = vadd.s32 %v406_v35, %v404_v26 }
  0x59   : > { %v387_v39 = vadd.s32 %v386_v30, %v376_v22  ;;  %v5889_v28 = vshrl.u32 %v801_v42, 5  ;;  %v796_v45 = vand.u32 8388607, %v789_v48  ;;  %vm165_vm6 = vcmp.lt.s32.totalorder %v5745_v2, 0 }
  0x5a   : > { %v268_v60 = vsel %vm266_vm4, %v267_v53, %v265_v19  ;;  %v5896_v50 = vadd.s32 %v403_v24, %v399_v18  ;;  %v409_v7 = vadd.s32 %v408_v41, %v398_v27  ;;  %v5899_v43 = vand.u32 31, %v5871_v8 }
  0x5b   : > { %v269_v37 = vclz %v268_v60  ;;  %v5894_v49 = vadd.s32 %v387_v39, %v378_v29  ;;  %v257_v55 = vadd.s32 %v5825_v13, %v5835_v21  ;;  %v287_v42 = vsub.s32 4, %v5866_v61 }
  0x5c   : > { %v411_v56 = vmul.u32 %v5791_v11, %v357_v32  ;;  %v410_v57 = vadd.s32 %v409_v7, %v400_v40  ;;  %v809_v58 = vshll.u32 %v5637_v36, %v5864_v59  ;;  %v810_v62 = vshrl.u32 %v5638_v38, %v5884_v12 }
  0x5d   : > { %v5302_v46 = vadd.s32 4294967294, %v269_v37  ;;  %v812_v63 = vshll.u32 %v5638_v38, %v5864_v59  ;;  %v813_v0 = vshrl.u32 %v5639_v44, %v5884_v12  ;;  %v815_v13 = vshll.u32 %v5639_v44, %v5864_v59 }
  0x5e   : > { %vm5917_vm8 = vcmp.le.f32.partialorder %v163_v9, 0.7853982  ;;  %vm413_vm9 = vc.u32 %v5894_v49, %v5896_v50  ;;  %v414_v54 = vadd.s32 1, %v410_v57  ;;  %v816_v10 = vshrl.u32 %v5640_v47, %v5884_v12 }
  0x5f   : > { %vm5303_vm7 = vcmp.lt.s32.totalorder %v5302_v46, 0  ;;  %v818_v14 = vshll.u32 %v5640_v47, %v5864_v59  ;;  %v819_v16 = vshrl.u32 %v5641_v52, %v5884_v12  ;;  %v806_v15 = vshll.u32 %v5636_v34, %v5864_v59 }
  0x60   : > { %v272_v31 = vsel %vm5303_vm7, 0, %v5302_v46  ;;  %v415_v20 = vsel %vm413_vm9, %v414_v54, %v410_v57  ;;  %v811_v33 = vor.u32 %v810_v62, %v809_v58  ;;  %v814_v22 = vor.u32 %v813_v0, %v812_v63 }
  0x61   : > { %v273_v21 = vsub.s32 32, %v272_v31  ;;  %v274_v1 = vshll.u32 %v265_v19, %v272_v31  ;;  %v277_v6 = vsub.s32 4294967266, %v272_v31  ;;  %v807_v19 = vshrl.u32 %v5637_v36, %v5884_v12 }
  0x62   : > { %v820_v23 = vor.u32 %v819_v16, %v818_v14  ;;  %v416_v25 = vadd.s32 %v415_v20, %v411_v56  ;;  %vm821_vm10 = vcmp.lt.s32.totalorder %v5889_v28, 1  ;;  %v288_v26 = vsel %vm165_vm6, %v287_v42, %v5866_v61 }
  0x63   : > { %v275_v9 = vshrl.u32 %v257_v55, %v273_v21  ;;  %v278_v18 = vadd.s32 127, %v277_v6  ;;  %v797_v29 = vor.u32 8388608, %v796_v45  ;;  %v817_v30 = vor.u32 %v816_v10, %v815_v13  ;;  %v5951_v45 = vld [vmem:[%s5733_s15 + $0x10] sm:$0xff] }
  0x64   : > { %vm824_vm11 = vcmp.lt.s32.totalorder %v5889_v28, 4  ;;  %v417_v60 = vadd.s32 536870912, %v416_v25  ;;  %vm823_vm12 = vcmp.lt.s32.totalorder %v5889_v28, 3  ;;  %v5940_v32 = vshrl.u32 %v5871_v8, 5  ;;  %5335 = vst [vmem:[%s5742_s17 + $0x10] sm:$0xff] %v5951_v45 }
  0x65   : > { %v276_v24 = vor.u32 %v275_v9, %v274_v1  ;;  %v279_v53 = vshll.u32 %v278_v18, 23  ;;  %vm822_vm13 = vcmp.lt.s32.totalorder %v5889_v28, 2  ;;  %v833_v35 = vsel %vm821_vm10, %v811_v33, %v814_v22 }
  0x66   : > { %v834_v61 = vsel %vm824_vm11, %v820_v23, 1326507024  ;;  %v5948_v37 = vsub.s32 32, %v5899_v43  ;;  %v418_v40 = vshrl.u32 %v417_v60, 30  ;;  %v808_v41 = vor.u32 %v807_v19, %v806_v15 }
  0x67   : > { %v280_v59 = vor.u32 4788187, %v279_v53  ;;  %v283_v27 = vcvt.s32.f32 %v276_v24  ;;  %v5955_v8 = vsel %vm5917_vm8, 0, %v288_v26  ;;  %v805_v46 = vshrl.u32 %v5636_v34, %v5884_v12 }
  0x68   : > { %v835_v7 = vsel %vm823_vm12, %v817_v30, %v834_v61  ;;  %v5961_v55 = vshll.u32 %v797_v29, 8  ;;  %v419_v56 = vshll.u32 %v418_v40, 30  ;;  %v830_v57 = vsel %vm824_vm11, %v817_v30, 920167782 }
  0x69   : > { %v281_v39 = vand.u32 2147483647, %v280_v59  ;;  %v836_v58 = vsel %vm822_vm13, %v833_v35, %v835_v7  ;;  %v307_v13 = vadd.s32 3, %v5955_v8  ;;  %v829_v1 = vsel %vm821_vm10, %v808_v41, %v811_v33 }
  0x6a   : > { %v5970_v62 = vand.u32 65535, %v5961_v55  ;;  %v5973_v12 = vshrl.u32 %v5961_v55, 16  ;;  %v840_v31 = vand.u32 65535, %v836_v58  ;;  %v841_v63 = vshrl.u32 %v836_v58, 16 }
  0x6b   : > { %v284_v42 = vmul.f32 %v283_v27, %v281_v39  ;;  %v5976_v21 = vsub.s32 %v416_v25, %v419_v56  ;;  %v826_v6 = vsel %vm824_vm11, %v814_v22, 2102212464  ;;  %v831_v54 = vsel %vm823_vm12, %v814_v22, %v830_v57 }
  0x6c   : > { %v5985_v10 = vmul.u32 %v841_v63, %v5970_v62  ;;  %v5988_v14 = vmul.u32 %v840_v31, %v5973_v12  ;;  %v842_v18 = vmul.u32 %v840_v31, %v5970_v62  ;;  %vm320_vm15 = vcmp.lt.s32.totalorder %v5749_v4, 0 }
  0x6d   : > { %v285_v0 = vxor.u32 2147483648, %v284_v42  ;;  %vm421_vm14 = vcmp.lt.s32.totalorder %v5976_v21, 0  ;;  %v422_v9 = vsub.s32 0, %v5976_v21  ;;  %v442_v19 = vsub.s32 4, %v418_v40 }
  0x6e   : > { %v846_v20 = vshll.u32 %v5985_v10, 16  ;;  %v6004_v23 = vand.u32 3, %v307_v13  ;;  %v825_v53 = vsel %vm821_vm10, %v805_v46, %v808_v41  ;;  %v827_v11 = vsel %vm823_vm12, %v811_v33, %v826_v6 }
  0x6f   : > { %v286_v16 = vsel %vm165_vm6, %v285_v0, %v284_v42  ;;  %v423_v24 = vsel %vm421_vm14, %v422_v9, %v5976_v21  ;;  %v832_v26 = vsel %vm822_vm13, %v829_v1, %v831_v54  ;;  %v848_v29 = vshll.u32 %v5988_v14, 16 }
  0x70   : > { %v5998_v15 = vsel %vm5917_vm8, %v5745_v2, %v286_v16  ;;  %v424_v25 = vclz %v423_v24  ;;  %vm850_vm0 = vc.u32 %v842_v18, %v846_v20  ;;  %v852_v27 = vadd.s32 %v846_v20, %v842_v18 }
  0x71   : > { %v291_v22 = vmul.f32 %v5998_v15, %v5998_v15  ;;  %vm6016_vm1 = vcmp.le.f32.partialorder %v318_v17, 0.7853982  ;;  %v412_v35 = vadd.s32 %v5896_v50, %v5894_v49  ;;  %v443_v33 = vsel %vm320_vm15, %v442_v19, %v418_v40 }
  0x72   : > { %v5305_v61 = vadd.s32 4294967294, %v424_v25  ;;  %v845_v46 = vmul.u32 %v841_v63, %v5973_v12  ;;  %v863_v7 = vshrl.u32 %v832_v26, 16  ;;  %vm313_vm2 = vcmp.eq.s32.totalorder %v6004_v23, 2 }
  0x73   : > { %v292_v30 = vmul.f32 -0.001358992, %v291_v22  ;;  %v299_v59 = vmul.f32 -0.00019511016, %v291_v22  ;;  %v6028_v17 = vsel %vm822_vm13, %v825_v53, %v827_v11  ;;  %v851_v42 = vsel %vm850_vm0, 1, %v5642_v51 }
  0x74   : > { %vm5306_vm3 = vcmp.lt.s32.totalorder %v5305_v61, 0  ;;  %v862_v56 = vand.u32 65535, %v832_v26  ;;  %vm854_vm4 = vc.u32 %v852_v27, %v848_v29  ;;  %vm310_vm5 = vcmp.eq.s32.totalorder %v6004_v23, 0 }
  0x75   : > { %v293_v39 = vadd.f32 0.041655596, %v292_v30  ;;  %v300_v41 = vadd.f32 0.008332121, %v299_v59  ;;  %v427_v57 = vsel %vm5306_vm3, 0, %v5305_v61  ;;  %v6035_v63 = vsel %vm6016_vm1, 0, %v443_v33 }
  0x76   : > { %v428_v40 = vsub.s32 32, %v427_v57  ;;  %v429_v58 = vshll.u32 %v5976_v21, %v427_v57  ;;  %v432_v31 = vsub.s32 4294967266, %v427_v57  ;;  %vm309_vm6 = vcmp.lt.s32.totalorder %v6004_v23, 2 }
  0x77   : > { %v294_v49 = vmul.f32 %v293_v39, %v291_v22  ;;  %v301_v50 = vmul.f32 %v300_v41, %v291_v22  ;;  %v853_v13 = vadd.s32 %v851_v42, %v845_v46  ;;  %v865_v1 = vmul.u32 %v863_v7, %v5970_v62 }
  0x78   : > { %vm306_vm7 = vweird.f32 %v5745_v2  ;;  %v430_v6 = vshrl.u32 %v412_v35, %v428_v40  ;;  %v433_v54 = vadd.s32 127, %v432_v31  ;;  %v620_v16 = vand.u32 3, %v5955_v8 }
  0x79   : > { %v295_v28 = vadd.f32 -0.4999988, %v294_v49  ;;  %v302_v0 = vadd.f32 -0.16666654, %v301_v50  ;;  %v855_v21 = vsel %vm854_vm4, 1, %v5642_v51  ;;  %v847_v19 = vshrl.u32 %v5985_v10, 16 }
  0x7a   : > { %v849_v20 = vshrl.u32 %v5988_v14, 16  ;;  %v431_v24 = vor.u32 %v430_v6, %v429_v58  ;;  %v434_v53 = vshll.u32 %v433_v54, 23  ;;  %v864_v25 = vmul.u32 %v862_v56, %v5970_v62 }
  0x7b   : > { %v296_v9 = vmul.f32 %v295_v28, %v291_v22  ;;  %v303_v18 = vmul.f32 %v302_v0, %v291_v22  ;;  %v866_v11 = vmul.u32 %v862_v56, %v5973_v12  ;;  %v857_v30 = vadd.s32 %v855_v21, %v853_v13 }
  0x7c   : > { %v868_v59 = vshll.u32 %v865_v1, 16  ;;  %v435_v27 = vor.u32 4788187, %v434_v53  ;;  %v438_v8 = vcvt.s32.f32 %v431_v24  ;;  %vm625_vm8 = vcmp.eq.s32.totalorder %v620_v16, 2  ;;  %v6089_v53 = vld [vmem:[%s5733_s15 + $0x18] sm:$0xff] }
  0x7d   : > { %v297_v26 = vadd.f32 1.0, %v296_v9  ;;  %v304_v29 = vadd.f32 1.0, %v303_v18  ;;  %v867_v35 = vmul.u32 %v863_v7, %v5973_v12  ;;  %v462_v14 = vadd.s32 3, %v6035_v63  ;;  %5336 = vst [vmem:[%s5742_s17 + $0x18] sm:$0xff] %v6089_v53 }
  0x7e   : > { %vm621_vm9 = vcmp.lt.s32.totalorder %v620_v16, 2  ;;  %v436_v61 = vand.u32 2147483647, %v435_v27  ;;  %vm622_vm10 = vcmp.eq.s32.totalorder %v620_v16, 0  ;;  %v870_v62 = vshll.u32 %v866_v11, 16 }
  0x7f   : > { %v305_v22 = vmul.f32 %v304_v29, %v5998_v15  ;;  %v314_v10 = vxor.u32 2147483648, %v297_v26  ;;  %vm872_vm11 = vc.u32 %v864_v25, %v868_v59  ;;  %v858_v12 = vadd.s32 %v857_v30, %v847_v19 }
  0x80   : > { %v873_v46 = vsel %vm872_vm11, 1, %v5642_v51  ;;  %v439_v42 = vmul.f32 %v438_v8, %v436_v61  ;;  %v874_v7 = vadd.s32 %v868_v59, %v864_v25  ;;  %v869_v50 = vshrl.u32 %v865_v1, 16 }
  0x81   : > { %v311_v33 = vxor.u32 2147483648, %v305_v22  ;;  %v315_v39 = vsel %vm313_vm2, %v314_v10, %v305_v22  ;;  %v627_v41 = vsel %vm625_vm8, %v314_v10, %v305_v22  ;;  %v875_v15 = vadd.s32 %v873_v46, %v867_v35 }
  0x82   : > { %v944_v57 = vand.u32 2147483647, %v5752_v5  ;;  %v440_v58 = vxor.u32 2147483648, %v439_v42  ;;  %vm876_vm12 = vc.u32 %v874_v7, %v870_v62  ;;  %v6060_v0 = vand.u32 3, %v462_v14 }
  0x83   : > { %v312_v56 = vsel %vm310_vm5, %v297_v26, %v311_v33  ;;  %v624_v49 = vsel %vm622_vm10, %v297_v26, %v311_v33  ;;  %v877_v1 = vsel %vm876_vm12, 1, %v5642_v51  ;;  %v6068_v6 = vadd.s32 %v858_v12, %v849_v20 }
  0x84   : > { %v316_v40 = vsel %vm309_vm6, %v312_v56, %v315_v39  ;;  %v628_v31 = vsel %vm621_vm9, %v624_v49, %v627_v41  ;;  %v441_v23 = vsel %vm320_vm15, %v440_v58, %v439_v42  ;;  %v871_v54 = vshrl.u32 %v866_v11, 16 }
  0x85   : > { %v317_v28 = vsel %vm306_vm7, nan, %v316_v40  ;;  %v629_v13 = vsel %vm306_vm7, nan, %v628_v31  ;;  %v879_v16 = vadd.s32 %v877_v1, %v875_v15  ;;  %v6073_v21 = vsel %vm6016_vm1, %v5749_v4, %v441_v23 }
  0x86   : > { %5307 = vst [vmem:[%s5742_s17 + $0x40] sm:$0xff] %v317_v28  ;;  %v6076_v2 = vadd.s32 %v874_v7, %v870_v62  ;;  %v961_v9 = vshll.u32 %v5636_v34, %v5899_v43  ;;  %v962_v18 = vshrl.u32 %v5637_v36, %v5948_v37  ;;  %v446_v19 = vmul.f32 %v6073_v21, %v6073_v21 }
  0x87   : > { %5315 = vst [vmem:[%s5742_s17 + $0xc0] sm:$0xff] %v629_v13  ;;  %v880_v20 = vadd.s32 %v879_v16, %v869_v50  ;;  %v882_v24 = vmul.u32 %v5961_v55, %v6028_v17  ;;  %v951_v60 = vand.u32 8388607, %v944_v57  ;;  %v964_v25 = vshll.u32 %v5637_v36, %v5899_v43 }
  0x88   : > { %v965_v11 = vshrl.u32 %v5638_v38, %v5948_v37  ;;  %v967_v26 = vshll.u32 %v5638_v38, %v5899_v43  ;;  %v968_v29 = vshrl.u32 %v5639_v44, %v5948_v37  ;;  %v447_v55 = vmul.f32 -0.001358992, %v446_v19 }
  0x89   : > { %v454_v17 = vmul.f32 -0.00019511016, %v446_v19  ;;  %v881_v30 = vadd.s32 %v880_v20, %v871_v54  ;;  %v970_v59 = vshll.u32 %v5639_v44, %v5899_v43  ;;  %vm884_vm13 = vc.u32 %v6068_v6, %v6076_v2 }
  0x8a   : > { %v6105_v27 = vor.u32 %v962_v18, %v961_v9  ;;  %v971_v8 = vshrl.u32 %v5640_v47, %v5948_v37  ;;  %v973_v35 = vshll.u32 %v5640_v47, %v5899_v43  ;;  %v448_v22 = vadd.f32 0.041655596, %v447_v55 }
  0x8b   : > { %v455_v10 = vadd.f32 0.008332121, %v454_v17  ;;  %v885_v14 = vadd.s32 1, %v881_v30  ;;  %v974_v61 = vshrl.u32 %v5641_v52, %v5948_v37  ;;  %v6113_v62 = vor.u32 %v965_v11, %v964_v25 }
  0x8c   : > { %v6115_v33 = vor.u32 %v968_v29, %v967_v26  ;;  %v972_v39 = vor.u32 %v971_v8, %v970_v59  ;;  %vm976_vm14 = vcmp.lt.s32.totalorder %v5940_v32, 1  ;;  %v449_v41 = vmul.f32 %v448_v22, %v446_v19 }
  0x8d   : > { %v456_v46 = vmul.f32 %v455_v10, %v446_v19  ;;  %v886_v42 = vsel %vm884_vm13, %v885_v14, %v881_v30  ;;  %v975_v12 = vor.u32 %v974_v61, %v973_v35  ;;  %v952_v15 = vor.u32 8388608, %v951_v60 }
  0x8e   : > { %v887_v7 = vadd.s32 %v886_v42, %v882_v24  ;;  %vm978_vm15 = vcmp.lt.s32.totalorder %v5940_v32, 3  ;;  %vm979_vm0 = vcmp.lt.s32.totalorder %v5940_v32, 4  ;;  %v450_v43 = vadd.f32 -0.4999988, %v449_v41 }
  0x8f   : > { %v457_v56 = vadd.f32 -0.16666654, %v456_v46  ;;  %vm464_vm1 = vcmp.lt.s32.totalorder %v6060_v0, 2  ;;  %v774_v49 = vand.u32 3, %v6035_v63  ;;  %vm977_vm2 = vcmp.lt.s32.totalorder %v5940_v32, 2 }
  0x90   : > { %vm461_vm3 = vweird.f32 %v5749_v4  ;;  %v888_v50 = vadd.s32 536870912, %v887_v7  ;;  %v985_v40 = vsel %vm979_vm0, %v972_v39, 920167782  ;;  %v988_v58 = vsel %vm976_vm14, %v6113_v62, %v6115_v33 }
  0x91   : > { %v989_v31 = vsel %vm979_vm0, %v975_v12, 1326507024  ;;  %v451_v28 = vmul.f32 %v450_v43, %v446_v19  ;;  %v458_v13 = vmul.f32 %v457_v56, %v446_v19  ;;  %v984_v63 = vsel %vm976_vm14, %v6105_v27, %v6113_v62 }
  0x92   : > { %v986_v1 = vsel %vm978_vm15, %v6115_v33, %v985_v40  ;;  %vm468_vm4 = vcmp.eq.s32.totalorder %v6060_v0, 2  ;;  %v6140_v23 = vshrl.u32 %v888_v50, 30  ;;  %v990_v54 = vsel %vm978_vm15, %v972_v39, %v989_v31 }
  0x93   : > { %v6144_v16 = vshll.u32 %v952_v15, 8  ;;  %v452_v9 = vadd.f32 1.0, %v451_v28  ;;  %v459_v18 = vadd.f32 1.0, %v458_v13  ;;  %vm779_vm5 = vcmp.eq.s32.totalorder %v774_v49, 2 }
  0x94   : > { %v991_v19 = vsel %vm977_vm2, %v988_v58, %v990_v54  ;;  %v890_v20 = vshll.u32 %v6140_v23, 30  ;;  %v987_v24 = vsel %vm977_vm2, %v984_v63, %v986_v1  ;;  %vm465_vm6 = vcmp.eq.s32.totalorder %v6060_v0, 0 }
  0x95   : > { %v993_v60 = vand.u32 65535, %v6144_v16  ;;  %v994_v25 = vshrl.u32 %v6144_v16, 16  ;;  %v460_v11 = vmul.f32 %v459_v18, %v6073_v21  ;;  %v469_v26 = vxor.u32 2147483648, %v452_v9 }
  0x96   : > { %v995_v29 = vand.u32 65535, %v991_v19  ;;  %v996_v55 = vshrl.u32 %v991_v19, 16  ;;  %vm775_vm7 = vcmp.lt.s32.totalorder %v774_v49, 2  ;;  %vm776_vm8 = vcmp.eq.s32.totalorder %v774_v49, 0 }
  0x97   : > { %v891_v17 = vsub.s32 %v887_v7, %v890_v20  ;;  %v466_v30 = vxor.u32 2147483648, %v460_v11  ;;  %v470_v59 = vsel %vm468_vm4, %v469_v26, %v460_v11  ;;  %v781_v8 = vsel %vm779_vm5, %v469_v26, %v460_v11 }
  0x98   : > { %v1018_v35 = vshrl.u32 %v987_v24, 16  ;;  %v997_v10 = vmul.u32 %v995_v29, %v993_v60  ;;  %v998_v21 = vmul.u32 %v996_v55, %v993_v60  ;;  %v999_v39 = vmul.u32 %v995_v29, %v994_v25 }
  0x99   : > { %vm892_vm9 = vcmp.lt.s32.totalorder %v891_v17, 0  ;;  %v893_v22 = vsub.s32 0, %v891_v17  ;;  %v467_v14 = vsel %vm465_vm6, %v452_v9, %v466_v30  ;;  %v778_v61 = vsel %vm776_vm8, %v452_v9, %v466_v30 }
  0x9a   : > { %v1000_v41 = vmul.u32 %v996_v55, %v994_v25  ;;  %v471_v46 = vsel %vm464_vm1, %v467_v14, %v470_v59  ;;  %v782_v42 = vsel %vm775_vm7, %v778_v61, %v781_v8  ;;  %v1001_v7 = vshll.u32 %v998_v21, 16 }
  0x9b   : > { %v894_v12 = vsel %vm892_vm9, %v893_v22, %v891_v17  ;;  %v472_v15 = vsel %vm461_vm3, nan, %v471_v46  ;;  %v783_v43 = vsel %vm461_vm3, nan, %v782_v42  ;;  %v1017_v50 = vand.u32 65535, %v987_v24 }
  0x9c   : > { %v895_v56 = vclz %v894_v12  ;;  %5308 = vst [vmem:[%s5742_s17 + $0x48] sm:$0xff] %v472_v15  ;;  %v1003_v40 = vshll.u32 %v999_v39, 16  ;;  %vm1005_vm10 = vc.u32 %v997_v10, %v1001_v7  ;;  %v1007_v58 = vadd.s32 %v1001_v7, %v997_v10 }
  0x9d   : > { %5316 = vst [vmem:[%s5742_s17 + $0xc8] sm:$0xff] %v783_v43  ;;  %v1006_v0 = vsel %vm1005_vm10, 1, %v5642_v51  ;;  %v1020_v49 = vmul.u32 %v1018_v35, %v993_v60  ;;  %v960_v28 = vshrl.u32 %v5636_v34, %v5948_v37  ;;  %v883_v4 = vadd.s32 %v6076_v2, %v6068_v6 }
  0x9e   : > { %v5318_v31 = vadd.s32 4294967294, %v895_v56  ;;  %v1008_v13 = vadd.s32 %v1006_v0, %v1000_v41  ;;  %vm1009_vm11 = vc.u32 %v1007_v58, %v1003_v40  ;;  %v1021_v1 = vmul.u32 %v1017_v50, %v994_v25 }
  0x9f   : > { %v1010_v63 = vsel %vm1009_vm11, 1, %v5642_v51  ;;  %v1002_v9 = vshrl.u32 %v998_v21, 16  ;;  %v1019_v19 = vmul.u32 %v1017_v50, %v993_v60  ;;  %v1023_v26 = vshll.u32 %v1020_v49, 16 }
  0xa0   : > { %vm5319_vm12 = vcmp.lt.s32.totalorder %v5318_v31, 0  ;;  %v1012_v18 = vadd.s32 %v1010_v63, %v1008_v13  ;;  %v980_v37 = vsel %vm976_vm14, %v960_v28, %v6105_v27  ;;  %v1022_v29 = vmul.u32 %v1018_v35, %v994_v25 }
  0xa1   : > { %v898_v54 = vsel %vm5319_vm12, 0, %v5318_v31  ;;  %v981_v6 = vsel %vm979_vm0, %v6115_v33, 2102212464  ;;  %v1025_v2 = vshll.u32 %v1021_v1, 16  ;;  %v913_v59 = vsub.s32 4, %v6140_v23 }
  0xa2   : > { %v899_v20 = vsub.s32 32, %v898_v54  ;;  %v900_v24 = vshll.u32 %v891_v17, %v898_v54  ;;  %v903_v11 = vsub.s32 4294967266, %v898_v54  ;;  %v1004_v8 = vshrl.u32 %v999_v39, 16 }
  0xa3   : > { %vm1027_vm13 = vc.u32 %v1019_v19, %v1023_v26  ;;  %v1029_v60 = vadd.s32 %v1023_v26, %v1019_v19  ;;  %v1013_v10 = vadd.s32 %v1012_v18, %v1002_v9  ;;  %v1024_v14 = vshrl.u32 %v1020_v49, 16 }
  0xa4   : > { %v901_v55 = vshrl.u32 %v883_v4, %v899_v20  ;;  %v904_v30 = vadd.s32 127, %v903_v11  ;;  %v1028_v21 = vsel %vm1027_vm13, 1, %v5642_v51  ;;  %v6182_v25 = vmul.f32 402.12387, %v5951_v45 }
  0xa5   : > { %v1030_v27 = vadd.s32 %v1028_v21, %v1022_v29  ;;  %vm1031_vm14 = vc.u32 %v1029_v60, %v1025_v2  ;;  %v982_v33 = vsel %vm978_vm15, %v6113_v62, %v981_v6  ;;  %vm791_vm0 = vcmp.lt.s32.totalorder %v5747_v3, 0 }
  0xa6   : > { %v902_v17 = vor.u32 %v901_v55, %v900_v24  ;;  %v905_v22 = vshll.u32 %v904_v30, 23  ;;  %v1032_v39 = vsel %vm1031_vm14, 1, %v5642_v51  ;;  %v1026_v41 = vshrl.u32 %v1021_v1, 16 }
  0xa7   : > { %v1034_v46 = vadd.s32 %v1032_v39, %v1030_v27  ;;  %v1424_v42 = vand.u32 2139095040, %v6182_v25  ;;  %v6190_v7 = vadd.s32 %v1013_v10, %v1004_v8  ;;  %v6192_v15 = vadd.s32 %v1029_v60, %v1025_v2 }
  0xa8   : > { %v906_v35 = vor.u32 4788187, %v905_v22  ;;  %v909_v61 = vcvt.s32.f32 %v902_v17  ;;  %v6195_v43 = vmul.f32 402.12387, %v6089_v53  ;;  %v914_v62 = vsel %vm791_vm0, %v913_v59, %v6140_v23 }
  0xa9   : > { %v983_v56 = vsel %vm977_vm2, %v980_v37, %v982_v33  ;;  %v1035_v50 = vadd.s32 %v1034_v46, %v1024_v14  ;;  %v1425_v40 = vshrl.u32 %v1424_v42, 23  ;;  %vm790_vm15 = vcmp.le.f32.partialorder %v789_v48, 0.7853982 }
  0xaa   : > { %v907_v12 = vand.u32 2147483647, %v906_v35  ;;  %v1579_v31 = vand.u32 2139095040, %v6195_v43  ;;  %v6205_v13 = vsel %vm790_vm15, 0, %v914_v62  ;;  %v1037_v4 = vmul.u32 %v6144_v16, %v983_v56 }
  0xab   : > { %v1036_v0 = vadd.s32 %v1035_v50, %v1026_v41  ;;  %v5337_v49 = vadd.s32 4294967169, %v1425_v40  ;;  %vm1039_vm1 = vc.u32 %v6190_v7, %v6192_v15  ;;  %v6211_v63 = vmul.f32 804.24774, %v5951_v45 }
  0xac   : > { %v910_v58 = vmul.f32 %v909_v61, %v907_v12  ;;  %v1580_v1 = vshrl.u32 %v1579_v31, 23  ;;  %v933_v9 = vadd.s32 3, %v6205_v13  ;;  %v6223_v30 = vmul.f32 804.24774, %v6089_v53 }
  0xad   : > { %v1040_v32 = vadd.s32 1, %v1036_v0  ;;  %v1431_v23 = vadd.s32 1, %v5337_v49  ;;  %v2050_v24 = vand.u32 2139095040, %v6211_v63  ;;  %v1421_v17 = vand.u32 2147483647, %v6182_v25 }
  0xae   : > { %v911_v28 = vxor.u32 2147483648, %v910_v58  ;;  %v5340_v11 = vadd.s32 4294967169, %v1580_v1  ;;  %v6218_v29 = vand.u32 3, %v933_v9  ;;  %v1576_v22 = vand.u32 2147483647, %v6195_v43 }
  0xaf   : > { %v1041_v18 = vsel %vm1039_vm1, %v1040_v32, %v1036_v0  ;;  %vm1432_vm2 = vcmp.gt.s32.totalorder %v1431_v23, 0  ;;  %v2051_v8 = vshrl.u32 %v2050_v24, 23  ;;  %vm946_vm5 = vcmp.lt.s32.totalorder %v5752_v5, 0 }
  0xb0   : > { %v912_v54 = vsel %vm791_vm0, %v911_v28, %v910_v58  ;;  %v1042_v16 = vadd.s32 %v1041_v18, %v1037_v4  ;;  %v1433_v20 = vsel %vm1432_vm2, %v1431_v23, 0  ;;  %v1586_v60 = vadd.s32 1, %v5340_v11 }
  0xb1   : > { %v915_v48 = vsel %vm790_vm15, %v5747_v3, %v912_v54  ;;  %v6220_v55 = vand.u32 31, %v1433_v20  ;;  %vm936_vm3 = vcmp.eq.s32.totalorder %v6218_v29, 0  ;;  %vm939_vm4 = vcmp.eq.s32.totalorder %v6218_v29, 2 }
  0xb2   : > { %v917_v19 = vmul.f32 %v915_v48, %v915_v48  ;;  %v1043_v45 = vadd.s32 536870912, %v1042_v16  ;;  %vm935_vm6 = vcmp.lt.s32.totalorder %v6218_v29, 2  ;;  %v2205_v33 = vand.u32 2139095040, %v6223_v30 }
  0xb3   : > { %v6231_v53 = vsub.s32 32, %v6220_v55  ;;  %vm932_vm7 = vweird.f32 %v5747_v3  ;;  %v5353_v39 = vadd.s32 4294967169, %v2051_v8  ;;  %vm1587_vm8 = vcmp.gt.s32.totalorder %v1586_v60, 0 }
  0xb4   : > { %v918_v26 = vmul.f32 -0.001358992, %v917_v19  ;;  %v925_v37 = vmul.f32 -0.00019511016, %v917_v19  ;;  %v1044_v59 = vshrl.u32 %v1043_v45, 30  ;;  %v1038_v56 = vadd.s32 %v6192_v15, %v6190_v7 }
  0xb5   : > { %v6238_v41 = vand.u32 8388607, %v1421_v17  ;;  %v6242_v46 = vand.u32 8388607, %v1576_v22  ;;  %v1438_v40 = vshll.u32 %v5636_v34, %v6220_v55  ;;  %v1439_v58 = vshrl.u32 %v5637_v36, %v6231_v53 }
  0xb6   : > { %v919_v6 = vadd.f32 0.041655596, %v918_v26  ;;  %v926_v2 = vadd.f32 0.008332121, %v925_v37  ;;  %v1045_v14 = vshll.u32 %v1044_v59, 30  ;;  %v1068_v50 = vsub.s32 4, %v1044_v59 }
  0xb7   : > { %v1588_v28 = vsel %vm1587_vm8, %v1586_v60, 0  ;;  %v6250_v32 = vadd.s32 1, %v5353_v39  ;;  %v6252_v23 = vshrl.u32 %v2205_v33, 23  ;;  %v1429_v1 = vor.u32 8388608, %v6238_v41 }
  0xb8   : > { %v920_v10 = vmul.f32 %v919_v6, %v917_v19  ;;  %v927_v21 = vmul.f32 %v926_v2, %v917_v19  ;;  %v1046_v61 = vsub.s32 %v1042_v16, %v1045_v14  ;;  %v6255_v15 = vshrl.u32 %v1433_v20, 5 }
  0xb9   : > { %v1584_v9 = vor.u32 8388608, %v6242_v46  ;;  %vm6260_vm10 = vcmp.le.f32.partialorder %v944_v57, 0.7853982  ;;  %v1069_v16 = vsel %vm946_vm5, %v1068_v50, %v1044_v59  ;;  %v6266_v24 = vand.u32 31, %v1588_v28 }
  0xba   : > { %v921_v27 = vadd.f32 -0.4999988, %v920_v10  ;;  %v928_v35 = vadd.f32 -0.16666654, %v927_v21  ;;  %vm1047_vm9 = vcmp.lt.s32.totalorder %v1046_v61, 0  ;;  %v1048_v62 = vsub.s32 0, %v1046_v61 }
  0xbb   : > { %v6268_v11 = vor.u32 %v1439_v58, %v1438_v40  ;;  %v1441_v26 = vshll.u32 %v5637_v36, %v6220_v55  ;;  %v1442_v57 = vshrl.u32 %v5638_v38, %v6231_v53  ;;  %v1444_v37 = vshll.u32 %v5638_v38, %v6220_v55 }
  0xbc   : > { %v922_v42 = vmul.f32 %v921_v27, %v917_v19  ;;  %v929_v12 = vmul.f32 %v928_v35, %v917_v19  ;;  %v1049_v49 = vsel %vm1047_vm9, %v1048_v62, %v1046_v61  ;;  %v1445_v45 = vshrl.u32 %v5639_v44, %v6231_v53 }
  0xbd   : > { %v1050_v4 = vclz %v1049_v49  ;;  %v1447_v6 = vshll.u32 %v5639_v44, %v6220_v55  ;;  %v1246_v8 = vand.u32 3, %v6205_v13  ;;  %v1448_v60 = vshrl.u32 %v5640_v47, %v6231_v53 }
  0xbe   : > { %v923_v31 = vadd.f32 1.0, %v922_v42  ;;  %v930_v0 = vadd.f32 1.0, %v929_v12  ;;  %v1443_v33 = vor.u32 %v1442_v57, %v1441_v26  ;;  %v1450_v39 = vshll.u32 %v5640_v47, %v6220_v55 }
  0xbf   : > { %v5321_v19 = vadd.s32 4294967294, %v1050_v4  ;;  %v1451_v42 = vshrl.u32 %v5641_v52, %v6231_v53  ;;  %vm1247_vm12 = vcmp.lt.s32.totalorder %v1246_v8, 2  ;;  %vm1248_vm13 = vcmp.eq.s32.totalorder %v1246_v8, 0 }
  0xc0   : > { %v931_v54 = vmul.f32 %v930_v0, %v915_v48  ;;  %v940_v7 = vxor.u32 2147483648, %v923_v31  ;;  %vm1251_vm14 = vcmp.eq.s32.totalorder %v1246_v8, 2  ;;  %vm1453_vm0 = vcmp.lt.s32.totalorder %v6255_v15, 1 }
  0xc1   : > { %vm5322_vm11 = vcmp.lt.s32.totalorder %v5321_v19, 0  ;;  %v1449_v58 = vor.u32 %v1448_v60, %v1447_v6  ;;  %v1071_v55 = vsel %vm6260_vm10, 0, %v1069_v16  ;;  %v1452_v49 = vor.u32 %v1451_v42, %v1450_v39 }
  0xc2   : > { %v937_v48 = vxor.u32 2147483648, %v931_v54  ;;  %v941_v20 = vsel %vm939_vm4, %v940_v7, %v931_v54  ;;  %v1053_v59 = vsel %vm5322_vm11, 0, %v5321_v19  ;;  %v1253_v40 = vsel %vm1251_vm14, %v940_v7, %v931_v54 }
  0xc3   : > { %v1054_v21 = vsub.s32 32, %v1053_v59  ;;  %v1055_v14 = vshll.u32 %v1046_v61, %v1053_v59  ;;  %v1058_v27 = vsub.s32 4294967266, %v1053_v59  ;;  %v1446_v61 = vor.u32 %v1445_v45, %v1444_v37 }
  0xc4   : > { %v938_v2 = vsel %vm936_vm3, %v923_v31, %v937_v48  ;;  %v1250_v29 = vsel %vm1248_vm13, %v923_v31, %v937_v48  ;;  %vm1456_vm15 = vcmp.lt.s32.totalorder %v6255_v15, 4  ;;  %vm1455_vm1 = vcmp.lt.s32.totalorder %v6255_v15, 3 }
  0xc5   : > { %v942_v10 = vsel %vm935_vm6, %v938_v2, %v941_v20  ;;  %v1056_v13 = vshrl.u32 %v1038_v56, %v1054_v21  ;;  %v1059_v12 = vadd.s32 127, %v1058_v27  ;;  %v1254_v0 = vsel %vm1247_vm12, %v1250_v29, %v1253_v40 }
  0xc6   : > { %v943_v35 = vsel %vm932_vm7, nan, %v942_v10  ;;  %v1255_v31 = vsel %vm932_vm7, nan, %v1254_v0  ;;  %v6304_v19 = vshrl.u32 %v1588_v28, 5  ;;  %v6307_v54 = vsub.s32 32, %v6266_v24 }
  0xc7   : > { %5323 = vst [vmem:[%s5742_s17 + $0x50] sm:$0xff] %v943_v35  ;;  %v1057_v62 = vor.u32 %v1056_v13, %v1055_v14  ;;  %v1060_v50 = vshll.u32 %v1059_v12, 23  ;;  %vm1454_vm2 = vcmp.lt.s32.totalorder %v6255_v15, 2  ;;  %v1461_v7 = vsel %vm1453_vm0, %v6268_v11, %v1443_v33 }
  0xc8   : > { %5331 = vst [vmem:[%s5742_s17 + $0xd0] sm:$0xff] %v1255_v31  ;;  %v1437_v48 = vshrl.u32 %v5636_v34, %v6231_v53  ;;  %v1462_v3 = vsel %vm1456_vm15, %v1449_v58, 920167782  ;;  %v1465_v28 = vsel %vm1453_vm0, %v1443_v33, %v1446_v61  ;;  %v1088_v20 = vadd.s32 3, %v1071_v55 }
  0xc9   : > { %v1061_v56 = vor.u32 4788187, %v1060_v50  ;;  %v1064_v4 = vcvt.s32.f32 %v1057_v62  ;;  %v1463_v26 = vsel %vm1455_vm1, %v1446_v61, %v1462_v3  ;;  %v1466_v57 = vsel %vm1456_vm15, %v1452_v49, 1326507024 }
  0xca   : > { %v6325_v37 = vshll.u32 %v1429_v1, 8  ;;  %v1458_v53 = vsel %vm1456_vm15, %v1446_v61, 2102212464  ;;  %v1464_v6 = vsel %vm1454_vm2, %v1461_v7, %v1463_v26  ;;  %v1467_v2 = vsel %vm1455_vm1, %v1449_v58, %v1466_v57 }
  0xcb   : > { %v1062_v16 = vand.u32 2147483647, %v1061_v56  ;;  %v1468_v59 = vsel %vm1454_vm2, %v1465_v28, %v1467_v2  ;;  %v1494_v41 = vand.u32 65535, %v1464_v6  ;;  %v1495_v14 = vshrl.u32 %v1464_v6, 16 }
  0xcc   : > { %v1470_v8 = vand.u32 65535, %v6325_v37  ;;  %v1471_v60 = vshrl.u32 %v6325_v37, 16  ;;  %v1472_v10 = vand.u32 65535, %v1468_v59  ;;  %v1473_v21 = vshrl.u32 %v1468_v59, 16 }
  0xcd   : > { %v1065_v45 = vmul.f32 %v1064_v4, %v1062_v16  ;;  %v6337_v27 = vand.u32 3, %v1088_v20  ;;  %v6339_v35 = vand.u32 3, %v1071_v55  ;;  %v1457_v39 = vsel %vm1453_vm0, %v1437_v48, %v6268_v11 }
  0xce   : > { %v6344_v42 = vmul.u32 %v1494_v41, %v1471_v60  ;;  %v1474_v12 = vmul.u32 %v1472_v10, %v1470_v8  ;;  %v1475_v29 = vmul.u32 %v1473_v21, %v1470_v8  ;;  %v1476_v61 = vmul.u32 %v1472_v10, %v1471_v60 }
  0xcf   : > { %v1066_v1 = vxor.u32 2147483648, %v1065_v45  ;;  %v1459_v50 = vsel %vm1455_vm1, %v1443_v33, %v1458_v53  ;;  %v1496_v40 = vmul.u32 %v1494_v41, %v1470_v8  ;;  %v1497_v58 = vmul.u32 %v1495_v14, %v1470_v8 }
  0xd0   : > { %v1477_v55 = vmul.u32 %v1473_v21, %v1471_v60  ;;  %v1478_v0 = vshll.u32 %v1475_v29, 16  ;;  %v1480_v49 = vshll.u32 %v1476_v61, 16  ;;  %v1479_v56 = vshrl.u32 %v1475_v29, 16 }
  0xd1   : > { %v1067_v13 = vsel %vm946_vm5, %v1066_v1, %v1065_v45  ;;  %v1499_v4 = vmul.u32 %v1495_v14, %v1471_v60  ;;  %v1500_v31 = vshll.u32 %v1497_v58, 16  ;;  %v1502_v7 = vshll.u32 %v6344_v42, 16 }
  0xd2   : > { %v6351_v62 = vsel %vm6260_vm10, %v5752_v5, %v1067_v13  ;;  %vm1482_vm3 = vc.u32 %v1474_v12, %v1478_v0  ;;  %v1484_v48 = vadd.s32 %v1478_v0, %v1474_v12  ;;  %v1481_v3 = vshrl.u32 %v1476_v61, 16 }
  0xd3   : > { %v1072_v11 = vmul.f32 %v6351_v62, %v6351_v62  ;;  %v1483_v33 = vsel %vm1482_vm3, 1, %v5642_v51  ;;  %vm1504_vm4 = vc.u32 %v1496_v40, %v1500_v31  ;;  %v1506_v28 = vadd.s32 %v1500_v31, %v1496_v40 }
  0xd4   : > { %v1485_v57 = vadd.s32 %v1483_v33, %v1477_v55  ;;  %vm1486_vm5 = vc.u32 %v1484_v48, %v1480_v49  ;;  %vm1094_vm6 = vcmp.eq.s32.totalorder %v6337_v27, 2  ;;  %v1501_v53 = vshrl.u32 %v1497_v58, 16 }
  0xd5   : > { %v1073_v16 = vmul.f32 -0.001358992, %v1072_v11  ;;  %v1080_v18 = vmul.f32 -0.00019511016, %v1072_v11  ;;  %v1487_v45 = vsel %vm1486_vm5, 1, %v5642_v51  ;;  %v1505_v6 = vsel %vm1504_vm4, 1, %v5642_v51 }
  0xd6   : > { %vm1508_vm7 = vc.u32 %v1506_v28, %v1502_v7  ;;  %v1489_v8 = vadd.s32 %v1487_v45, %v1485_v57  ;;  %v1507_v60 = vadd.s32 %v1505_v6, %v1499_v4  ;;  %vm1091_vm8 = vcmp.eq.s32.totalorder %v6337_v27, 0 }
  0xd7   : > { %v1074_v20 = vadd.f32 0.041655596, %v1073_v16  ;;  %v1081_v26 = vadd.f32 0.008332121, %v1080_v18  ;;  %vm1402_vm9 = vcmp.eq.s32.totalorder %v6339_v35, 0  ;;  %v1460_v41 = vsel %vm1454_vm2, %v1457_v39, %v1459_v50 }
  0xd8   : > { %v1503_v1 = vshrl.u32 %v6344_v42, 16  ;;  %v1509_v10 = vsel %vm1508_vm7, 1, %v5642_v51  ;;  %v1593_v21 = vshll.u32 %v5636_v34, %v6266_v24  ;;  %vm1090_vm10 = vcmp.lt.s32.totalorder %v6337_v27, 2 }
  0xd9   : > { %v1075_v2 = vmul.f32 %v1074_v20, %v1072_v11  ;;  %v1082_v59 = vmul.f32 %v1081_v26, %v1072_v11  ;;  %vm1401_vm11 = vcmp.lt.s32.totalorder %v6339_v35, 2  ;;  %v1490_v12 = vadd.s32 %v1489_v8, %v1479_v56 }
  0xda   : > { %v1511_v29 = vadd.s32 %v1509_v10, %v1507_v60  ;;  %v6372_v61 = vadd.s32 %v1506_v28, %v1502_v7  ;;  %v1594_v15 = vshrl.u32 %v5637_v36, %v6307_v54  ;;  %v1596_v39 = vshll.u32 %v5637_v36, %v6266_v24 }
  0xdb   : > { %v1076_v14 = vadd.f32 -0.4999988, %v1075_v2  ;;  %v1083_v13 = vadd.f32 -0.16666654, %v1082_v59  ;;  %v1597_v42 = vshrl.u32 %v5638_v38, %v6307_v54  ;;  %v6380_v58 = vadd.s32 %v1490_v12, %v1481_v3 }
  0xdc   : > { %v1512_v55 = vadd.s32 %v1511_v29, %v1501_v53  ;;  %v1599_v0 = vshll.u32 %v5638_v38, %v6266_v24  ;;  %v1600_v49 = vshrl.u32 %v5639_v44, %v6307_v54  ;;  %v1602_v56 = vshll.u32 %v5639_v44, %v6266_v24 }
  0xdd   : > { %v1077_v50 = vmul.f32 %v1076_v14, %v1072_v11  ;;  %v1084_v40 = vmul.f32 %v1083_v13, %v1072_v11  ;;  %v1603_v4 = vshrl.u32 %v5640_v47, %v6307_v54  ;;  %vm1405_vm12 = vcmp.eq.s32.totalorder %v6339_v35, 2 }
  0xde   : > { %vm2058_vm13 = vcmp.gt.s32.totalorder %v6250_v32, 0  ;;  %v1513_v11 = vadd.s32 %v1512_v55, %v1503_v1  ;;  %v1514_v16 = vmul.u32 %v6325_v37, %v1460_v41  ;;  %vm1516_vm14 = vc.u32 %v6380_v58, %v6372_v61 }
  0xdf   : > { %v1078_v31 = vadd.f32 1.0, %v1077_v50  ;;  %v1085_v7 = vadd.f32 1.0, %v1084_v40  ;;  %v1605_v18 = vshll.u32 %v5640_v47, %v6266_v24  ;;  %v1606_v48 = vshrl.u32 %v5641_v52, %v6307_v54 }
  0xe0   : > { %v1517_v28 = vadd.s32 1, %v1513_v11  ;;  %v1595_v20 = vor.u32 %v1594_v15, %v1593_v21  ;;  %v6400_v26 = vor.u32 %v1597_v42, %v1596_v39  ;;  %v1601_v57 = vor.u32 %v1600_v49, %v1599_v0 }
  0xe1   : > { %v1086_v3 = vmul.f32 %v1085_v7, %v6351_v62  ;;  %v1095_v33 = vxor.u32 2147483648, %v1078_v31  ;;  %v1604_v45 = vor.u32 %v1603_v4, %v1602_v56  ;;  %vm1608_vm0 = vcmp.lt.s32.totalorder %v6304_v19, 1 }
  0xe2   : > { %v1518_v6 = vsel %vm1516_vm14, %v1517_v28, %v1513_v11  ;;  %vm1087_vm15 = vweird.f32 %v5752_v5  ;;  %v1607_v2 = vor.u32 %v1606_v48, %v1605_v18  ;;  %vm1611_vm1 = vcmp.lt.s32.totalorder %v6304_v19, 4 }
  0xe3   : > { %v1092_v37 = vxor.u32 2147483648, %v1086_v3  ;;  %v1096_v53 = vsel %vm1094_vm6, %v1095_v33, %v1086_v3  ;;  %v1407_v24 = vsel %vm1405_vm12, %v1095_v33, %v1086_v3  ;;  %v1519_v62 = vadd.s32 %v1518_v6, %v1514_v16 }
  0xe4   : > { %vm1609_vm2 = vcmp.lt.s32.totalorder %v6304_v19, 2  ;;  %vm1610_vm3 = vcmp.lt.s32.totalorder %v6304_v19, 3  ;;  %v1616_v1 = vsel %vm1608_vm0, %v1595_v20, %v6400_v26  ;;  %v1617_v14 = vsel %vm1611_vm1, %v1604_v45, 920167782 }
  0xe5   : > { %v1093_v59 = vsel %vm1091_vm8, %v1078_v31, %v1092_v37  ;;  %v1404_v8 = vsel %vm1402_vm9, %v1078_v31, %v1092_v37  ;;  %v1520_v41 = vadd.s32 536870912, %v1519_v62  ;;  %v1620_v13 = vsel %vm1608_vm0, %v6400_v26, %v1601_v57 }
  0xe6   : > { %v1097_v60 = vsel %vm1090_vm10, %v1093_v59, %v1096_v53  ;;  %v1408_v5 = vsel %vm1401_vm11, %v1404_v8, %v1407_v24  ;;  %v1618_v35 = vsel %vm1610_vm3, %v1601_v57, %v1617_v14  ;;  %v1621_v12 = vsel %vm1611_vm1, %v1607_v2, 1326507024 }
  0xe7   : > { %v1098_v10 = vsel %vm1087_vm15, nan, %v1097_v60  ;;  %v1409_v21 = vsel %vm1087_vm15, nan, %v1408_v5  ;;  %v6428_v27 = vshrl.u32 %v1520_v41, 30  ;;  %v6436_v29 = vshll.u32 %v1584_v9, 8 }
  0xe8   : > { %5324 = vst [vmem:[%s5742_s17 + $0x58] sm:$0xff] %v1098_v10  ;;  %v5356_v15 = vadd.s32 4294967169, %v6252_v23  ;;  %v1619_v39 = vsel %vm1609_vm2, %v1616_v1, %v1618_v35  ;;  %v1622_v42 = vsel %vm1610_vm3, %v1604_v45, %v1621_v12  ;;  %v2059_v50 = vsel %vm2058_vm13, %v6250_v32, 0 }
  0xe9   : > { %5332 = vst [vmem:[%s5742_s17 + $0xd8] sm:$0xff] %v1409_v21  ;;  %v1522_v40 = vshll.u32 %v6428_v27, 30  ;;  %v1623_v46 = vsel %vm1609_vm2, %v1620_v13, %v1622_v42  ;;  %v1625_v9 = vand.u32 65535, %v6436_v29  ;;  %v1592_v23 = vshrl.u32 %v5636_v34, %v6307_v54 }
  0xea   : > { %v1626_v55 = vshrl.u32 %v6436_v29, 16  ;;  %v1627_v0 = vand.u32 65535, %v1623_v46  ;;  %v1628_v49 = vshrl.u32 %v1623_v46, 16  ;;  %v6454_v56 = vshrl.u32 %v2059_v50, 5 }
  0xeb   : > { %v1523_v4 = vsub.s32 %v1519_v62, %v1522_v40  ;;  %v1649_v31 = vand.u32 65535, %v1619_v39  ;;  %v1650_v7 = vshrl.u32 %v1619_v39, 16  ;;  %v6456_v32 = vand.u32 31, %v2059_v50 }
  0xec   : > { %v1629_v11 = vmul.u32 %v1627_v0, %v1625_v9  ;;  %v1630_v16 = vmul.u32 %v1628_v49, %v1625_v9  ;;  %v1631_v18 = vmul.u32 %v1627_v0, %v1626_v55  ;;  %v6458_v48 = vadd.s32 1, %v5356_v15 }
  0xed   : > { %vm1524_vm4 = vcmp.lt.s32.totalorder %v1523_v4, 0  ;;  %v1525_v3 = vsub.s32 0, %v1523_v4  ;;  %v1613_v54 = vsel %vm1611_vm1, %v1601_v57, 2102212464  ;;  %v1612_v33 = vsel %vm1608_vm0, %v1592_v23, %v1595_v20 }
  0xee   : > { %v1632_v28 = vmul.u32 %v1628_v49, %v1626_v55  ;;  %v1633_v45 = vshll.u32 %v1630_v16, 16  ;;  %v1635_v37 = vshll.u32 %v1631_v18, 16  ;;  %v1651_v24 = vmul.u32 %v1649_v31, %v1625_v9 }
  0xef   : > { %v1526_v53 = vsel %vm1524_vm4, %v1525_v3, %v1523_v4  ;;  %v1652_v6 = vmul.u32 %v1650_v7, %v1625_v9  ;;  %v1653_v62 = vmul.u32 %v1649_v31, %v1626_v55  ;;  %v1614_v59 = vsel %vm1610_vm3, %v6400_v26, %v1613_v54 }
  0xf0   : > { %v1527_v2 = vclz %v1526_v53  ;;  %vm1637_vm5 = vc.u32 %v1629_v11, %v1633_v45  ;;  %v1639_v8 = vadd.s32 %v1633_v45, %v1629_v11  ;;  %v1654_v57 = vmul.u32 %v1650_v7, %v1626_v55 }
  0xf1   : > { %v1638_v60 = vsel %vm1637_vm5, 1, %v5642_v51  ;;  %v1655_v5 = vshll.u32 %v1652_v6, 16  ;;  %v1657_v41 = vshll.u32 %v1653_v62, 16  ;;  %v1634_v1 = vshrl.u32 %v1630_v16, 16 }
  0xf2   : > { %v5338_v20 = vadd.s32 4294967294, %v1527_v2  ;;  %v1640_v10 = vadd.s32 %v1638_v60, %v1632_v28  ;;  %vm1641_vm6 = vc.u32 %v1639_v8, %v1635_v37  ;;  %v1515_v21 = vadd.s32 %v6372_v61, %v6380_v58 }
  0xf3   : > { %v1642_v14 = vsel %vm1641_vm6, 1, %v5642_v51  ;;  %vm1659_vm7 = vc.u32 %v1651_v24, %v1655_v5  ;;  %v1661_v13 = vadd.s32 %v1655_v5, %v1651_v24  ;;  %v1615_v26 = vsel %vm1609_vm2, %v1612_v33, %v1614_v59 }
  0xf4   : > { %vm5339_vm8 = vcmp.lt.s32.totalorder %v5338_v20, 0  ;;  %v1644_v35 = vadd.s32 %v1642_v14, %v1640_v10  ;;  %v1660_v12 = vsel %vm1659_vm7, 1, %v5642_v51  ;;  %v1636_v39 = vshrl.u32 %v1631_v18, 16 }
  0xf5   : > { %v1530_v15 = vsel %vm5339_vm8, 0, %v5338_v20  ;;  %v1662_v42 = vadd.s32 %v1660_v12, %v1654_v57  ;;  %vm1663_vm9 = vc.u32 %v1661_v13, %v1657_v41  ;;  %v6475_v61 = vsub.s32 32, %v6456_v32 }
  0xf6   : > { %v1531_v50 = vsub.s32 32, %v1530_v15  ;;  %v1532_v40 = vshll.u32 %v1523_v4, %v1530_v15  ;;  %v1535_v46 = vsub.s32 4294967266, %v1530_v15  ;;  %v1645_v9 = vadd.s32 %v1644_v35, %v1634_v1 }
  0xf7   : > { %v1656_v58 = vshrl.u32 %v1652_v6, 16  ;;  %v1664_v23 = vsel %vm1663_vm9, 1, %v5642_v51  ;;  %v2047_v19 = vand.u32 2147483647, %v6211_v63  ;;  %vm2213_vm10 = vcmp.gt.s32.totalorder %v6458_v48, 0 }
  0xf8   : > { %vm1423_vm11 = vcmp.lt.s32.totalorder %v6182_v25, 0  ;;  %v1533_v55 = vshrl.u32 %v1515_v21, %v1531_v50  ;;  %v1536_v0 = vadd.s32 127, %v1535_v46  ;;  %v2064_v49 = vshll.u32 %v5636_v34, %v6456_v32 }
  0xf9   : > { %v1545_v4 = vsub.s32 4, %v6428_v27  ;;  %v1658_v31 = vshrl.u32 %v1653_v62, 16  ;;  %v1666_v7 = vadd.s32 %v1664_v23, %v1662_v42  ;;  %v1669_v11 = vmul.u32 %v6436_v29, %v1615_v26  ;;  %v6540_v42 = vld [vmem:[%s5733_s15 + $0x20] sm:$0xff] }
  0xfa   : > { %v1534_v16 = vor.u32 %v1533_v55, %v1532_v40  ;;  %v1537_v18 = vshll.u32 %v1536_v0, 23  ;;  %v6485_v3 = vadd.s32 %v1645_v9, %v1636_v39  ;;  %v6487_v54 = vadd.s32 %v1661_v13, %v1657_v41  ;;  %5371 = vst [vmem:[%s5742_s17 + $0x20] sm:$0xff] %v6540_v42 }
  0xfb   : > { %v1667_v33 = vadd.s32 %v1666_v7, %v1656_v58  ;;  %v2054_v28 = vand.u32 8388607, %v2047_v19  ;;  %v2067_v45 = vshll.u32 %v5637_v36, %v6456_v32  ;;  %v2068_v37 = vshrl.u32 %v5638_v38, %v6475_v61 }
  0xfc   : > { %v1538_v53 = vor.u32 4788187, %v1537_v18  ;;  %v1541_v24 = vcvt.s32.f32 %v1534_v16  ;;  %v2070_v29 = vshll.u32 %v5638_v38, %v6456_v32  ;;  %v2071_v6 = vshrl.u32 %v5639_v44, %v6475_v61 }
  0xfd   : > { %v1668_v62 = vadd.s32 %v1667_v33, %v1658_v31  ;;  %v2065_v2 = vshrl.u32 %v5637_v36, %v6475_v61  ;;  %v2073_v59 = vshll.u32 %v5639_v44, %v6456_v32  ;;  %v2074_v8 = vshrl.u32 %v5640_v47, %v6475_v61 }
  0xfe   : > { %v1539_v60 = vand.u32 2147483647, %v1538_v53  ;;  %vm1671_vm12 = vc.u32 %v6485_v3, %v6487_v54  ;;  %v2076_v57 = vshll.u32 %v5640_v47, %v6456_v32  ;;  %v2077_v5 = vshrl.u32 %v5641_v52, %v6475_v61 }
  0xff   : > { %vm6513_vm13 = vcmp.le.f32.partialorder %v1421_v17, 0.7853982  ;;  %v1546_v20 = vsel %vm1423_vm11, %v1545_v4, %v6428_v27  ;;  %v1672_v1 = vadd.s32 1, %v1668_v62  ;;  %v2055_v10 = vor.u32 8388608, %v2054_v28 }
 0x100   : > { %v1542_v21 = vmul.f32 %v1541_v24, %v1539_v60  ;;  %v6520_v14 = vor.u32 %v2068_v37, %v2067_v45  ;;  %v6522_v32 = vor.u32 %v2071_v6, %v2070_v29  ;;  %v2075_v13 = vor.u32 %v2074_v8, %v2073_v59 }
 0x101   : > { %v1673_v26 = vsel %vm1671_vm12, %v1672_v1, %v1668_v62  ;;  %v2078_v35 = vor.u32 %v2077_v5, %v2076_v57  ;;  %vm2079_vm14 = vcmp.lt.s32.totalorder %v6454_v56, 1  ;;  %vm2082_vm0 = vcmp.lt.s32.totalorder %v6454_v56, 4 }
 0x102   : > { %v1543_v17 = vxor.u32 2147483648, %v1542_v21  ;;  %v6528_v27 = vsel %vm6513_vm13, 0, %v1546_v20  ;;  %v1674_v12 = vadd.s32 %v1673_v26, %v1669_v11  ;;  %v6530_v15 = vor.u32 %v2065_v2, %v2064_v49 }
 0x103   : > { %v6535_v39 = vsel %vm2213_vm10, %v6458_v48, 0  ;;  %vm2080_vm15 = vcmp.lt.s32.totalorder %v6454_v56, 2  ;;  %vm2081_vm1 = vcmp.lt.s32.totalorder %v6454_v56, 3  ;;  %v2088_v46 = vsel %vm2082_vm0, %v2075_v13, 920167782 }
 0x104   : > { %v1544_v50 = vsel %vm1423_vm11, %v1543_v17, %v1542_v21  ;;  %v1675_v40 = vadd.s32 536870912, %v1674_v12  ;;  %v2091_v9 = vsel %vm2079_vm14, %v6520_v14, %v6522_v32  ;;  %v1565_v58 = vadd.s32 3, %v6528_v27 }
 0x105   : > { %v6555_v48 = vsel %vm6513_vm13, %v6182_v25, %v1544_v50  ;;  %v2092_v23 = vsel %vm2082_vm0, %v2078_v35, 1326507024  ;;  %v6560_v55 = vshll.u32 %v2055_v10, 8  ;;  %v2087_v4 = vsel %vm2079_vm14, %v6530_v15, %v6520_v14 }
 0x106   : > { %v1549_v0 = vmul.f32 %v6555_v48, %v6555_v48  ;;  %v1676_v49 = vshrl.u32 %v1675_v40, 30  ;;  %v2093_v31 = vsel %vm2081_vm1, %v2075_v13, %v2092_v23  ;;  %v2089_v7 = vsel %vm2081_vm1, %v6522_v32, %v2088_v46 }
 0x107   : > { %v2094_v11 = vsel %vm2080_vm15, %v2091_v9, %v2093_v31  ;;  %v2096_v16 = vand.u32 65535, %v6560_v55  ;;  %v6577_v18 = vshrl.u32 %v6560_v55, 16  ;;  %v6580_v33 = vand.u32 31, %v6535_v39 }
 0x108   : > { %v1550_v28 = vmul.f32 -0.001358992, %v1549_v0  ;;  %v1557_v45 = vmul.f32 -0.00019511016, %v1549_v0  ;;  %v1677_v37 = vshll.u32 %v1676_v49, 30  ;;  %v6582_v53 = vand.u32 3, %v1565_v58 }
 0x109   : > { %vm1578_vm2 = vcmp.lt.s32.totalorder %v6195_v43, 0  ;;  %v2098_v24 = vand.u32 65535, %v2094_v11  ;;  %v2099_v29 = vshrl.u32 %v2094_v11, 16  ;;  %vm6587_vm3 = vcmp.le.f32.partialorder %v1576_v22, 0.7853982 }
 0x10a   : > { %v1551_v6 = vadd.f32 0.041655596, %v1550_v28  ;;  %v1558_v62 = vadd.f32 0.008332121, %v1557_v45  ;;  %v6591_v59 = vsub.s32 %v1674_v12, %v1677_v37  ;;  %v6595_v8 = vsel %vm2080_vm15, %v2087_v4, %v2089_v7 }
 0x10b   : > { %v1700_v60 = vsub.s32 4, %v1676_v49  ;;  %v2100_v57 = vmul.u32 %v2098_v24, %v2096_v16  ;;  %v6597_v5 = vmul.u32 %v2099_v29, %v2096_v16  ;;  %v6600_v41 = vmul.u32 %v2098_v24, %v6577_v18 }
 0x10c   : > { %v1552_v20 = vmul.f32 %v1551_v6, %v1549_v0  ;;  %v1559_v1 = vmul.f32 %v1558_v62, %v1549_v0  ;;  %vm1679_vm4 = vcmp.lt.s32.totalorder %v6591_v59, 0  ;;  %v1680_v22 = vsub.s32 0, %v6591_v59 }
 0x10d   : > { %vm1568_vm5 = vcmp.eq.s32.totalorder %v6582_v53, 0  ;;  %vm1571_vm6 = vcmp.eq.s32.totalorder %v6582_v53, 2  ;;  %v2104_v10 = vshll.u32 %v6597_v5, 16  ;;  %v2106_v21 = vshll.u32 %v6600_v41, 16 }
 0x10e   : > { %v2120_v13 = vand.u32 65535, %v6595_v8  ;;  %v1553_v26 = vadd.f32 -0.4999988, %v1552_v20  ;;  %v1560_v35 = vadd.f32 -0.16666654, %v1559_v1  ;;  %vm1567_vm7 = vcmp.lt.s32.totalorder %v6582_v53, 2 }
 0x10f   : > { %v1681_v17 = vsel %vm1679_vm4, %v1680_v22, %v6591_v59  ;;  %v2121_v12 = vshrl.u32 %v6595_v8, 16  ;;  %vm1564_vm8 = vweird.f32 %v6182_v25  ;;  %v2103_v40 = vmul.u32 %v2099_v29, %v6577_v18 }
 0x110   : > { %v1682_v50 = vclz %v1681_v17  ;;  %vm2108_vm9 = vc.u32 %v2100_v57, %v2104_v10  ;;  %v2110_v46 = vadd.s32 %v2104_v10, %v2100_v57  ;;  %v1554_v9 = vmul.f32 %v1553_v26, %v1549_v0 }
 0x111   : > { %v1561_v58 = vmul.f32 %v1560_v35, %v1549_v0  ;;  %v1701_v23 = vsel %vm1578_vm2, %v1700_v60, %v1676_v49  ;;  %v2109_v4 = vsel %vm2108_vm9, 1, %v5642_v51  ;;  %v1670_v31 = vadd.s32 %v6487_v54, %v6485_v3 }
 0x112   : > { %v5341_v7 = vadd.s32 4294967294, %v1682_v50  ;;  %v2063_v11 = vshrl.u32 %v5636_v34, %v6475_v61  ;;  %vm2112_vm10 = vc.u32 %v2110_v46, %v2106_v21  ;;  %v1555_v28 = vadd.f32 1.0, %v1554_v9 }
 0x113   : > { %v1562_v45 = vadd.f32 1.0, %v1561_v58  ;;  %v2084_v37 = vsel %vm2082_vm0, %v6522_v32, 2102212464  ;;  %v2122_v0 = vmul.u32 %v2120_v13, %v2096_v16  ;;  %v6626_v49 = vsel %vm6587_vm3, 0, %v1701_v23 }
 0x114   : > { %vm5342_vm11 = vcmp.lt.s32.totalorder %v5341_v7, 0  ;;  %v2111_v24 = vadd.s32 %v2109_v4, %v2103_v40  ;;  %v6628_v29 = vmul.u32 %v2121_v12, %v2096_v16  ;;  %v1572_v54 = vxor.u32 2147483648, %v1555_v28 }
 0x115   : > { %v1563_v3 = vmul.f32 %v1562_v45, %v6555_v48  ;;  %v1685_v61 = vsel %vm5342_vm11, 0, %v5341_v7  ;;  %v2113_v6 = vsel %vm2112_vm10, 1, %v5642_v51  ;;  %v1878_v32 = vand.u32 3, %v6528_v27 }
 0x116   : > { %v1686_v62 = vsub.s32 32, %v1685_v61  ;;  %v1687_v8 = vshll.u32 %v6591_v59, %v1685_v61  ;;  %v1690_v60 = vsub.s32 4294967266, %v1685_v61  ;;  %v2105_v1 = vshrl.u32 %v6597_v5, 16 }
 0x117   : > { %v1569_v57 = vxor.u32 2147483648, %v1563_v3  ;;  %v1573_v20 = vsel %vm1571_vm6, %v1572_v54, %v1563_v3  ;;  %v2124_v16 = vmul.u32 %v2120_v13, %v6577_v18  ;;  %v2115_v10 = vadd.s32 %v2113_v6, %v2111_v24 }
 0x118   : > { %v1688_v22 = vshrl.u32 %v1670_v31, %v1686_v62  ;;  %v1691_v48 = vadd.s32 127, %v1690_v60  ;;  %v2126_v21 = vshll.u32 %v6628_v29, 16  ;;  %vm1879_vm12 = vcmp.lt.s32.totalorder %v1878_v32, 2 }
 0x119   : > { %v1570_v59 = vsel %vm1568_vm5, %v1555_v28, %v1569_v57  ;;  %vm1880_vm13 = vcmp.eq.s32.totalorder %v1878_v32, 0  ;;  %vm1883_vm0 = vcmp.eq.s32.totalorder %v1878_v32, 2  ;;  %v2083_v50 = vsel %vm2079_vm14, %v2063_v11, %v6530_v15 }
 0x11a   : > { %v1574_v27 = vsel %vm1567_vm7, %v1570_v59, %v1573_v20  ;;  %v1689_v26 = vor.u32 %v1688_v22, %v1687_v8  ;;  %v1692_v35 = vshll.u32 %v1691_v48, 23  ;;  %v1882_v5 = vsel %vm1880_vm13, %v1555_v28, %v1569_v57  ;;  %v6675_v8 = vld [vmem:[%s5733_s15 + $0x28] sm:$0xff] }
 0x11b   : > { %v1575_v13 = vsel %vm1564_vm8, nan, %v1574_v27  ;;  %v1885_v17 = vsel %vm1883_vm0, %v1572_v54, %v1563_v3  ;;  %v2085_v40 = vsel %vm2081_vm1, %v6520_v14, %v2084_v37  ;;  %v2125_v58 = vmul.u32 %v2121_v12, %v6577_v18  ;;  %5372 = vst [vmem:[%s5742_s17 + $0x28] sm:$0xff] %v6675_v8 }
 0x11c   : > { %5343 = vst [vmem:[%s5742_s17 + $0x60] sm:$0xff] %v1575_v13  ;;  %v1693_v46 = vor.u32 4788187, %v1692_v35  ;;  %v1696_v53 = vcvt.s32.f32 %v1689_v26  ;;  %v1886_v9 = vsel %vm1879_vm12, %v1882_v5, %v1885_v17  ;;  %v1720_v23 = vadd.s32 3, %v6626_v49 }
 0x11d   : > { %v1887_v4 = vsel %vm1564_vm8, nan, %v1886_v9  ;;  %v2107_v31 = vshrl.u32 %v6600_v41, 16  ;;  %v2128_v7 = vshll.u32 %v2124_v16, 16  ;;  %v2116_v15 = vadd.s32 %v2115_v10, %v2105_v1 }
 0x11e   : > { %v1694_v28 = vand.u32 2147483647, %v1693_v46  ;;  %5351 = vst [vmem:[%s5742_s17 + $0xe0] sm:$0xff] %v1887_v4  ;;  %vm2130_vm14 = vc.u32 %v2122_v0, %v2126_v21  ;;  %v2132_v11 = vadd.s32 %v2126_v21, %v2122_v0  ;;  %v6659_v14 = vsub.s32 32, %v6580_v33 }
 0x11f   : > { %v2131_v45 = vsel %vm2130_vm14, 1, %v5642_v51  ;;  %v2202_v18 = vand.u32 2147483647, %v6223_v30  ;;  %v2127_v25 = vshrl.u32 %v6628_v29, 16  ;;  %v6665_v41 = vshrl.u32 %v6535_v39, 5 }
 0x120   : > { %v1697_v12 = vmul.f32 %v1696_v53, %v1694_v28  ;;  %v2133_v37 = vadd.s32 %v2131_v45, %v2125_v58  ;;  %vm2134_vm1 = vc.u32 %v2132_v11, %v2128_v7  ;;  %v6667_v24 = vand.u32 3, %v1720_v23 }
 0x121   : > { %v2086_v0 = vsel %vm2080_vm15, %v2083_v50, %v2085_v40  ;;  %v2135_v3 = vsel %vm2134_vm1, 1, %v5642_v51  ;;  %v6672_v61 = vadd.s32 %v2116_v15, %v2107_v31  ;;  %v2129_v6 = vshrl.u32 %v2124_v16, 16 }
 0x122   : > { %v1698_v54 = vxor.u32 2147483648, %v1697_v12  ;;  %v2137_v62 = vadd.s32 %v2135_v3, %v2133_v37  ;;  %v6677_v29 = vadd.s32 %v2132_v11, %v2128_v7  ;;  %v2209_v39 = vand.u32 8388607, %v2202_v18 }
 0x123   : > { %v2222_v60 = vshll.u32 %v5637_v36, %v6580_v33  ;;  %v2223_v56 = vshrl.u32 %v5638_v38, %v6659_v14  ;;  %v2225_v20 = vshll.u32 %v5638_v38, %v6580_v33  ;;  %v2226_v1 = vshrl.u32 %v5639_v44, %v6659_v14 }
 0x124   : > { %v1699_v32 = vsel %vm1578_vm2, %v1698_v54, %v1697_v12  ;;  %v2138_v57 = vadd.s32 %v2137_v62, %v2127_v25  ;;  %v2228_v22 = vshll.u32 %v5639_v44, %v6580_v33  ;;  %v2229_v48 = vshrl.u32 %v5640_v47, %v6659_v14 }
 0x125   : > { %v6696_v16 = vsel %vm6587_vm3, %v6195_v43, %v1699_v32  ;;  %v2231_v10 = vshll.u32 %v5640_v47, %v6580_v33  ;;  %v2140_v27 = vmul.u32 %v6560_v55, %v2086_v0  ;;  %v2232_v2 = vshrl.u32 %v5641_v52, %v6659_v14 }
 0x126   : > { %v1704_v21 = vmul.f32 %v6696_v16, %v6696_v16  ;;  %v2139_v59 = vadd.s32 %v2138_v57, %v2129_v6  ;;  %vm2142_vm15 = vc.u32 %v6672_v61, %v6677_v29  ;;  %v2210_v26 = vor.u32 8388608, %v2209_v39 }
 0x127   : > { %v2219_v35 = vshll.u32 %v5636_v34, %v6580_v33  ;;  %v6713_v5 = vor.u32 %v2223_v56, %v2222_v60  ;;  %v6715_v40 = vor.u32 %v2226_v1, %v2225_v20  ;;  %v2220_v55 = vshrl.u32 %v5637_v36, %v6659_v14 }
 0x128   : > { %v1705_v13 = vmul.f32 -0.001358992, %v1704_v21  ;;  %v1712_v17 = vmul.f32 -0.00019511016, %v1704_v21  ;;  %v2143_v50 = vadd.s32 1, %v2139_v59  ;;  %v2230_v46 = vor.u32 %v2229_v48, %v2228_v22 }
 0x129   : > { %v2233_v53 = vor.u32 %v2232_v2, %v2231_v10  ;;  %vm2234_vm2 = vcmp.lt.s32.totalorder %v6665_v41, 1  ;;  %vm2237_vm3 = vcmp.lt.s32.totalorder %v6665_v41, 4  ;;  %vm1726_vm4 = vcmp.eq.s32.totalorder %v6667_v24, 2 }
 0x12a   : > { %v1706_v9 = vadd.f32 0.041655596, %v1705_v13  ;;  %v1713_v58 = vadd.f32 0.008332121, %v1712_v17  ;;  %v2144_v23 = vsel %vm2142_vm15, %v2143_v50, %v2139_v59  ;;  %v2032_v33 = vand.u32 3, %v6626_v49 }
 0x12b   : > { %v2145_v4 = vadd.s32 %v2144_v23, %v2140_v27  ;;  %vm2236_vm5 = vcmp.lt.s32.totalorder %v6665_v41, 3  ;;  %vm2235_vm6 = vcmp.lt.s32.totalorder %v6665_v41, 2  ;;  %v2246_v28 = vsel %vm2234_vm2, %v6713_v5, %v6715_v40 }
 0x12c   : > { %v1707_v31 = vmul.f32 %v1706_v9, %v1704_v21  ;;  %v1714_v7 = vmul.f32 %v1713_v58, %v1704_v21  ;;  %vm1723_vm7 = vcmp.eq.s32.totalorder %v6667_v24, 0  ;;  %v6730_v11 = vor.u32 %v2220_v55, %v2219_v35 }
 0x12d   : > { %v2146_v15 = vadd.s32 536870912, %v2145_v4  ;;  %v2247_v49 = vsel %vm2237_vm3, %v2233_v53, 1326507024  ;;  %v6734_v45 = vshll.u32 %v2210_v26, 8  ;;  %vm1722_vm8 = vcmp.lt.s32.totalorder %v6667_v24, 2 }
 0x12e   : > { %v1708_v12 = vadd.f32 -0.4999988, %v1707_v31  ;;  %v1715_v25 = vadd.f32 -0.16666654, %v1714_v7  ;;  %v2243_v37 = vsel %vm2237_vm3, %v2230_v46, 920167782  ;;  %v2248_v0 = vsel %vm2236_vm5, %v2230_v46, %v2247_v49 }
 0x12f   : > { %vm1719_vm9 = vweird.f32 %v6195_v43  ;;  %v6742_v3 = vshrl.u32 %v2146_v15, 30  ;;  %v2249_v54 = vsel %vm2235_vm6, %v2246_v28, %v2248_v0  ;;  %v2251_v6 = vand.u32 65535, %v6734_v45 }
 0x130   : > { %v6748_v62 = vshrl.u32 %v6734_v45, 16  ;;  %v1709_v39 = vmul.f32 %v1708_v12, %v1704_v21  ;;  %v1716_v60 = vmul.f32 %v1715_v25, %v1704_v21  ;;  %v2253_v56 = vand.u32 65535, %v2249_v54 }
 0x131   : > { %v2254_v32 = vshrl.u32 %v2249_v54, 16  ;;  %vm2033_vm10 = vcmp.lt.s32.totalorder %v2032_v33, 2  ;;  %v2148_v57 = vshll.u32 %v6742_v3, 30  ;;  %v2242_v20 = vsel %vm2234_vm2, %v6730_v11, %v6713_v5 }
 0x132   : > { %v2244_v1 = vsel %vm2236_vm5, %v6715_v40, %v2243_v37  ;;  %v1710_v22 = vadd.f32 1.0, %v1709_v39  ;;  %v1717_v48 = vadd.f32 1.0, %v1716_v60  ;;  %vm2034_vm11 = vcmp.eq.s32.totalorder %v2032_v33, 0 }
 0x133   : > { %v2256_v10 = vmul.u32 %v2254_v32, %v2251_v6  ;;  %vm2037_vm12 = vcmp.eq.s32.totalorder %v2032_v33, 2  ;;  %v2149_v21 = vsub.s32 %v2145_v4, %v2148_v57  ;;  %v2255_v59 = vmul.u32 %v2253_v56, %v2251_v6 }
 0x134   : > { %v6759_v27 = vmul.u32 %v2253_v56, %v6748_v62  ;;  %v1718_v2 = vmul.f32 %v1717_v48, %v6696_v16  ;;  %v1727_v26 = vxor.u32 2147483648, %v1710_v22  ;;  %v2245_v35 = vsel %vm2235_vm6, %v2242_v20, %v2244_v1 }
 0x135   : > { %v2259_v13 = vshll.u32 %v2256_v10, 16  ;;  %vm2150_vm13 = vcmp.lt.s32.totalorder %v2149_v21, 0  ;;  %v2151_v17 = vsub.s32 0, %v2149_v21  ;;  %v2258_v50 = vmul.u32 %v2254_v32, %v6748_v62 }
 0x136   : > { %v2261_v55 = vshll.u32 %v6759_v27, 16  ;;  %v1724_v46 = vxor.u32 2147483648, %v1718_v2  ;;  %v1728_v53 = vsel %vm1726_vm4, %v1727_v26, %v1718_v2  ;;  %v2039_v9 = vsel %vm2037_vm12, %v1727_v26, %v1718_v2 }
 0x137   : > { %v2275_v58 = vand.u32 65535, %v2245_v35  ;;  %v2152_v23 = vsel %vm2150_vm13, %v2151_v17, %v2149_v21  ;;  %vm2263_vm0 = vc.u32 %v2255_v59, %v2259_v13  ;;  %v2265_v16 = vadd.s32 %v2259_v13, %v2255_v59 }
 0x138   : > { %v2276_v4 = vshrl.u32 %v2245_v35, 16  ;;  %v1725_v31 = vsel %vm1723_vm7, %v1710_v22, %v1724_v46  ;;  %v2036_v7 = vsel %vm2034_vm11, %v1710_v22, %v1724_v46  ;;  %v2153_v28 = vclz %v2152_v23 }
 0x139   : > { %v2264_v15 = vsel %vm2263_vm0, 1, %v5642_v51  ;;  %v1729_v49 = vsel %vm1722_vm8, %v1725_v31, %v1728_v53  ;;  %v2040_v12 = vsel %vm2033_vm10, %v2036_v7, %v2039_v9  ;;  %vm2267_vm14 = vc.u32 %v2265_v16, %v2261_v55 }
 0x13a   : > { %v2266_v25 = vadd.s32 %v2264_v15, %v2258_v50  ;;  %v1730_v37 = vsel %vm1719_vm9, nan, %v1729_v49  ;;  %v2041_v0 = vsel %vm1719_vm9, nan, %v2040_v12  ;;  %v5354_v54 = vadd.s32 4294967294, %v2153_v28 }
 0x13b   : > { %v2268_v39 = vsel %vm2267_vm14, 1, %v5642_v51  ;;  %5344 = vst [vmem:[%s5742_s17 + $0x68] sm:$0xff] %v1730_v37  ;;  %v2218_v60 = vshrl.u32 %v5636_v34, %v6659_v14  ;;  %v2278_v56 = vmul.u32 %v2276_v4, %v2251_v6  ;;  %v2141_v24 = vadd.s32 %v6677_v29, %v6672_v61 }
 0x13c   : > { %5352 = vst [vmem:[%s5742_s17 + $0xe8] sm:$0xff] %v2041_v0  ;;  %vm5355_vm1 = vcmp.lt.s32.totalorder %v5354_v54, 0  ;;  %v2260_v33 = vshrl.u32 %v2256_v10, 16  ;;  %v2279_v32 = vmul.u32 %v2275_v58, %v6748_v62  ;;  %v2270_v20 = vadd.s32 %v2268_v39, %v2266_v25 }
 0x13d   : > { %v2156_v57 = vsel %vm5355_vm1, 0, %v5354_v54  ;;  %v2277_v43 = vmul.u32 %v2275_v58, %v2251_v6  ;;  %v2281_v1 = vshll.u32 %v2278_v56, 16  ;;  %vm2049_vm15 = vcmp.lt.s32.totalorder %v6211_v63, 0 }
 0x13e   : > { %v2157_v22 = vsub.s32 32, %v2156_v57  ;;  %v2158_v48 = vshll.u32 %v2149_v21, %v2156_v57  ;;  %v2161_v59 = vsub.s32 4294967266, %v2156_v57  ;;  %vm6790_vm4 = vcmp.le.f32.partialorder %v2047_v19, 0.7853982 }
 0x13f   : > { %v2171_v61 = vsub.s32 4, %v6742_v3  ;;  %v2238_v29 = vsel %vm2234_vm2, %v2218_v60, %v6730_v11  ;;  %v2239_v6 = vsel %vm2237_vm3, %v6715_v40, 2102212464  ;;  %v2280_v10 = vmul.u32 %v2276_v4, %v6748_v62 }
 0x140   : > { %v2159_v21 = vshrl.u32 %v2141_v24, %v2157_v22  ;;  %v2162_v2 = vadd.s32 127, %v2161_v59  ;;  %v2262_v26 = vshrl.u32 %v6759_v27, 16  ;;  %v2283_v19 = vshll.u32 %v2279_v32, 16 }
 0x141   : > { %v2271_v35 = vadd.s32 %v2270_v20, %v2260_v33  ;;  %vm2285_vm7 = vc.u32 %v2277_v43, %v2281_v1  ;;  %v2287_v13 = vadd.s32 %v2281_v1, %v2277_v43  ;;  %v6804_v17 = vmul.f32 402.12387, %v6540_v42 }
 0x142   : > { %v2160_v50 = vor.u32 %v2159_v21, %v2158_v48  ;;  %v2163_v55 = vshll.u32 %v2162_v2, 23  ;;  %v2286_v11 = vsel %vm2285_vm7, 1, %v5642_v51  ;;  %v6808_v46 = vmul.f32 402.12387, %v6675_v8 }
 0x143   : > { %v2282_v40 = vshrl.u32 %v2278_v56, 16  ;;  %v2288_v62 = vadd.s32 %v2286_v11, %v2280_v10  ;;  %vm2289_vm2 = vc.u32 %v2287_v13, %v2283_v19  ;;  %v2682_v53 = vand.u32 2139095040, %v6804_v17 }
 0x144   : > { %v2164_v27 = vor.u32 4788187, %v2163_v55  ;;  %v2167_v9 = vcvt.s32.f32 %v2160_v50  ;;  %v2240_v58 = vsel %vm2236_vm5, %v6713_v5, %v2239_v6  ;;  %v2290_v23 = vsel %vm2289_vm2, 1, %v5642_v51 }
 0x145   : > { %v2172_v16 = vsel %vm2049_vm15, %v2171_v61, %v6742_v3  ;;  %v2284_v4 = vshrl.u32 %v2279_v32, 16  ;;  %v2292_v31 = vadd.s32 %v2290_v23, %v2288_v62  ;;  %v2683_v7 = vshrl.u32 %v2682_v53, 23 }
 0x146   : > { %v2165_v28 = vand.u32 2147483647, %v2164_v27  ;;  %v2272_v15 = vadd.s32 %v2271_v35, %v2262_v26  ;;  %v2291_v49 = vadd.s32 %v2287_v13, %v2283_v19  ;;  %v2837_v12 = vand.u32 2139095040, %v6808_v46 }
 0x147   : > { %v2241_v25 = vsel %vm2235_vm6, %v2238_v29, %v2240_v58  ;;  %v2293_v37 = vadd.s32 %v2292_v31, %v2282_v40  ;;  %v5373_v0 = vadd.s32 4294967169, %v2683_v7  ;;  %v6822_v5 = vmul.f32 804.24774, %v6540_v42 }
 0x148   : > { %v2168_v54 = vmul.f32 %v2167_v9, %v2165_v28  ;;  %v6826_v3 = vsel %vm6790_vm4, 0, %v2172_v16  ;;  %v2838_v39 = vshrl.u32 %v2837_v12, 23  ;;  %v2295_v33 = vmul.u32 %v6734_v45, %v2241_v25 }
 0x149   : > { %v2294_v60 = vadd.s32 %v2293_v37, %v2284_v4  ;;  %v2689_v56 = vadd.s32 1, %v5373_v0  ;;  %vm2297_vm3 = vc.u32 %v2272_v15, %v2291_v49  ;;  %v2191_v41 = vadd.s32 3, %v6826_v3 }
 0x14a   : > { %v2169_v24 = vxor.u32 2147483648, %v2168_v54  ;;  %v3308_v57 = vand.u32 2139095040, %v6822_v5  ;;  %v5376_v20 = vadd.s32 4294967169, %v2838_v39  ;;  %v6839_v2 = vmul.f32 804.24774, %v6675_v8 }
 0x14b   : > { %v2298_v32 = vadd.s32 1, %v2294_v60  ;;  %vm2690_vm5 = vcmp.gt.s32.totalorder %v2689_v56, 0  ;;  %v6836_v59 = vand.u32 3, %v2191_v41  ;;  %v2679_v26 = vand.u32 2147483647, %v6804_v17 }
 0x14c   : > { %v2170_v42 = vsel %vm2049_vm15, %v2169_v24, %v2168_v54  ;;  %v2691_v45 = vsel %vm2690_vm5, %v2689_v56, 0  ;;  %v3309_v61 = vshrl.u32 %v3308_v57, 23  ;;  %v2844_v21 = vadd.s32 1, %v5376_v20 }
 0x14d   : > { %v2173_v43 = vsel %vm6790_vm4, %v6211_v63, %v2170_v42  ;;  %v2299_v1 = vsel %vm2297_vm3, %v2298_v32, %v2294_v60  ;;  %v2834_v19 = vand.u32 2147483647, %v6808_v46  ;;  %vm2204_vm6 = vcmp.lt.s32.totalorder %v6223_v30, 0 }
 0x14e   : > { %v2175_v22 = vmul.f32 %v2173_v43, %v2173_v43  ;;  %v2300_v48 = vadd.s32 %v2299_v1, %v2295_v33  ;;  %v2693_v50 = vand.u32 31, %v2691_v45  ;;  %v5389_v55 = vadd.s32 4294967169, %v3309_v61 }
 0x14f   : > { %vm2845_vm8 = vcmp.gt.s32.totalorder %v2844_v21, 0  ;;  %vm2194_vm9 = vcmp.eq.s32.totalorder %v6836_v59, 0  ;;  %vm2197_vm10 = vcmp.eq.s32.totalorder %v6836_v59, 2  ;;  %v3463_v8 = vand.u32 2139095040, %v6839_v2 }
 0x150   : > { %v2176_v29 = vmul.f32 -0.001358992, %v2175_v22  ;;  %v2183_v6 = vmul.f32 -0.00019511016, %v2175_v22  ;;  %v2301_v10 = vadd.s32 536870912, %v2300_v48  ;;  %vm2193_vm11 = vcmp.lt.s32.totalorder %v6836_v59, 2 }
 0x151   : > { %v6849_v53 = vand.u32 8388607, %v2679_v26  ;;  %v6853_v27 = vand.u32 8388607, %v2834_v19  ;;  %vm6858_vm12 = vcmp.le.f32.partialorder %v2202_v18, 0.7853982  ;;  %v2296_v16 = vadd.s32 %v2291_v49, %v2272_v15 }
 0x152   : > { %v2177_v14 = vadd.f32 0.041655596, %v2176_v29  ;;  %v2184_v35 = vadd.f32 0.008332121, %v2183_v6  ;;  %v2302_v13 = vshrl.u32 %v2301_v10, 30  ;;  %vm2190_vm13 = vweird.f32 %v6211_v63 }
 0x153   : > { %v2694_v7 = vsub.s32 32, %v2693_v50  ;;  %v6863_v28 = vadd.s32 1, %v5389_v55  ;;  %v2846_v12 = vsel %vm2845_vm8, %v2844_v21, 0  ;;  %v6866_v54 = vshrl.u32 %v2691_v45, 5 }
 0x154   : > { %v2178_v11 = vmul.f32 %v2177_v14, %v2175_v22  ;;  %v2185_v40 = vmul.f32 %v2184_v35, %v2175_v22  ;;  %v2303_v62 = vshll.u32 %v2302_v13, 30  ;;  %v2326_v31 = vsub.s32 4, %v2302_v13 }
 0x155   : > { %v6868_v18 = vshrl.u32 %v3463_v8, 23  ;;  %v2687_v39 = vor.u32 8388608, %v6849_v53  ;;  %v2842_v15 = vor.u32 8388608, %v6853_v27  ;;  %v6872_v24 = vshrl.u32 %v2846_v12, 5 }
 0x156   : > { %v2179_v9 = vadd.f32 -0.4999988, %v2178_v11  ;;  %v2186_v58 = vadd.f32 -0.16666654, %v2185_v40  ;;  %v2304_v4 = vsub.s32 %v2300_v48, %v2303_v62  ;;  %v6874_v41 = vand.u32 31, %v2846_v12 }
 0x157   : > { %v2696_v32 = vshll.u32 %v5636_v34, %v2693_v50  ;;  %v2697_v57 = vshrl.u32 %v5637_v36, %v2694_v7  ;;  %v2327_v1 = vsel %vm2204_vm6, %v2326_v31, %v2302_v13  ;;  %v2700_v45 = vshrl.u32 %v5638_v38, %v2694_v7 }
 0x158   : > { %v2180_v25 = vmul.f32 %v2179_v9, %v2175_v22  ;;  %v2187_v37 = vmul.f32 %v2186_v58, %v2175_v22  ;;  %vm2305_vm0 = vcmp.lt.s32.totalorder %v2304_v4, 0  ;;  %v2306_v0 = vsub.s32 0, %v2304_v4 }
 0x159   : > { %v2699_v22 = vshll.u32 %v5637_v36, %v2693_v50  ;;  %v2702_v61 = vshll.u32 %v5638_v38, %v2693_v50  ;;  %v2703_v29 = vshrl.u32 %v5639_v44, %v2694_v7  ;;  %v2705_v21 = vshll.u32 %v5639_v44, %v2693_v50 }
 0x15a   : > { %v2181_v49 = vadd.f32 1.0, %v2180_v25  ;;  %v2188_v60 = vadd.f32 1.0, %v2187_v37  ;;  %v2307_v56 = vsel %vm2305_vm0, %v2306_v0, %v2304_v4  ;;  %v2329_v14 = vsel %vm6858_vm12, 0, %v2327_v1 }
 0x15b   : > { %v2308_v33 = vclz %v2307_v56  ;;  %v2698_v35 = vor.u32 %v2697_v57, %v2696_v32  ;;  %v2708_v13 = vshll.u32 %v5640_v47, %v2693_v50  ;;  %v2504_v40 = vand.u32 3, %v6826_v3 }
 0x15c   : > { %v2189_v42 = vmul.f32 %v2188_v60, %v2173_v43  ;;  %v2198_v20 = vxor.u32 2147483648, %v2181_v49  ;;  %v2706_v43 = vshrl.u32 %v5640_v47, %v2694_v7  ;;  %v2709_v62 = vshrl.u32 %v5641_v52, %v2694_v7 }
 0x15d   : > { %v5357_v48 = vadd.s32 4294967294, %v2308_v33  ;;  %v2701_v25 = vor.u32 %v2700_v45, %v2699_v22  ;;  %v2704_v37 = vor.u32 %v2703_v29, %v2702_v61  ;;  %vm2505_vm1 = vcmp.lt.s32.totalorder %v2504_v40, 2 }
 0x15e   : > { %v2195_v6 = vxor.u32 2147483648, %v2189_v42  ;;  %v2199_v10 = vsel %vm2197_vm10, %v2198_v20, %v2189_v42  ;;  %v2707_v50 = vor.u32 %v2706_v43, %v2705_v21  ;;  %vm2506_vm15 = vcmp.eq.s32.totalorder %v2504_v40, 0 }
 0x15f   : > { %vm5358_vm14 = vcmp.lt.s32.totalorder %v5357_v48, 0  ;;  %vm2509_vm4 = vcmp.eq.s32.totalorder %v2504_v40, 2  ;;  %v2710_v56 = vor.u32 %v2709_v62, %v2708_v13  ;;  %vm2711_vm7 = vcmp.lt.s32.totalorder %v6866_v54, 1 }
 0x160   : > { %v2196_v55 = vsel %vm2194_vm9, %v2181_v49, %v2195_v6  ;;  %v2311_v11 = vsel %vm5358_vm14, 0, %v5357_v48  ;;  %v2508_v3 = vsel %vm2506_vm15, %v2181_v49, %v2195_v6  ;;  %v2511_v33 = vsel %vm2509_vm4, %v2198_v20, %v2189_v42 }
 0x161   : > { %v2200_v8 = vsel %vm2193_vm11, %v2196_v55, %v2199_v10  ;;  %v2312_v9 = vsub.s32 32, %v2311_v11  ;;  %v2313_v58 = vshll.u32 %v2304_v4, %v2311_v11  ;;  %v2316_v31 = vsub.s32 4294967266, %v2311_v11 }
 0x162   : > { %v2201_v12 = vsel %vm2190_vm13, nan, %v2200_v8  ;;  %vm2714_vm2 = vcmp.lt.s32.totalorder %v6866_v54, 4  ;;  %v2512_v32 = vsel %vm2505_vm1, %v2508_v3, %v2511_v33  ;;  %v2695_v57 = vshrl.u32 %v5636_v34, %v2694_v7 }
 0x163   : > { %5359 = vst [vmem:[%s5742_s17 + $0x70] sm:$0xff] %v2201_v12  ;;  %v2314_v0 = vshrl.u32 %v2296_v16, %v2312_v9  ;;  %v2317_v60 = vadd.s32 127, %v2316_v31  ;;  %vm2712_vm3 = vcmp.lt.s32.totalorder %v6866_v54, 2  ;;  %vm2713_vm5 = vcmp.lt.s32.totalorder %v6866_v54, 3 }
 0x164   : > { %v2513_v49 = vsel %vm2190_vm13, nan, %v2512_v32  ;;  %v2716_v22 = vsel %vm2714_vm2, %v2704_v37, 2102212464  ;;  %v2346_v48 = vadd.s32 3, %v2329_v14  ;;  %v2719_v42 = vsel %vm2711_vm7, %v2698_v35, %v2701_v25 }
 0x165   : > { %v2315_v59 = vor.u32 %v2314_v0, %v2313_v58  ;;  %v2318_v4 = vshll.u32 %v2317_v60, 23  ;;  %5367 = vst [vmem:[%s5742_s17 + $0xf0] sm:$0xff] %v2513_v49  ;;  %v2720_v7 = vsel %vm2714_vm2, %v2707_v50, 920167782  ;;  %v2723_v20 = vsel %vm2711_vm7, %v2701_v25, %v2704_v37 }
 0x166   : > { %v2721_v61 = vsel %vm2713_vm5, %v2704_v37, %v2720_v7  ;;  %v2724_v63 = vsel %vm2714_vm2, %v2710_v56, 1326507024  ;;  %v6922_v29 = vshll.u32 %v2687_v39, 8  ;;  %v2715_v6 = vsel %vm2711_vm7, %v2695_v57, %v2698_v35 }
 0x167   : > { %v2319_v16 = vor.u32 4788187, %v2318_v4  ;;  %v2322_v1 = vcvt.s32.f32 %v2315_v59  ;;  %v2717_v10 = vsel %vm2713_vm5, %v2701_v25, %v2716_v22  ;;  %v2722_v21 = vsel %vm2712_vm3, %v2719_v42, %v2721_v61 }
 0x168   : > { %v2725_v43 = vsel %vm2713_vm5, %v2707_v50, %v2724_v63  ;;  %v2728_v53 = vand.u32 65535, %v6922_v29  ;;  %v2729_v39 = vshrl.u32 %v6922_v29, 16  ;;  %v2752_v35 = vand.u32 65535, %v2722_v21 }
 0x169   : > { %v2320_v45 = vand.u32 2147483647, %v2319_v16  ;;  %v2726_v55 = vsel %vm2712_vm3, %v2723_v20, %v2725_v43  ;;  %v2753_v62 = vshrl.u32 %v2722_v21, 16  ;;  %v6936_v9 = vand.u32 3, %v2346_v48 }
 0x16a   : > { %v2730_v11 = vand.u32 65535, %v2726_v55  ;;  %v2731_v40 = vshrl.u32 %v2726_v55, 16  ;;  %v6938_v58 = vand.u32 3, %v2329_v14  ;;  %v6941_v31 = vsub.s32 32, %v6874_v41 }
 0x16b   : > { %v2323_v13 = vmul.f32 %v2322_v1, %v2320_v45  ;;  %v6945_v12 = vsel %vm2712_vm3, %v2715_v6, %v2717_v10  ;;  %v2755_v3 = vmul.u32 %v2753_v62, %v2728_v53  ;;  %v2756_v56 = vmul.u32 %v2752_v35, %v2729_v39 }
 0x16c   : > { %v2732_v25 = vmul.u32 %v2730_v11, %v2728_v53  ;;  %v2733_v37 = vmul.u32 %v2731_v40, %v2728_v53  ;;  %v2734_v50 = vmul.u32 %v2730_v11, %v2729_v39  ;;  %v2735_v60 = vmul.u32 %v2731_v40, %v2729_v39 }
 0x16d   : > { %v2324_v8 = vxor.u32 2147483648, %v2323_v13  ;;  %v2754_v33 = vmul.u32 %v2752_v35, %v2728_v53  ;;  %v2758_v57 = vshll.u32 %v2755_v3, 16  ;;  %v2851_v16 = vshll.u32 %v5636_v34, %v6874_v41 }
 0x16e   : > { %v2736_v59 = vshll.u32 %v2733_v37, 16  ;;  %v2738_v4 = vshll.u32 %v2734_v50, 16  ;;  %v2737_v32 = vshrl.u32 %v2733_v37, 16  ;;  %v2757_v49 = vmul.u32 %v2753_v62, %v2729_v39 }
 0x16f   : > { %v2325_v0 = vsel %vm2204_vm6, %v2324_v8, %v2323_v13  ;;  %v2760_v22 = vshll.u32 %v2756_v56, 16  ;;  %v2739_v23 = vshrl.u32 %v2734_v50, 16  ;;  %vm2762_vm9 = vc.u32 %v2754_v33, %v2758_v57 }
 0x170   : > { %v6952_v14 = vsel %vm6858_vm12, %v6223_v30, %v2325_v0  ;;  %vm2740_vm6 = vc.u32 %v2732_v25, %v2736_v59  ;;  %v2742_v1 = vadd.s32 %v2736_v59, %v2732_v25  ;;  %v2764_v45 = vadd.s32 %v2758_v57, %v2754_v33 }
 0x171   : > { %v2330_v54 = vmul.f32 %v6952_v14, %v6952_v14  ;;  %v2741_v7 = vsel %vm2740_vm6, 1, %v5642_v51  ;;  %v2763_v10 = vsel %vm2762_vm9, 1, %v5642_v51  ;;  %vm2352_vm10 = vcmp.eq.s32.totalorder %v6936_v9, 2 }
 0x172   : > { %v2743_v20 = vadd.s32 %v2741_v7, %v2735_v60  ;;  %vm2744_vm8 = vc.u32 %v2742_v1, %v2738_v4  ;;  %vm2663_vm11 = vcmp.eq.s32.totalorder %v6938_v58, 2  ;;  %v2759_v43 = vshrl.u32 %v2755_v3, 16 }
 0x173   : > { %v2331_v48 = vmul.f32 -0.001358992, %v2330_v54  ;;  %v2338_v42 = vmul.f32 -0.00019511016, %v2330_v54  ;;  %v2745_v6 = vsel %vm2744_vm8, 1, %v5642_v51  ;;  %v2765_v13 = vadd.s32 %v2763_v10, %v2757_v49 }
 0x174   : > { %v2747_v21 = vadd.s32 %v2745_v6, %v2743_v20  ;;  %vm2766_vm12 = vc.u32 %v2764_v45, %v2760_v22  ;;  %v2852_v11 = vshrl.u32 %v5637_v36, %v6941_v31  ;;  %vm2349_vm13 = vcmp.eq.s32.totalorder %v6936_v9, 0 }
 0x175   : > { %v2332_v61 = vadd.f32 0.041655596, %v2331_v48  ;;  %v2339_v63 = vadd.f32 0.008332121, %v2338_v42  ;;  %v2767_v39 = vsel %vm2766_vm12, 1, %v5642_v51  ;;  %vm2660_vm0 = vcmp.eq.s32.totalorder %v6938_v58, 0 }
 0x176   : > { %v2748_v40 = vadd.s32 %v2747_v21, %v2737_v32  ;;  %v2761_v35 = vshrl.u32 %v2756_v56, 16  ;;  %v2769_v62 = vadd.s32 %v2767_v39, %v2765_v13  ;;  %v2854_v8 = vshll.u32 %v5637_v36, %v6874_v41 }
 0x177   : > { %v2333_v55 = vmul.f32 %v2332_v61, %v2330_v54  ;;  %v2340_v53 = vmul.f32 %v2339_v63, %v2330_v54  ;;  %vm2348_vm14 = vcmp.lt.s32.totalorder %v6936_v9, 2  ;;  %vm2659_vm1 = vcmp.lt.s32.totalorder %v6938_v58, 2 }
 0x178   : > { %vm3316_vm15 = vcmp.gt.s32.totalorder %v6863_v28, 0  ;;  %v6973_v50 = vadd.s32 %v2764_v45, %v2760_v22  ;;  %v2860_v0 = vshll.u32 %v5639_v44, %v6874_v41  ;;  %v6977_v60 = vadd.s32 %v2748_v40, %v2739_v23 }
 0x179   : > { %v2334_v25 = vadd.f32 -0.4999988, %v2333_v55  ;;  %v2341_v37 = vadd.f32 -0.16666654, %v2340_v53  ;;  %v2770_v3 = vadd.s32 %v2769_v62, %v2759_v43  ;;  %v2855_v56 = vshrl.u32 %v5638_v38, %v6941_v31 }
 0x17a   : > { %v2861_v59 = vshrl.u32 %v5640_v47, %v6941_v31  ;;  %v2857_v32 = vshll.u32 %v5638_v38, %v6874_v41  ;;  %v2858_v57 = vshrl.u32 %v5639_v44, %v6941_v31  ;;  %v2772_v49 = vmul.u32 %v6922_v29, %v6945_v12 }
 0x17b   : > { %v2335_v4 = vmul.f32 %v2334_v25, %v2330_v54  ;;  %v2342_v33 = vmul.f32 %v2341_v37, %v2330_v54  ;;  %v2771_v1 = vadd.s32 %v2770_v3, %v2761_v35  ;;  %v2863_v48 = vshll.u32 %v5640_v47, %v6874_v41 }
 0x17c   : > { %v2862_v22 = vor.u32 %v2861_v59, %v2860_v0  ;;  %vm2774_vm4 = vc.u32 %v6977_v60, %v6973_v50  ;;  %v2864_v54 = vshrl.u32 %v5641_v52, %v6941_v31  ;;  %v2853_v20 = vor.u32 %v2852_v11, %v2851_v16 }
 0x17d   : > { %v2336_v42 = vadd.f32 1.0, %v2335_v4  ;;  %v2343_v23 = vadd.f32 1.0, %v2342_v33  ;;  %v2775_v7 = vadd.s32 1, %v2771_v1  ;;  %v2856_v45 = vor.u32 %v2855_v56, %v2854_v8 }
 0x17e   : > { %vm2869_vm7 = vcmp.lt.s32.totalorder %v6872_v24, 4  ;;  %v2859_v12 = vor.u32 %v2858_v57, %v2857_v32  ;;  %vm2866_vm2 = vcmp.lt.s32.totalorder %v6872_v24, 1  ;;  %v2865_v63 = vor.u32 %v2864_v54, %v2863_v48 }
 0x17f   : > { %v2344_v61 = vmul.f32 %v2343_v23, %v6952_v14  ;;  %v2353_v29 = vxor.u32 2147483648, %v2336_v42  ;;  %v2776_v41 = vsel %vm2774_vm4, %v2775_v7, %v2771_v1  ;;  %vm2868_vm3 = vcmp.lt.s32.totalorder %v6872_v24, 3 }
 0x180   : > { %v2875_v6 = vsel %vm2869_vm7, %v2862_v22, 920167782  ;;  %v2777_v43 = vadd.s32 %v2776_v41, %v2772_v49  ;;  %vm2345_vm5 = vweird.f32 %v6223_v30  ;;  %v5392_v14 = vadd.s32 4294967169, %v6868_v18 }
 0x181   : > { %v2350_v10 = vxor.u32 2147483648, %v2344_v61  ;;  %v2354_v16 = vsel %vm2352_vm10, %v2353_v29, %v2344_v61  ;;  %v2665_v21 = vsel %vm2663_vm11, %v2353_v29, %v2344_v61  ;;  %vm2867_vm6 = vcmp.lt.s32.totalorder %v6872_v24, 2 }
 0x182   : > { %v2874_v13 = vsel %vm2866_vm2, %v2853_v20, %v2856_v45  ;;  %v2778_v39 = vadd.s32 536870912, %v2777_v43  ;;  %v2876_v11 = vsel %vm2868_vm3, %v2859_v12, %v2875_v6  ;;  %v3317_v40 = vsel %vm3316_vm15, %v6863_v28, 0 }
 0x183   : > { %v2351_v55 = vsel %vm2349_vm13, %v2336_v42, %v2350_v10  ;;  %v2662_v53 = vsel %vm2660_vm0, %v2336_v42, %v2350_v10  ;;  %v2878_v35 = vsel %vm2866_vm2, %v2856_v45, %v2859_v12  ;;  %v2879_v37 = vsel %vm2869_vm7, %v2865_v63, 1326507024 }
 0x184   : > { %v2355_v30 = vsel %vm2348_vm14, %v2351_v55, %v2354_v16  ;;  %v2666_v18 = vsel %vm2659_vm1, %v2662_v53, %v2665_v21  ;;  %v7025_v25 = vshrl.u32 %v2778_v39, 30  ;;  %v7030_v9 = vadd.s32 1, %v5392_v14 }
 0x185   : > { %v2356_v62 = vsel %vm2345_vm5, nan, %v2355_v30  ;;  %v2667_v8 = vsel %vm2345_vm5, nan, %v2666_v18  ;;  %v2877_v58 = vsel %vm2867_vm6, %v2874_v13, %v2876_v11  ;;  %v2880_v0 = vsel %vm2868_vm3, %v2862_v22, %v2879_v37 }
 0x186   : > { %5360 = vst [vmem:[%s5742_s17 + $0x78] sm:$0xff] %v2356_v62  ;;  %v7038_v28 = vshll.u32 %v2842_v15, 8  ;;  %v2780_v3 = vshll.u32 %v7025_v25, 30  ;;  %v2850_v56 = vshrl.u32 %v5636_v34, %v6941_v31  ;;  %v2871_v59 = vsel %vm2869_vm7, %v2859_v12, 2102212464 }
 0x187   : > { %5368 = vst [vmem:[%s5742_s17 + $0xf8] sm:$0xff] %v2667_v8  ;;  %v2881_v4 = vsel %vm2867_vm6, %v2878_v35, %v2880_v0  ;;  %v7050_v15 = vshrl.u32 %v3317_v40, 5  ;;  %v2907_v49 = vand.u32 65535, %v2877_v58  ;;  %v2908_v22 = vshrl.u32 %v2877_v58, 16 }
 0x188   : > { %v2883_v33 = vand.u32 65535, %v7038_v28  ;;  %v2884_v32 = vshrl.u32 %v7038_v28, 16  ;;  %v2885_v57 = vand.u32 65535, %v2881_v4  ;;  %v2886_v27 = vshrl.u32 %v2881_v4, 16 }
 0x189   : > { %v2781_v1 = vsub.s32 %v2777_v43, %v2780_v3  ;;  %v7052_v48 = vand.u32 31, %v3317_v40  ;;  %vm3471_vm8 = vcmp.gt.s32.totalorder %v7030_v9, 0  ;;  %v2870_v7 = vsel %vm2866_vm2, %v2850_v56, %v2853_v20 }
 0x18a   : > { %v2887_v31 = vmul.u32 %v2885_v57, %v2883_v33  ;;  %v2888_v42 = vmul.u32 %v2886_v27, %v2883_v33  ;;  %v2889_v23 = vmul.u32 %v2885_v57, %v2884_v32  ;;  %v2872_v61 = vsel %vm2868_vm3, %v2856_v45, %v2871_v59 }
 0x18b   : > { %vm2782_vm9 = vcmp.lt.s32.totalorder %v2781_v1, 0  ;;  %v2783_v54 = vsub.s32 0, %v2781_v1  ;;  %v2773_v29 = vadd.s32 %v6973_v50, %v6977_v60  ;;  %v2890_v12 = vmul.u32 %v2886_v27, %v2884_v32 }
 0x18c   : > { %v2891_v41 = vshll.u32 %v2888_v42, 16  ;;  %v2893_v63 = vshll.u32 %v2889_v23, 16  ;;  %v2909_v10 = vmul.u32 %v2907_v49, %v2883_v33  ;;  %v2910_v16 = vmul.u32 %v2908_v22, %v2883_v33 }
 0x18d   : > { %v2784_v6 = vsel %vm2782_vm9, %v2783_v54, %v2781_v1  ;;  %v2911_v21 = vmul.u32 %v2907_v49, %v2884_v32  ;;  %v7063_v14 = vsel %vm2867_vm6, %v2870_v7, %v2872_v61  ;;  %v2912_v45 = vmul.u32 %v2908_v22, %v2884_v32 }
 0x18e   : > { %v2785_v43 = vclz %v2784_v6  ;;  %vm2895_vm10 = vc.u32 %v2887_v31, %v2891_v41  ;;  %v2897_v20 = vadd.s32 %v2891_v41, %v2887_v31  ;;  %v2913_v55 = vshll.u32 %v2910_v16, 16 }
 0x18f   : > { %v2896_v13 = vsel %vm2895_vm10, 1, %v5642_v51  ;;  %v2915_v53 = vshll.u32 %v2911_v21, 16  ;;  %v2892_v60 = vshrl.u32 %v2888_v42, 16  ;;  %v2803_v11 = vsub.s32 4, %v7025_v25 }
 0x190   : > { %v5374_v50 = vadd.s32 4294967294, %v2785_v43  ;;  %v2898_v39 = vadd.s32 %v2896_v13, %v2890_v12  ;;  %vm2899_vm11 = vc.u32 %v2897_v20, %v2893_v63  ;;  %vm2917_vm12 = vc.u32 %v2909_v10, %v2913_v55 }
 0x191   : > { %v2900_v30 = vsel %vm2899_vm11, 1, %v5642_v51  ;;  %v2919_v18 = vadd.s32 %v2913_v55, %v2909_v10  ;;  %v2918_v40 = vsel %vm2917_vm12, 1, %v5642_v51  ;;  %v3305_v35 = vand.u32 2147483647, %v6822_v5 }
 0x192   : > { %vm5375_vm13 = vcmp.lt.s32.totalorder %v5374_v50, 0  ;;  %v2902_v24 = vadd.s32 %v2900_v30, %v2898_v39  ;;  %v2894_v8 = vshrl.u32 %v2889_v23, 16  ;;  %v2920_v37 = vadd.s32 %v2918_v40, %v2912_v45 }
 0x193   : > { %v2788_v62 = vsel %vm5375_vm13, 0, %v5374_v50  ;;  %vm2921_vm0 = vc.u32 %v2919_v18, %v2915_v53  ;;  %v7071_v59 = vsub.s32 32, %v7052_v48  ;;  %vm2681_vm14 = vcmp.lt.s32.totalorder %v6804_v17, 0 }
 0x194   : > { %v2789_v58 = vsub.s32 32, %v2788_v62  ;;  %v2790_v0 = vshll.u32 %v2781_v1, %v2788_v62  ;;  %v2793_v3 = vsub.s32 4294967266, %v2788_v62  ;;  %v2903_v56 = vadd.s32 %v2902_v24, %v2892_v60 }
 0x195   : > { %v2914_v4 = vshrl.u32 %v2910_v16, 16  ;;  %v2922_v33 = vsel %vm2921_vm0, 1, %v5642_v51  ;;  %v3472_v32 = vsel %vm3471_vm8, %v7030_v9, 0  ;;  %v2804_v1 = vsel %vm2681_vm14, %v2803_v11, %v7025_v25 }
 0x196   : > { %v2791_v57 = vshrl.u32 %v2773_v29, %v2789_v58  ;;  %v2794_v27 = vadd.s32 127, %v2793_v3  ;;  %v2916_v49 = vshrl.u32 %v2911_v21, 16  ;;  %v2924_v22 = vadd.s32 %v2922_v33, %v2920_v37  ;;  %v7140_v58 = vld [vmem:[%s5733_s15 + $0x30] sm:$0xff] }
 0x197   : > { %v2927_v31 = vmul.u32 %v7038_v28, %v7063_v14  ;;  %v3312_v42 = vand.u32 8388607, %v3305_v35  ;;  %v7085_v7 = vadd.s32 %v2903_v56, %v2894_v8  ;;  %v7087_v61 = vadd.s32 %v2919_v18, %v2915_v53  ;;  %5407 = vst [vmem:[%s5742_s17 + $0x30] sm:$0xff] %v7140_v58 }
 0x198   : > { %v2792_v23 = vor.u32 %v2791_v57, %v2790_v0  ;;  %v2795_v54 = vshll.u32 %v2794_v27, 23  ;;  %v2925_v9 = vadd.s32 %v2924_v22, %v2914_v4  ;;  %v3322_v29 = vshll.u32 %v5636_v34, %v7052_v48 }
 0x199   : > { %v3325_v25 = vshll.u32 %v5637_v36, %v7052_v48  ;;  %v3326_v12 = vshrl.u32 %v5638_v38, %v7071_v59  ;;  %v3328_v63 = vshll.u32 %v5638_v38, %v7052_v48  ;;  %v3329_v6 = vshrl.u32 %v5639_v44, %v7071_v59 }
 0x19a   : > { %v2796_v28 = vor.u32 4788187, %v2795_v54  ;;  %v2799_v41 = vcvt.s32.f32 %v2792_v23  ;;  %v2926_v10 = vadd.s32 %v2925_v9, %v2916_v49  ;;  %v3323_v16 = vshrl.u32 %v5637_v36, %v7071_v59 }
 0x19b   : > { %v3331_v21 = vshll.u32 %v5639_v44, %v7052_v48  ;;  %v3332_v43 = vshrl.u32 %v5640_v47, %v7071_v59  ;;  %vm2929_vm1 = vc.u32 %v7085_v7, %v7087_v61  ;;  %v3334_v20 = vshll.u32 %v5640_v47, %v7052_v48 }
 0x19c   : > { %v2797_v14 = vand.u32 2147483647, %v2796_v28  ;;  %v3335_v13 = vshrl.u32 %v5641_v52, %v7071_v59  ;;  %vm7113_vm15 = vcmp.le.f32.partialorder %v2679_v26, 0.7853982  ;;  %v2930_v55 = vadd.s32 1, %v2926_v10 }
 0x19d   : > { %v7117_v53 = vor.u32 %v3326_v12, %v3325_v25  ;;  %v7119_v50 = vor.u32 %v3329_v6, %v3328_v63  ;;  %vm3337_vm4 = vcmp.lt.s32.totalorder %v7050_v15, 1  ;;  %vm3340_vm7 = vcmp.lt.s32.totalorder %v7050_v15, 4 }
 0x19e   : > { %v2800_v60 = vmul.f32 %v2799_v41, %v2797_v14  ;;  %v3336_v39 = vor.u32 %v3335_v13, %v3334_v20  ;;  %v7125_v48 = vsel %vm7113_vm15, 0, %v2804_v1  ;;  %v2931_v26 = vsel %vm2929_vm1, %v2930_v55, %v2926_v10 }
 0x19f   : > { %v3313_v11 = vor.u32 8388608, %v3312_v42  ;;  %v3333_v30 = vor.u32 %v3332_v43, %v3331_v21  ;;  %v2932_v24 = vadd.s32 %v2931_v26, %v2927_v31  ;;  %v7127_v40 = vor.u32 %v3323_v16, %v3322_v29 }
 0x1a0   : > { %v2801_v18 = vxor.u32 2147483648, %v2800_v60  ;;  %vm3339_vm2 = vcmp.lt.s32.totalorder %v7050_v15, 3  ;;  %v7130_v62 = vshrl.u32 %v3472_v32, 5  ;;  %vm3338_vm3 = vcmp.lt.s32.totalorder %v7050_v15, 2 }
 0x1a1   : > { %v3349_v8 = vsel %vm3337_vm4, %v7117_v53, %v7119_v50  ;;  %v3350_v37 = vsel %vm3340_vm7, %v3336_v39, 1326507024  ;;  %v7142_v0 = vand.u32 31, %v3472_v32  ;;  %v2823_v56 = vadd.s32 3, %v7125_v48 }
 0x1a2   : > { %v2802_v3 = vsel %vm2681_vm14, %v2801_v18, %v2800_v60  ;;  %v2933_v4 = vadd.s32 536870912, %v2932_v24  ;;  %v3346_v57 = vsel %vm3340_vm7, %v3333_v30, 920167782  ;;  %v3351_v32 = vsel %vm3339_vm2, %v3333_v30, %v3350_v37 }
 0x1a3   : > { %v7152_v33 = vsel %vm7113_vm15, %v6804_v17, %v2802_v3  ;;  %v7158_v27 = vshll.u32 %v3313_v11, 8  ;;  %v3345_v22 = vsel %vm3337_vm4, %v7127_v40, %v7117_v53  ;;  %v3352_v31 = vsel %vm3338_vm3, %v3349_v8, %v3351_v32 }
 0x1a4   : > { %v2807_v1 = vmul.f32 %v7152_v33, %v7152_v33  ;;  %v2934_v49 = vshrl.u32 %v2933_v4, 30  ;;  %v3356_v54 = vand.u32 65535, %v3352_v31  ;;  %v3357_v9 = vshrl.u32 %v3352_v31, 16 }
 0x1a5   : > { %v7169_v42 = vand.u32 65535, %v7158_v27  ;;  %v7172_v23 = vshrl.u32 %v7158_v27, 16  ;;  %v3347_v28 = vsel %vm3339_vm2, %v7119_v50, %v3346_v57  ;;  %v7177_v41 = vand.u32 3, %v2823_v56 }
 0x1a6   : > { %v2808_v29 = vmul.f32 -0.001358992, %v2807_v1  ;;  %v2815_v25 = vmul.f32 -0.00019511016, %v2807_v1  ;;  %v2935_v12 = vshll.u32 %v2934_v49, 30  ;;  %vm2836_vm6 = vcmp.lt.s32.totalorder %v6808_v46, 0 }
 0x1a7   : > { %v3358_v63 = vmul.u32 %v3356_v54, %v7169_v42  ;;  %v7181_v6 = vmul.u32 %v3357_v9, %v7169_v42  ;;  %v7184_v10 = vmul.u32 %v3356_v54, %v7172_v23  ;;  %vm7188_vm5 = vcmp.le.f32.partialorder %v2834_v19, 0.7853982 }
 0x1a8   : > { %v2809_v16 = vadd.f32 0.041655596, %v2808_v29  ;;  %v2816_v21 = vadd.f32 0.008332121, %v2815_v25  ;;  %v2936_v14 = vsub.s32 %v2932_v24, %v2935_v12  ;;  %v2958_v20 = vsub.s32 4, %v2934_v49 }
 0x1a9   : > { %v7195_v13 = vsel %vm3338_vm3, %v3345_v22, %v3347_v28  ;;  %v3362_v45 = vshll.u32 %v7181_v6, 16  ;;  %v3364_v55 = vshll.u32 %v7184_v10, 16  ;;  %vm2826_vm9 = vcmp.eq.s32.totalorder %v7177_v41, 0 }
 0x1aa   : > { %v2810_v60 = vmul.f32 %v2809_v16, %v2807_v1  ;;  %v2817_v39 = vmul.f32 %v2816_v21, %v2807_v1  ;;  %vm2937_vm8 = vcmp.lt.s32.totalorder %v2936_v14, 0  ;;  %v2938_v26 = vsub.s32 0, %v2936_v14 }
 0x1ab   : > { %v3321_v19 = vshrl.u32 %v5636_v34, %v7071_v59  ;;  %vm3366_vm10 = vc.u32 %v3358_v63, %v3362_v45  ;;  %v3368_v11 = vadd.s32 %v3362_v45, %v3358_v63  ;;  %vm2825_vm11 = vcmp.lt.s32.totalorder %v7177_v41, 2 }
 0x1ac   : > { %v2811_v30 = vadd.f32 -0.4999988, %v2810_v60  ;;  %v2818_v18 = vadd.f32 -0.16666654, %v2817_v39  ;;  %v2939_v24 = vsel %vm2937_vm8, %v2938_v26, %v2936_v14  ;;  %v3361_v8 = vmul.u32 %v3357_v9, %v7172_v23 }
 0x1ad   : > { %vm2822_vm12 = vweird.f32 %v6804_v17  ;;  %vm2829_vm13 = vcmp.eq.s32.totalorder %v7177_v41, 2  ;;  %v2940_v37 = vclz %v2939_v24  ;;  %v3367_v3 = vsel %vm3366_vm10, 1, %v5642_v51 }
 0x1ae   : > { %v3379_v56 = vshrl.u32 %v7195_v13, 16  ;;  %v2812_v4 = vmul.f32 %v2811_v30, %v2807_v1  ;;  %v2819_v59 = vmul.f32 %v2818_v18, %v2807_v1  ;;  %v2959_v57 = vsel %vm2836_vm6, %v2958_v20, %v2934_v49 }
 0x1af   : > { %vm3370_vm0 = vc.u32 %v3368_v11, %v3364_v55  ;;  %v2928_v32 = vadd.s32 %v7087_v61, %v7085_v7  ;;  %v5377_v22 = vadd.s32 4294967294, %v2940_v37  ;;  %v3341_v31 = vsel %vm3337_vm4, %v3321_v19, %v7127_v40 }
 0x1b0   : > { %v3342_v54 = vsel %vm3340_vm7, %v7119_v50, 2102212464  ;;  %v2813_v9 = vadd.f32 1.0, %v2812_v4  ;;  %v2820_v29 = vadd.f32 1.0, %v2819_v59  ;;  %v3369_v25 = vadd.s32 %v3367_v3, %v3361_v8 }
 0x1b1   : > { %v3378_v1 = vand.u32 65535, %v7195_v13  ;;  %vm5378_vm14 = vcmp.lt.s32.totalorder %v5377_v22, 0  ;;  %v7221_v49 = vsel %vm7188_vm5, 0, %v2959_v57  ;;  %v3371_v7 = vsel %vm3370_vm0, 1, %v5642_v51 }
 0x1b2   : > { %v7225_v61 = vmul.u32 %v3379_v56, %v7169_v42  ;;  %v2821_v40 = vmul.f32 %v2820_v29, %v7152_v33  ;;  %v2830_v12 = vxor.u32 2147483648, %v2813_v9  ;;  %v2943_v28 = vsel %vm5378_vm14, 0, %v5377_v22 }
 0x1b3   : > { %v3363_v50 = vshrl.u32 %v7181_v6, 16  ;;  %v2944_v63 = vsub.s32 32, %v2943_v28  ;;  %v2945_v16 = vshll.u32 %v2936_v14, %v2943_v28  ;;  %v2948_v21 = vsub.s32 4294967266, %v2943_v28 }
 0x1b4   : > { %v3136_v20 = vand.u32 3, %v7125_v48  ;;  %v2827_v13 = vxor.u32 2147483648, %v2821_v40  ;;  %v2831_v45 = vsel %vm2829_vm13, %v2830_v12, %v2821_v40  ;;  %v3373_v55 = vadd.s32 %v3371_v7, %v3369_v25 }
 0x1b5   : > { %v3380_v60 = vmul.u32 %v3378_v1, %v7169_v42  ;;  %v2946_v39 = vshrl.u32 %v2928_v32, %v2944_v63  ;;  %v2949_v26 = vadd.s32 127, %v2948_v21  ;;  %v3382_v33 = vmul.u32 %v3378_v1, %v7172_v23  ;;  %v7270_v63 = vld [vmem:[%s5733_s15 + $0x38] sm:$0xff] }
 0x1b6   : > { %v3384_v19 = vshll.u32 %v7225_v61, 16  ;;  %v2828_v6 = vsel %vm2826_vm9, %v2813_v9, %v2827_v13  ;;  %vm3137_vm1 = vcmp.lt.s32.totalorder %v3136_v20, 2  ;;  %vm3138_vm15 = vcmp.eq.s32.totalorder %v3136_v20, 0  ;;  %5408 = vst [vmem:[%s5742_s17 + $0x38] sm:$0xff] %v7270_v63 }
 0x1b7   : > { %vm3141_vm4 = vcmp.eq.s32.totalorder %v3136_v20, 2  ;;  %v2832_v48 = vsel %vm2825_vm11, %v2828_v6, %v2831_v45  ;;  %v2947_v14 = vor.u32 %v2946_v39, %v2945_v16  ;;  %v2950_v11 = vshll.u32 %v2949_v26, 23 }
 0x1b8   : > { %v3140_v42 = vsel %vm3138_vm15, %v2813_v9, %v2827_v13  ;;  %v2833_v30 = vsel %vm2822_vm12, nan, %v2832_v48  ;;  %v3143_v18 = vsel %vm3141_vm4, %v2830_v12, %v2821_v40  ;;  %v3343_v24 = vsel %vm3339_vm2, %v7117_v53, %v3342_v54 }
 0x1b9   : > { %v3383_v8 = vmul.u32 %v3379_v56, %v7172_v23  ;;  %5379 = vst [vmem:[%s5742_s17 + $0x80] sm:$0xff] %v2833_v30  ;;  %v2951_v37 = vor.u32 4788187, %v2950_v11  ;;  %v2954_v3 = vcvt.s32.f32 %v2947_v14  ;;  %v2978_v41 = vadd.s32 3, %v7221_v49 }
 0x1ba   : > { %v3144_v4 = vsel %vm3137_vm1, %v3140_v42, %v3143_v18  ;;  %v3365_v57 = vshrl.u32 %v7184_v10, 16  ;;  %v3374_v32 = vadd.s32 %v3373_v55, %v3363_v50  ;;  %v3386_v22 = vshll.u32 %v3382_v33, 16 }
 0x1bb   : > { %v3145_v59 = vsel %vm2822_vm12, nan, %v3144_v4  ;;  %v2952_v9 = vand.u32 2147483647, %v2951_v37  ;;  %v3344_v53 = vsel %vm3338_vm3, %v3341_v31, %v3343_v24  ;;  %vm3388_vm7 = vc.u32 %v3380_v60, %v3384_v19 }
 0x1bc   : > { %5387 = vst [vmem:[%s5742_s17 + $0x100] sm:$0xff] %v3145_v59  ;;  %v3390_v23 = vadd.s32 %v3384_v19, %v3380_v60  ;;  %v7254_v56 = vsub.s32 32, %v7142_v0  ;;  %v3385_v54 = vshrl.u32 %v7225_v61, 16  ;;  %v3389_v17 = vsel %vm3388_vm7, 1, %v5642_v51 }
 0x1bd   : > { %v3460_v29 = vand.u32 2147483647, %v6839_v2  ;;  %v2955_v10 = vmul.f32 %v2954_v3, %v2952_v9  ;;  %v7259_v25 = vand.u32 3, %v2978_v41  ;;  %v3391_v1 = vadd.s32 %v3389_v17, %v3383_v8 }
 0x1be   : > { %vm3392_vm2 = vc.u32 %v3390_v23, %v3386_v22  ;;  %v7261_v15 = vadd.s32 %v3374_v32, %v3365_v57  ;;  %v3387_v31 = vshrl.u32 %v3382_v33, 16  ;;  %v3398_v40 = vmul.u32 %v7158_v27, %v3344_v53 }
 0x1bf   : > { %v3393_v7 = vsel %vm3392_vm2, 1, %v5642_v51  ;;  %v2956_v12 = vxor.u32 2147483648, %v2955_v10  ;;  %v7265_v28 = vadd.s32 %v3390_v23, %v3386_v22  ;;  %v3477_v50 = vshll.u32 %v5636_v34, %v7142_v0 }
 0x1c0   : > { %v3395_v61 = vadd.s32 %v3393_v7, %v3391_v1  ;;  %v3467_v16 = vand.u32 8388607, %v3460_v29  ;;  %v3480_v21 = vshll.u32 %v5637_v36, %v7142_v0  ;;  %v3481_v20 = vshrl.u32 %v5638_v38, %v7254_v56 }
 0x1c1   : > { %v3483_v27 = vshll.u32 %v5638_v38, %v7142_v0  ;;  %v2957_v13 = vsel %vm2836_vm6, %v2956_v12, %v2955_v10  ;;  %v3484_v55 = vshrl.u32 %v5639_v44, %v7254_v56  ;;  %v3486_v60 = vshll.u32 %v5639_v44, %v7142_v0 }
 0x1c2   : > { %v3396_v45 = vadd.s32 %v3395_v61, %v3385_v54  ;;  %v2960_v39 = vsel %vm7188_vm5, %v6808_v46, %v2957_v13  ;;  %v3478_v26 = vshrl.u32 %v5637_v36, %v7254_v56  ;;  %v3487_v33 = vshrl.u32 %v5640_v47, %v7254_v56 }
 0x1c3   : > { %v3489_v19 = vshll.u32 %v5640_v47, %v7142_v0  ;;  %v2962_v6 = vmul.f32 %v2960_v39, %v2960_v39  ;;  %vm3400_vm3 = vc.u32 %v7261_v15, %v7265_v28  ;;  %v3490_v14 = vshrl.u32 %v5641_v52, %v7254_v56 }
 0x1c4   : > { %v3397_v48 = vadd.s32 %v3396_v45, %v3387_v31  ;;  %v7301_v11 = vor.u32 %v3481_v20, %v3480_v21  ;;  %v7303_v43 = vor.u32 %v3484_v55, %v3483_v27  ;;  %v3488_v42 = vor.u32 %v3487_v33, %v3486_v60 }
 0x1c5   : > { %vm3492_vm5 = vcmp.lt.s32.totalorder %v7130_v62, 1  ;;  %v2963_v30 = vmul.f32 -0.001358992, %v2962_v6  ;;  %v2970_v18 = vmul.f32 -0.00019511016, %v2962_v6  ;;  %v3491_v8 = vor.u32 %v3490_v14, %v3489_v19 }
 0x1c6   : > { %v3401_v24 = vadd.s32 1, %v3397_v48  ;;  %v3468_v0 = vor.u32 8388608, %v3467_v16  ;;  %v7306_v37 = vor.u32 %v3478_v26, %v3477_v50  ;;  %vm3493_vm6 = vcmp.lt.s32.totalorder %v7130_v62, 2 }
 0x1c7   : > { %vm3495_vm8 = vcmp.lt.s32.totalorder %v7130_v62, 4  ;;  %v2964_v3 = vadd.f32 0.041655596, %v2963_v30  ;;  %v2971_v41 = vadd.f32 0.008332121, %v2970_v18  ;;  %vm3494_vm9 = vcmp.lt.s32.totalorder %v7130_v62, 3 }
 0x1c8   : > { %v3402_v4 = vsel %vm3400_vm3, %v3401_v24, %v3397_v48  ;;  %v3501_v57 = vsel %vm3495_vm8, %v3488_v42, 920167782  ;;  %v3504_v32 = vsel %vm3492_vm5, %v7301_v11, %v7303_v43  ;;  %v3505_v22 = vsel %vm3495_vm8, %v3491_v8, 1326507024 }
 0x1c9   : > { %v3403_v59 = vadd.s32 %v3402_v4, %v3398_v40  ;;  %v2965_v9 = vmul.f32 %v2964_v3, %v2962_v6  ;;  %v2972_v53 = vmul.f32 %v2971_v41, %v2962_v6  ;;  %v3290_v23 = vand.u32 3, %v7221_v49 }
 0x1ca   : > { %v3500_v17 = vsel %vm3492_vm5, %v7306_v37, %v7301_v11  ;;  %v3506_v10 = vsel %vm3494_vm9, %v3488_v42, %v3505_v22  ;;  %v7329_v1 = vshll.u32 %v3468_v0, 8  ;;  %vm2980_vm10 = vcmp.lt.s32.totalorder %v7259_v25, 2 }
 0x1cb   : > { %v3404_v54 = vadd.s32 536870912, %v3403_v59  ;;  %v2966_v31 = vadd.f32 -0.4999988, %v2965_v9  ;;  %v2973_v7 = vadd.f32 -0.16666654, %v2972_v53  ;;  %v3502_v40 = vsel %vm3494_vm9, %v7303_v43, %v3501_v57 }
 0x1cc   : > { %v3507_v49 = vsel %vm3493_vm6, %v3504_v32, %v3506_v10  ;;  %vm2977_vm11 = vweird.f32 %v6808_v46  ;;  %v3509_v61 = vand.u32 65535, %v7329_v1  ;;  %v3510_v50 = vshrl.u32 %v7329_v1, 16 }
 0x1cd   : > { %v7338_v12 = vshrl.u32 %v3404_v54, 30  ;;  %v3511_v16 = vand.u32 65535, %v3507_v49  ;;  %v2967_v21 = vmul.f32 %v2966_v31, %v2962_v6  ;;  %v2974_v20 = vmul.f32 %v2973_v7, %v2962_v6 }
 0x1ce   : > { %vm2981_vm12 = vcmp.eq.s32.totalorder %v7259_v25, 0  ;;  %v3512_v27 = vshrl.u32 %v3507_v49, 16  ;;  %vm2984_vm13 = vcmp.eq.s32.totalorder %v7259_v25, 2  ;;  %v3503_v45 = vsel %vm3493_vm6, %v3500_v17, %v3502_v40 }
 0x1cf   : > { %v3406_v13 = vshll.u32 %v7338_v12, 30  ;;  %v7347_v55 = vmul.u32 %v3511_v16, %v3510_v50  ;;  %v2968_v60 = vadd.f32 1.0, %v2967_v21  ;;  %v2975_v26 = vadd.f32 1.0, %v2974_v20 }
 0x1d0   : > { %v3513_v33 = vmul.u32 %v3511_v16, %v3509_v61  ;;  %v7349_v19 = vmul.u32 %v3512_v27, %v3509_v61  ;;  %vm3291_vm0 = vcmp.lt.s32.totalorder %v3290_v23, 2  ;;  %vm3292_vm14 = vcmp.eq.s32.totalorder %v3290_v23, 0 }
 0x1d1   : > { %vm3295_vm1 = vcmp.eq.s32.totalorder %v3290_v23, 2  ;;  %v3407_v6 = vsub.s32 %v3403_v59, %v3406_v13  ;;  %v2976_v48 = vmul.f32 %v2975_v26, %v2960_v39  ;;  %v2985_v14 = vxor.u32 2147483648, %v2968_v60 }
 0x1d2   : > { %v3517_v42 = vshll.u32 %v7349_v19, 16  ;;  %v3534_v30 = vshrl.u32 %v3503_v45, 16  ;;  %v3516_v24 = vmul.u32 %v3512_v27, %v3510_v50  ;;  %v3519_v8 = vshll.u32 %v7347_v55, 16 }
 0x1d3   : > { %vm3408_vm15 = vcmp.lt.s32.totalorder %v3407_v6, 0  ;;  %v3409_v18 = vsub.s32 0, %v3407_v6  ;;  %v2982_v0 = vxor.u32 2147483648, %v2976_v48  ;;  %v2986_v3 = vsel %vm2984_vm13, %v2985_v14, %v2976_v48 }
 0x1d4   : > { %v3297_v41 = vsel %vm3295_vm1, %v2985_v14, %v2976_v48  ;;  %vm3521_vm4 = vc.u32 %v3513_v33, %v3517_v42  ;;  %v3523_v39 = vadd.s32 %v3517_v42, %v3513_v33  ;;  %v3533_v57 = vand.u32 65535, %v3503_v45 }
 0x1d5   : > { %v3410_v4 = vsel %vm3408_vm15, %v3409_v18, %v3407_v6  ;;  %v3522_v59 = vsel %vm3521_vm4, 1, %v5642_v51  ;;  %v2983_v32 = vsel %vm2981_vm12, %v2968_v60, %v2982_v0  ;;  %v3294_v22 = vsel %vm3292_vm14, %v2968_v60, %v2982_v0 }
 0x1d6   : > { %v3411_v9 = vclz %v3410_v4  ;;  %v3536_v53 = vmul.u32 %v3534_v30, %v3509_v61  ;;  %v2987_v54 = vsel %vm2980_vm10, %v2983_v32, %v2986_v3  ;;  %v3298_v17 = vsel %vm3291_vm0, %v3294_v22, %v3297_v41 }
 0x1d7   : > { %vm3525_vm7 = vc.u32 %v3523_v39, %v3519_v8  ;;  %v2988_v10 = vsel %vm2977_vm11, nan, %v2987_v54  ;;  %v3299_v31 = vsel %vm2977_vm11, nan, %v3298_v17  ;;  %v3524_v40 = vadd.s32 %v3522_v59, %v3516_v24 }
 0x1d8   : > { %v5390_v7 = vadd.s32 4294967294, %v3411_v9  ;;  %5380 = vst [vmem:[%s5742_s17 + $0x88] sm:$0xff] %v2988_v10  ;;  %v3476_v49 = vshrl.u32 %v5636_v34, %v7254_v56  ;;  %v3526_v16 = vsel %vm3525_vm7, 1, %v5642_v51  ;;  %v3537_v21 = vmul.u32 %v3533_v57, %v3510_v50 }
 0x1d9   : > { %5388 = vst [vmem:[%s5742_s17 + $0x108] sm:$0xff] %v3299_v31  ;;  %v3399_v25 = vadd.s32 %v7265_v28, %v7261_v15  ;;  %v3535_v23 = vmul.u32 %v3533_v57, %v3509_v61  ;;  %v3539_v20 = vshll.u32 %v3536_v53, 16  ;;  %vm3307_vm3 = vcmp.lt.s32.totalorder %v6822_v5, 0 }
 0x1da   : > { %vm5391_vm2 = vcmp.lt.s32.totalorder %v5390_v7, 0  ;;  %v3518_v27 = vshrl.u32 %v7349_v19, 16  ;;  %v3538_v13 = vmul.u32 %v3534_v30, %v3510_v50  ;;  %v3528_v56 = vadd.s32 %v3526_v16, %v3524_v40 }
 0x1db   : > { %v3414_v46 = vsel %vm5391_vm2, 0, %v5390_v7  ;;  %vm7377_vm10 = vcmp.le.f32.partialorder %v3305_v35, 0.7853982  ;;  %v3496_v15 = vsel %vm3492_vm5, %v3476_v49, %v7306_v37  ;;  %v3497_v28 = vsel %vm3495_vm8, %v7303_v43, 2102212464 }
 0x1dc   : > { %v3415_v45 = vsub.s32 32, %v3414_v46  ;;  %v3416_v60 = vshll.u32 %v3407_v6, %v3414_v46  ;;  %v3419_v26 = vsub.s32 4294967266, %v3414_v46  ;;  %v3541_v61 = vshll.u32 %v3537_v21, 16 }
 0x1dd   : > { %v3429_v6 = vsub.s32 4, %v7338_v12  ;;  %vm3543_vm11 = vc.u32 %v3535_v23, %v3539_v20  ;;  %v3520_v48 = vshrl.u32 %v7347_v55, 16  ;;  %v3545_v14 = vadd.s32 %v3539_v20, %v3535_v23 }
 0x1de   : > { %v3417_v50 = vshrl.u32 %v3399_v25, %v3415_v45  ;;  %v3420_v19 = vadd.s32 127, %v3419_v26  ;;  %v3544_v35 = vsel %vm3543_vm11, 1, %v5642_v51  ;;  %v7391_v42 = vmul.f32 402.12387, %v7140_v58 }
 0x1df   : > { %v3529_v18 = vadd.s32 %v3528_v56, %v3518_v27  ;;  %v3546_v24 = vadd.s32 %v3544_v35, %v3538_v13  ;;  %v3540_v8 = vshrl.u32 %v3536_v53, 16  ;;  %vm3547_vm5 = vc.u32 %v3545_v14, %v3541_v61 }
 0x1e0   : > { %v3418_v30 = vor.u32 %v3417_v50, %v3416_v60  ;;  %v3421_v37 = vshll.u32 %v3420_v19, 23  ;;  %v3940_v43 = vand.u32 2139095040, %v7391_v42  ;;  %v7395_v0 = vmul.f32 402.12387, %v7270_v63 }
 0x1e1   : > { %v3498_v55 = vsel %vm3494_vm9, %v7301_v11, %v3497_v28  ;;  %v3548_v4 = vsel %vm3547_vm5, 1, %v5642_v51  ;;  %v3430_v59 = vsel %vm3307_vm3, %v3429_v6, %v7338_v12  ;;  %v3542_v39 = vshrl.u32 %v3537_v21, 16 }
 0x1e2   : > { %v3422_v3 = vor.u32 4788187, %v3421_v37  ;;  %v3425_v41 = vcvt.s32.f32 %v3418_v30  ;;  %v3550_v57 = vadd.s32 %v3548_v4, %v3546_v24  ;;  %v3941_v32 = vshrl.u32 %v3940_v43, 23 }
 0x1e3   : > { %v3530_v9 = vadd.s32 %v3529_v18, %v3520_v48  ;;  %v3549_v53 = vadd.s32 %v3545_v14, %v3541_v61  ;;  %v4095_v54 = vand.u32 2139095040, %v7395_v0  ;;  %v3499_v17 = vsel %vm3493_vm6, %v3496_v15, %v3498_v55 }
 0x1e4   : > { %v3423_v22 = vand.u32 2147483647, %v3422_v3  ;;  %v3551_v10 = vadd.s32 %v3550_v57, %v3540_v8  ;;  %v5409_v31 = vadd.s32 4294967169, %v3941_v32  ;;  %v7408_v11 = vmul.f32 804.24774, %v7140_v58 }
 0x1e5   : > { %v7412_v12 = vsel %vm7377_vm10, 0, %v3430_v59  ;;  %v4096_v40 = vshrl.u32 %v4095_v54, 23  ;;  %v3553_v25 = vmul.u32 %v7329_v1, %v3499_v17  ;;  %vm3555_vm8 = vc.u32 %v3530_v9, %v3549_v53 }
 0x1e6   : > { %v3426_v7 = vmul.f32 %v3425_v41, %v3423_v22  ;;  %v3552_v49 = vadd.s32 %v3551_v10, %v3542_v39  ;;  %v3947_v16 = vadd.s32 1, %v5409_v31  ;;  %v3449_v62 = vadd.s32 3, %v7412_v12 }
 0x1e7   : > { %v4566_v20 = vand.u32 2139095040, %v7408_v11  ;;  %v5412_v46 = vadd.s32 4294967169, %v4096_v40  ;;  %v7425_v19 = vmul.f32 804.24774, %v7270_v63  ;;  %v3937_v6 = vand.u32 2147483647, %v7391_v42 }
 0x1e8   : > { %v3427_v21 = vxor.u32 2147483648, %v3426_v7  ;;  %v3556_v23 = vadd.s32 1, %v3552_v49  ;;  %vm3948_vm6 = vcmp.gt.s32.totalorder %v3947_v16, 0  ;;  %v7422_v26 = vand.u32 3, %v3449_v62 }
 0x1e9   : > { %v3949_v1 = vsel %vm3948_vm6, %v3947_v16, 0  ;;  %v4567_v56 = vshrl.u32 %v4566_v20, 23  ;;  %v4102_v50 = vadd.s32 1, %v5412_v46  ;;  %v4092_v48 = vand.u32 2147483647, %v7395_v0 }
 0x1ea   : > { %v3428_v58 = vsel %vm3307_vm3, %v3427_v21, %v3426_v7  ;;  %v3557_v13 = vsel %vm3555_vm8, %v3556_v23, %v3552_v49  ;;  %vm3462_vm9 = vcmp.lt.s32.totalorder %v6839_v2, 0  ;;  %v3951_v30 = vand.u32 31, %v3949_v1 }
 0x1eb   : > { %v3431_v27 = vsel %vm7377_vm10, %v6822_v5, %v3428_v58  ;;  %v3558_v60 = vadd.s32 %v3557_v13, %v3553_v25  ;;  %v5425_v37 = vadd.s32 4294967169, %v4567_v56  ;;  %vm4103_vm12 = vcmp.gt.s32.totalorder %v4102_v50, 0 }
 0x1ec   : > { %v3433_v45 = vmul.f32 %v3431_v27, %v3431_v27  ;;  %vm3452_vm13 = vcmp.eq.s32.totalorder %v7422_v26, 0  ;;  %vm3455_vm0 = vcmp.eq.s32.totalorder %v7422_v26, 2  ;;  %v4721_v63 = vand.u32 2139095040, %v7425_v19 }
 0x1ed   : > { %v3559_v61 = vadd.s32 536870912, %v3558_v60  ;;  %v7435_v43 = vand.u32 8388607, %v3937_v6  ;;  %v7439_v3 = vand.u32 8388607, %v4092_v48  ;;  %vm3451_vm14 = vcmp.lt.s32.totalorder %v7422_v26, 2 }
 0x1ee   : > { %v3434_v15 = vmul.f32 -0.001358992, %v3433_v45  ;;  %v3441_v28 = vmul.f32 -0.00019511016, %v3433_v45  ;;  %vm7444_vm1 = vcmp.le.f32.partialorder %v3460_v29, 0.7853982  ;;  %v3554_v59 = vadd.s32 %v3549_v53, %v3530_v9 }
 0x1ef   : > { %v3560_v14 = vshrl.u32 %v3559_v61, 30  ;;  %vm3448_vm15 = vweird.f32 %v6822_v5  ;;  %v3952_v32 = vsub.s32 32, %v3951_v30  ;;  %v7449_v22 = vadd.s32 1, %v5425_v37 }
 0x1f0   : > { %v3435_v33 = vadd.f32 0.041655596, %v3434_v15  ;;  %v3442_v35 = vadd.f32 0.008332121, %v3441_v28  ;;  %v4104_v54 = vsel %vm4103_vm12, %v4102_v50, 0  ;;  %v7452_v7 = vshrl.u32 %v3949_v1, 5 }
 0x1f1   : > { %v3561_v8 = vshll.u32 %v3560_v14, 30  ;;  %v3584_v57 = vsub.s32 4, %v3560_v14  ;;  %v7454_v29 = vshrl.u32 %v4721_v63, 23  ;;  %v3945_v40 = vor.u32 8388608, %v7435_v43 }
 0x1f2   : > { %v3436_v18 = vmul.f32 %v3435_v33, %v3433_v45  ;;  %v3443_v24 = vmul.f32 %v3442_v35, %v3433_v45  ;;  %v4100_v9 = vor.u32 8388608, %v7439_v3  ;;  %v7458_v21 = vshrl.u32 %v4104_v54, 5 }
 0x1f3   : > { %v3562_v39 = vsub.s32 %v3558_v60, %v3561_v8  ;;  %v7460_v62 = vand.u32 31, %v4104_v54  ;;  %v3954_v23 = vshll.u32 %v5636_v34, %v3951_v30  ;;  %v3955_v20 = vshrl.u32 %v5637_v36, %v3952_v32 }
 0x1f4   : > { %v3437_v41 = vadd.f32 -0.4999988, %v3436_v18  ;;  %v3444_v55 = vadd.f32 -0.16666654, %v3443_v24  ;;  %v3585_v13 = vsel %vm3462_vm9, %v3584_v57, %v3560_v14  ;;  %v3958_v1 = vshrl.u32 %v5638_v38, %v3952_v32 }
 0x1f5   : > { %vm3563_vm4 = vcmp.lt.s32.totalorder %v3562_v39, 0  ;;  %v3564_v31 = vsub.s32 0, %v3562_v39  ;;  %v3960_v56 = vshll.u32 %v5638_v38, %v3951_v30  ;;  %v3961_v15 = vshrl.u32 %v5639_v44, %v3952_v32 }
 0x1f6   : > { %v3438_v17 = vmul.f32 %v3437_v41, %v3433_v45  ;;  %v3445_v10 = vmul.f32 %v3444_v55, %v3433_v45  ;;  %v3957_v45 = vshll.u32 %v5637_v36, %v3951_v30  ;;  %v3963_v50 = vshll.u32 %v5639_v44, %v3951_v30 }
 0x1f7   : > { %v3565_v16 = vsel %vm3563_vm4, %v3564_v31, %v3562_v39  ;;  %v3587_v33 = vsel %vm7444_vm1, 0, %v3585_v13  ;;  %v3956_v35 = vor.u32 %v3955_v20, %v3954_v23  ;;  %v3966_v14 = vshll.u32 %v5640_v47, %v3951_v30 }
 0x1f8   : > { %v3439_v53 = vadd.f32 1.0, %v3438_v17  ;;  %v3446_v49 = vadd.f32 1.0, %v3445_v10  ;;  %v3566_v25 = vclz %v3565_v16  ;;  %v3762_v24 = vand.u32 3, %v7412_v12 }
 0x1f9   : > { %v3967_v8 = vshrl.u32 %v5641_v52, %v3952_v32  ;;  %v3959_v17 = vor.u32 %v3958_v1, %v3957_v45  ;;  %v3962_v10 = vor.u32 %v3961_v15, %v3960_v56  ;;  %vm3969_vm11 = vcmp.lt.s32.totalorder %v7452_v7, 1 }
 0x1fa   : > { %v3447_v58 = vmul.f32 %v3446_v49, %v3431_v27  ;;  %v3456_v46 = vxor.u32 2147483648, %v3439_v53  ;;  %v5393_v60 = vadd.s32 4294967294, %v3566_v25  ;;  %v3964_v27 = vshrl.u32 %v5640_v47, %v3952_v32 }
 0x1fb   : > { %vm3763_vm2 = vcmp.lt.s32.totalorder %v3762_v24, 2  ;;  %vm3764_vm3 = vcmp.eq.s32.totalorder %v3762_v24, 0  ;;  %vm3767_vm10 = vcmp.eq.s32.totalorder %v3762_v24, 2  ;;  %v3968_v16 = vor.u32 %v3967_v8, %v3966_v14 }
 0x1fc   : > { %v3453_v28 = vxor.u32 2147483648, %v3447_v58  ;;  %v3457_v61 = vsel %vm3455_vm0, %v3456_v46, %v3447_v58  ;;  %vm5394_vm7 = vcmp.lt.s32.totalorder %v5393_v60, 0  ;;  %v3965_v30 = vor.u32 %v3964_v27, %v3963_v50 }
 0x1fd   : > { %v3569_v18 = vsel %vm5394_vm7, 0, %v5393_v60  ;;  %v3769_v25 = vsel %vm3767_vm10, %v3456_v46, %v3447_v58  ;;  %vm3972_vm5 = vcmp.lt.s32.totalorder %v7452_v7, 4  ;;  %v3953_v20 = vshrl.u32 %v5636_v34, %v3952_v32 }
 0x1fe   : > { %v3454_v37 = vsel %vm3452_vm13, %v3439_v53, %v3453_v28  ;;  %v3570_v41 = vsub.s32 32, %v3569_v18  ;;  %v3571_v55 = vshll.u32 %v3562_v39, %v3569_v18  ;;  %v3574_v57 = vsub.s32 4294967266, %v3569_v18 }
 0x1ff   : > { %v3458_v63 = vsel %vm3451_vm14, %v3454_v37, %v3457_v61  ;;  %v3766_v12 = vsel %vm3764_vm3, %v3439_v53, %v3453_v28  ;;  %vm3970_vm8 = vcmp.lt.s32.totalorder %v7452_v7, 2  ;;  %vm3971_vm6 = vcmp.lt.s32.totalorder %v7452_v7, 3 }
 0x200   : > { %v3459_v54 = vsel %vm3448_vm15, nan, %v3458_v63  ;;  %v3572_v31 = vshrl.u32 %v3554_v59, %v3570_v41  ;;  %v3575_v49 = vadd.s32 127, %v3574_v57  ;;  %v3770_v23 = vsel %vm3763_vm2, %v3766_v12, %v3769_v25 }
 0x201   : > { %5395 = vst [vmem:[%s5742_s17 + $0x90] sm:$0xff] %v3459_v54  ;;  %v3771_v53 = vsel %vm3448_vm15, nan, %v3770_v23  ;;  %v3974_v45 = vsel %vm3972_vm5, %v3962_v10, 2102212464  ;;  %v3604_v60 = vadd.s32 3, %v3587_v33  ;;  %v3977_v58 = vsel %vm3969_vm11, %v3956_v35, %v3959_v17 }
 0x202   : > { %v3573_v26 = vor.u32 %v3572_v31, %v3571_v55  ;;  %v3576_v39 = vshll.u32 %v3575_v49, 23  ;;  %5403 = vst [vmem:[%s5742_s17 + $0x110] sm:$0xff] %v3771_v53  ;;  %v3978_v32 = vsel %vm3972_vm5, %v3965_v30, 920167782  ;;  %v3981_v46 = vsel %vm3969_vm11, %v3959_v17, %v3962_v10 }
 0x203   : > { %v3979_v56 = vsel %vm3971_vm6, %v3962_v10, %v3978_v32  ;;  %v3982_v5 = vsel %vm3972_vm5, %v3968_v16, 1326507024  ;;  %v7508_v15 = vshll.u32 %v3945_v40, 8  ;;  %v3973_v28 = vsel %vm3969_vm11, %v3953_v20, %v3956_v35 }
 0x204   : > { %v3577_v59 = vor.u32 4788187, %v3576_v39  ;;  %v3580_v13 = vcvt.s32.f32 %v3573_v26  ;;  %v3975_v61 = vsel %vm3971_vm6, %v3959_v17, %v3974_v45  ;;  %v3980_v50 = vsel %vm3970_vm8, %v3977_v58, %v3979_v56 }
 0x205   : > { %v3983_v27 = vsel %vm3971_vm6, %v3965_v30, %v3982_v5  ;;  %v3986_v43 = vand.u32 65535, %v7508_v15  ;;  %v3987_v40 = vshrl.u32 %v7508_v15, 16  ;;  %v4010_v35 = vand.u32 65535, %v3980_v50 }
 0x206   : > { %v3578_v1 = vand.u32 2147483647, %v3577_v59  ;;  %v3984_v37 = vsel %vm3970_vm8, %v3981_v46, %v3983_v27  ;;  %v4011_v8 = vshrl.u32 %v3980_v50, 16  ;;  %v7522_v41 = vand.u32 3, %v3604_v60 }
 0x207   : > { %v3988_v18 = vand.u32 65535, %v3984_v37  ;;  %v3989_v24 = vshrl.u32 %v3984_v37, 16  ;;  %v7524_v55 = vand.u32 3, %v3587_v33  ;;  %v7527_v57 = vsub.s32 32, %v7460_v62 }
 0x208   : > { %v3581_v14 = vmul.f32 %v3580_v13, %v3578_v1  ;;  %v7531_v54 = vsel %vm3970_vm8, %v3973_v28, %v3975_v61  ;;  %v4013_v12 = vmul.u32 %v4011_v8, %v3986_v43  ;;  %v4014_v16 = vmul.u32 %v4010_v35, %v3987_v40 }
 0x209   : > { %v3990_v17 = vmul.u32 %v3988_v18, %v3986_v43  ;;  %v3991_v10 = vmul.u32 %v3989_v24, %v3986_v43  ;;  %v3992_v30 = vmul.u32 %v3988_v18, %v3987_v40  ;;  %v3993_v49 = vmul.u32 %v3989_v24, %v3987_v40 }
 0x20a   : > { %v3582_v63 = vxor.u32 2147483648, %v3581_v14  ;;  %v4012_v25 = vmul.u32 %v4010_v35, %v3986_v43  ;;  %v4016_v20 = vshll.u32 %v4013_v12, 16  ;;  %v4109_v59 = vshll.u32 %v5636_v34, %v7460_v62 }
 0x20b   : > { %v3994_v26 = vshll.u32 %v3991_v10, 16  ;;  %v3996_v39 = vshll.u32 %v3992_v30, 16  ;;  %v3995_v23 = vshrl.u32 %v3991_v10, 16  ;;  %v4015_v53 = vmul.u32 %v4011_v8, %v3987_v40 }
 0x20c   : > { %v3583_v31 = vsel %vm3462_vm9, %v3582_v63, %v3581_v14  ;;  %v4018_v45 = vshll.u32 %v4014_v16, 16  ;;  %v3997_v4 = vshrl.u32 %v3992_v30, 16  ;;  %vm4020_vm13 = vc.u32 %v4012_v25, %v4016_v20 }
 0x20d   : > { %v7538_v33 = vsel %vm7444_vm1, %v6839_v2, %v3583_v31  ;;  %vm3998_vm9 = vc.u32 %v3990_v17, %v3994_v26  ;;  %v4000_v13 = vadd.s32 %v3994_v26, %v3990_v17  ;;  %v4022_v1 = vadd.s32 %v4016_v20, %v4012_v25 }
 0x20e   : > { %v3588_v7 = vmul.f32 %v7538_v33, %v7538_v33  ;;  %v3999_v32 = vsel %vm3998_vm9, 1, %v5642_v51  ;;  %v4021_v61 = vsel %vm4020_vm13, 1, %v5642_v51  ;;  %vm3610_vm0 = vcmp.eq.s32.totalorder %v7522_v41, 2 }
 0x20f   : > { %v4001_v46 = vadd.s32 %v3999_v32, %v3993_v49  ;;  %vm4002_vm12 = vc.u32 %v4000_v13, %v3996_v39  ;;  %vm3921_vm14 = vcmp.eq.s32.totalorder %v7524_v55, 2  ;;  %v4017_v27 = vshrl.u32 %v4013_v12, 16 }
 0x210   : > { %v3589_v60 = vmul.f32 -0.001358992, %v3588_v7  ;;  %v3596_v58 = vmul.f32 -0.00019511016, %v3588_v7  ;;  %v4003_v28 = vsel %vm4002_vm12, 1, %v5642_v51  ;;  %v4023_v14 = vadd.s32 %v4021_v61, %v4015_v53 }
 0x211   : > { %v4005_v50 = vadd.s32 %v4003_v28, %v4001_v46  ;;  %vm4024_vm1 = vc.u32 %v4022_v1, %v4018_v45  ;;  %v4110_v18 = vshrl.u32 %v5637_v36, %v7527_v57  ;;  %vm3607_vm15 = vcmp.eq.s32.totalorder %v7522_v41, 0 }
 0x212   : > { %v3590_v56 = vadd.f32 0.041655596, %v3589_v60  ;;  %v3597_v5 = vadd.f32 0.008332121, %v3596_v58  ;;  %v4025_v40 = vsel %vm4024_vm1, 1, %v5642_v51  ;;  %vm3918_vm4 = vcmp.eq.s32.totalorder %v7524_v55, 0 }
 0x213   : > { %v4006_v24 = vadd.s32 %v4005_v50, %v3995_v23  ;;  %v4019_v35 = vshrl.u32 %v4014_v16, 16  ;;  %v4027_v8 = vadd.s32 %v4025_v40, %v4023_v14  ;;  %v4112_v63 = vshll.u32 %v5637_v36, %v7460_v62 }
 0x214   : > { %v3591_v37 = vmul.f32 %v3590_v56, %v3588_v7  ;;  %v3598_v43 = vmul.f32 %v3597_v5, %v3588_v7  ;;  %vm3606_vm7 = vcmp.lt.s32.totalorder %v7522_v41, 2  ;;  %vm3917_vm2 = vcmp.lt.s32.totalorder %v7524_v55, 2 }
 0x215   : > { %vm4574_vm3 = vcmp.gt.s32.totalorder %v7449_v22, 0  ;;  %v7559_v30 = vadd.s32 %v4022_v1, %v4018_v45  ;;  %v4118_v31 = vshll.u32 %v5639_v44, %v7460_v62  ;;  %v7563_v49 = vadd.s32 %v4006_v24, %v3997_v4 }
 0x216   : > { %v3592_v17 = vadd.f32 -0.4999988, %v3591_v37  ;;  %v3599_v10 = vadd.f32 -0.16666654, %v3598_v43  ;;  %v4028_v12 = vadd.s32 %v4027_v8, %v4017_v27  ;;  %v4113_v16 = vshrl.u32 %v5638_v38, %v7527_v57 }
 0x217   : > { %v4119_v26 = vshrl.u32 %v5640_v47, %v7527_v57  ;;  %v4115_v23 = vshll.u32 %v5638_v38, %v7460_v62  ;;  %v4116_v20 = vshrl.u32 %v5639_v44, %v7527_v57  ;;  %v4030_v53 = vmul.u32 %v7508_v15, %v7531_v54 }
 0x218   : > { %v3593_v39 = vmul.f32 %v3592_v17, %v3588_v7  ;;  %v3600_v25 = vmul.f32 %v3599_v10, %v3588_v7  ;;  %v4029_v13 = vadd.s32 %v4028_v12, %v4019_v35  ;;  %v4121_v60 = vshll.u32 %v5640_v47, %v7460_v62 }
 0x219   : > { %v4120_v45 = vor.u32 %v4119_v26, %v4118_v31  ;;  %vm4032_vm10 = vc.u32 %v7563_v49, %v7559_v30  ;;  %v4122_v7 = vshrl.u32 %v5641_v52, %v7527_v57  ;;  %v4111_v46 = vor.u32 %v4110_v18, %v4109_v59 }
 0x21a   : > { %v3594_v58 = vadd.f32 1.0, %v3593_v39  ;;  %v3601_v4 = vadd.f32 1.0, %v3600_v25  ;;  %v4033_v32 = vadd.s32 1, %v4029_v13  ;;  %v4114_v1 = vor.u32 %v4113_v16, %v4112_v63 }
 0x21b   : > { %vm4127_vm11 = vcmp.lt.s32.totalorder %v7458_v21, 4  ;;  %v4117_v54 = vor.u32 %v4116_v20, %v4115_v23  ;;  %vm4124_vm5 = vcmp.lt.s32.totalorder %v7458_v21, 1  ;;  %v4123_v5 = vor.u32 %v4122_v7, %v4121_v60 }
 0x21c   : > { %v3602_v56 = vmul.f32 %v3601_v4, %v7538_v33  ;;  %v3611_v15 = vxor.u32 2147483648, %v3594_v58  ;;  %v4034_v62 = vsel %vm4032_vm10, %v4033_v32, %v4029_v13  ;;  %vm4126_vm8 = vcmp.lt.s32.totalorder %v7458_v21, 3 }
 0x21d   : > { %v4133_v28 = vsel %vm4127_vm11, %v4120_v45, 920167782  ;;  %v4035_v27 = vadd.s32 %v4034_v62, %v4030_v53  ;;  %vm3603_vm6 = vweird.f32 %v6839_v2  ;;  %v5428_v33 = vadd.s32 4294967169, %v7454_v29 }
 0x21e   : > { %v3608_v61 = vxor.u32 2147483648, %v3602_v56  ;;  %v3612_v59 = vsel %vm3610_vm0, %v3611_v15, %v3602_v56  ;;  %v3923_v50 = vsel %vm3921_vm14, %v3611_v15, %v3602_v56  ;;  %vm4125_vm9 = vcmp.lt.s32.totalorder %v7458_v21, 2 }
 0x21f   : > { %v4132_v14 = vsel %vm4124_vm5, %v4111_v46, %v4114_v1  ;;  %v4036_v40 = vadd.s32 536870912, %v4035_v27  ;;  %v4134_v18 = vsel %vm4126_vm8, %v4117_v54, %v4133_v28  ;;  %v4575_v24 = vsel %vm4574_vm3, %v7449_v22, 0 }
 0x220   : > { %v3609_v37 = vsel %vm3607_vm15, %v3594_v58, %v3608_v61  ;;  %v3920_v43 = vsel %vm3918_vm4, %v3594_v58, %v3608_v61  ;;  %v4136_v35 = vsel %vm4124_vm5, %v4114_v1, %v4117_v54  ;;  %v4137_v10 = vsel %vm4127_vm11, %v4123_v5, 1326507024 }
 0x221   : > { %v3613_v2 = vsel %vm3606_vm7, %v3609_v37, %v3612_v59  ;;  %v3924_v29 = vsel %vm3917_vm2, %v3920_v43, %v3923_v50  ;;  %v7611_v17 = vshrl.u32 %v4036_v40, 30  ;;  %v7616_v41 = vadd.s32 1, %v5428_v33 }
 0x222   : > { %v3614_v8 = vsel %vm3603_vm6, nan, %v3613_v2  ;;  %v3925_v63 = vsel %vm3603_vm6, nan, %v3924_v29  ;;  %v4135_v55 = vsel %vm4125_vm9, %v4132_v14, %v4134_v18  ;;  %v4138_v31 = vsel %vm4126_vm8, %v4120_v45, %v4137_v10 }
 0x223   : > { %5396 = vst [vmem:[%s5742_s17 + $0x98] sm:$0xff] %v3614_v8  ;;  %v7624_v22 = vshll.u32 %v4100_v9, 8  ;;  %v4038_v12 = vshll.u32 %v7611_v17, 30  ;;  %v4108_v16 = vshrl.u32 %v5636_v34, %v7527_v57  ;;  %v4129_v26 = vsel %vm4127_vm11, %v4117_v54, 2102212464 }
 0x224   : > { %5404 = vst [vmem:[%s5742_s17 + $0x118] sm:$0xff] %v3925_v63  ;;  %v4139_v39 = vsel %vm4125_vm9, %v4136_v35, %v4138_v31  ;;  %v7636_v9 = vshrl.u32 %v4575_v24, 5  ;;  %v4165_v53 = vand.u32 65535, %v4135_v55  ;;  %v4166_v45 = vshrl.u32 %v4135_v55, 16 }
 0x225   : > { %v4141_v25 = vand.u32 65535, %v7624_v22  ;;  %v4142_v23 = vshrl.u32 %v7624_v22, 16  ;;  %v4143_v20 = vand.u32 65535, %v4139_v39  ;;  %v4144_v3 = vshrl.u32 %v4139_v39, 16 }
 0x226   : > { %v4039_v13 = vsub.s32 %v4035_v27, %v4038_v12  ;;  %v7638_v60 = vand.u32 31, %v4575_v24  ;;  %vm4729_vm12 = vcmp.gt.s32.totalorder %v7616_v41, 0  ;;  %v4128_v32 = vsel %vm4124_vm5, %v4108_v16, %v4111_v46 }
 0x227   : > { %v4145_v57 = vmul.u32 %v4143_v20, %v4141_v25  ;;  %v4146_v58 = vmul.u32 %v4144_v3, %v4141_v25  ;;  %v4147_v4 = vmul.u32 %v4143_v20, %v4142_v23  ;;  %v4130_v56 = vsel %vm4126_vm8, %v4114_v1, %v4129_v26 }
 0x228   : > { %vm4040_vm13 = vcmp.lt.s32.totalorder %v4039_v13, 0  ;;  %v4041_v7 = vsub.s32 0, %v4039_v13  ;;  %v4031_v15 = vadd.s32 %v7559_v30, %v7563_v49  ;;  %v4148_v54 = vmul.u32 %v4144_v3, %v4142_v23 }
 0x229   : > { %v4149_v62 = vshll.u32 %v4146_v58, 16  ;;  %v4151_v5 = vshll.u32 %v4147_v4, 16  ;;  %v4167_v61 = vmul.u32 %v4165_v53, %v4141_v25  ;;  %v4168_v59 = vmul.u32 %v4166_v45, %v4141_v25 }
 0x22a   : > { %v4042_v28 = vsel %vm4040_vm13, %v4041_v7, %v4039_v13  ;;  %v4169_v50 = vmul.u32 %v4165_v53, %v4142_v23  ;;  %v7649_v33 = vsel %vm4125_vm9, %v4128_v32, %v4130_v56  ;;  %v4170_v1 = vmul.u32 %v4166_v45, %v4142_v23 }
 0x22b   : > { %v4043_v27 = vclz %v4042_v28  ;;  %vm4153_vm0 = vc.u32 %v4145_v57, %v4149_v62  ;;  %v4155_v46 = vadd.s32 %v4149_v62, %v4145_v57  ;;  %v4171_v37 = vshll.u32 %v4168_v59, 16 }
 0x22c   : > { %v4154_v14 = vsel %vm4153_vm0, 1, %v5642_v51  ;;  %v4173_v43 = vshll.u32 %v4169_v50, 16  ;;  %v4150_v49 = vshrl.u32 %v4146_v58, 16  ;;  %v4061_v18 = vsub.s32 4, %v7611_v17 }
 0x22d   : > { %v5410_v30 = vadd.s32 4294967294, %v4043_v27  ;;  %v4156_v40 = vadd.s32 %v4154_v14, %v4148_v54  ;;  %vm4157_vm14 = vc.u32 %v4155_v46, %v4151_v5  ;;  %vm4175_vm1 = vc.u32 %v4167_v61, %v4171_v37 }
 0x22e   : > { %v4158_v2 = vsel %vm4157_vm14, 1, %v5642_v51  ;;  %v4177_v29 = vadd.s32 %v4171_v37, %v4167_v61  ;;  %v4176_v24 = vsel %vm4175_vm1, 1, %v5642_v51  ;;  %v4563_v35 = vand.u32 2147483647, %v7408_v11 }
 0x22f   : > { %vm5411_vm15 = vcmp.lt.s32.totalorder %v5410_v30, 0  ;;  %v4160_v21 = vadd.s32 %v4158_v2, %v4156_v40  ;;  %v4152_v63 = vshrl.u32 %v4147_v4, 16  ;;  %v4178_v10 = vadd.s32 %v4176_v24, %v4170_v1 }
 0x230   : > { %v4046_v8 = vsel %vm5411_vm15, 0, %v5410_v30  ;;  %vm4179_vm4 = vc.u32 %v4177_v29, %v4173_v43  ;;  %v7657_v26 = vsub.s32 32, %v7638_v60  ;;  %vm3939_vm7 = vcmp.lt.s32.totalorder %v7391_v42, 0 }
 0x231   : > { %v4047_v55 = vsub.s32 32, %v4046_v8  ;;  %v4048_v31 = vshll.u32 %v4039_v13, %v4046_v8  ;;  %v4051_v12 = vsub.s32 4294967266, %v4046_v8  ;;  %v4161_v16 = vadd.s32 %v4160_v21, %v4150_v49 }
 0x232   : > { %v4172_v39 = vshrl.u32 %v4168_v59, 16  ;;  %v4180_v25 = vsel %vm4179_vm4, 1, %v5642_v51  ;;  %v4730_v23 = vsel %vm4729_vm12, %v7616_v41, 0  ;;  %v4062_v13 = vsel %vm3939_vm7, %v4061_v18, %v7611_v17 }
 0x233   : > { %v4049_v20 = vshrl.u32 %v4031_v15, %v4047_v55  ;;  %v4052_v3 = vadd.s32 127, %v4051_v12  ;;  %v4174_v53 = vshrl.u32 %v4169_v50, 16  ;;  %v4182_v45 = vadd.s32 %v4180_v25, %v4178_v10 }
 0x234   : > { %v4185_v57 = vmul.u32 %v7624_v22, %v7649_v33  ;;  %v4570_v58 = vand.u32 8388607, %v4563_v35  ;;  %v7671_v32 = vadd.s32 %v4161_v16, %v4152_v63  ;;  %v7673_v56 = vadd.s32 %v4177_v29, %v4173_v43 }
 0x235   : > { %v4050_v4 = vor.u32 %v4049_v20, %v4048_v31  ;;  %v4053_v7 = vshll.u32 %v4052_v3, 23  ;;  %v4183_v41 = vadd.s32 %v4182_v45, %v4172_v39  ;;  %v4580_v15 = vshll.u32 %v5636_v34, %v7638_v60 }
 0x236   : > { %v4583_v17 = vshll.u32 %v5637_v36, %v7638_v60  ;;  %v4584_v54 = vshrl.u32 %v5638_v38, %v7657_v26  ;;  %v4586_v5 = vshll.u32 %v5638_v38, %v7638_v60  ;;  %v4587_v28 = vshrl.u32 %v5639_v44, %v7657_v26 }
 0x237   : > { %v4054_v22 = vor.u32 4788187, %v4053_v7  ;;  %v4057_v62 = vcvt.s32.f32 %v4050_v4  ;;  %v4184_v61 = vadd.s32 %v4183_v41, %v4174_v53  ;;  %v4581_v59 = vshrl.u32 %v5637_v36, %v7657_v26 }
 0x238   : > { %v4589_v50 = vshll.u32 %v5639_v44, %v7638_v60  ;;  %v4590_v27 = vshrl.u32 %v5640_v47, %v7657_v26  ;;  %vm4187_vm2 = vc.u32 %v7671_v32, %v7673_v56  ;;  %v4592_v46 = vshll.u32 %v5640_v47, %v7638_v60 }
 0x239   : > { %v4055_v33 = vand.u32 2147483647, %v4054_v22  ;;  %v4593_v14 = vshrl.u32 %v5641_v52, %v7657_v26  ;;  %vm7699_vm3 = vcmp.le.f32.partialorder %v3937_v6, 0.7853982  ;;  %v4188_v37 = vadd.s32 1, %v4184_v61 }
 0x23a   : > { %v7703_v43 = vor.u32 %v4584_v54, %v4583_v17  ;;  %v7705_v30 = vor.u32 %v4587_v28, %v4586_v5  ;;  %vm4595_vm10 = vcmp.lt.s32.totalorder %v7636_v9, 1  ;;  %vm4598_vm11 = vcmp.lt.s32.totalorder %v7636_v9, 4 }
 0x23b   : > { %v4058_v49 = vmul.f32 %v4057_v62, %v4055_v33  ;;  %v4594_v40 = vor.u32 %v4593_v14, %v4592_v46  ;;  %v7711_v60 = vsel %vm7699_vm3, 0, %v4062_v13  ;;  %v4189_v18 = vsel %vm4187_vm2, %v4188_v37, %v4184_v61 }
 0x23c   : > { %v4571_v6 = vor.u32 8388608, %v4570_v58  ;;  %v4591_v2 = vor.u32 %v4590_v27, %v4589_v50  ;;  %v4190_v21 = vadd.s32 %v4189_v18, %v4185_v57  ;;  %v7713_v24 = vor.u32 %v4581_v59, %v4580_v15 }
 0x23d   : > { %v4059_v29 = vxor.u32 2147483648, %v4058_v49  ;;  %vm4597_vm5 = vcmp.lt.s32.totalorder %v7636_v9, 3  ;;  %v7716_v8 = vshrl.u32 %v4730_v23, 5  ;;  %vm4596_vm8 = vcmp.lt.s32.totalorder %v7636_v9, 2 }
 0x23e   : > { %v4607_v63 = vsel %vm4595_vm10, %v7703_v43, %v7705_v30  ;;  %v4608_v10 = vsel %vm4598_vm11, %v4594_v40, 1326507024  ;;  %v7725_v55 = vand.u32 31, %v4730_v23  ;;  %v4081_v12 = vadd.s32 3, %v7711_v60 }
 0x23f   : > { %v4060_v31 = vsel %vm3939_vm7, %v4059_v29, %v4058_v49  ;;  %v4191_v16 = vadd.s32 536870912, %v4190_v21  ;;  %v4604_v25 = vsel %vm4598_vm11, %v4591_v2, 920167782  ;;  %v4609_v20 = vsel %vm4597_vm5, %v4591_v2, %v4608_v10 }
 0x240   : > { %v7733_v39 = vsel %vm7699_vm3, %v7391_v42, %v4060_v31  ;;  %v7739_v3 = vshll.u32 %v4571_v6, 8  ;;  %v4603_v53 = vsel %vm4595_vm10, %v7713_v24, %v7703_v43  ;;  %v4610_v45 = vsel %vm4596_vm8, %v4607_v63, %v4609_v20 }
 0x241   : > { %v4065_v23 = vmul.f32 %v7733_v39, %v7733_v39  ;;  %v4192_v13 = vshrl.u32 %v4191_v16, 30  ;;  %v4614_v4 = vand.u32 65535, %v4610_v45  ;;  %v4615_v7 = vshrl.u32 %v4610_v45, 16 }
 0x242   : > { %v7750_v57 = vand.u32 65535, %v7739_v3  ;;  %v7753_v58 = vshrl.u32 %v7739_v3, 16  ;;  %v4605_v54 = vsel %vm4597_vm5, %v7705_v30, %v4604_v25  ;;  %v7758_v22 = vand.u32 3, %v4081_v12 }
 0x243   : > { %v4066_v41 = vmul.f32 -0.001358992, %v4065_v23  ;;  %v4073_v15 = vmul.f32 -0.00019511016, %v4065_v23  ;;  %v4193_v17 = vshll.u32 %v4192_v13, 30  ;;  %vm4094_vm9 = vcmp.lt.s32.totalorder %v7395_v0, 0 }
 0x244   : > { %v4616_v62 = vmul.u32 %v4614_v4, %v7750_v57  ;;  %v7762_v5 = vmul.u32 %v4615_v7, %v7750_v57  ;;  %v7765_v28 = vmul.u32 %v4614_v4, %v7753_v58  ;;  %vm7769_vm6 = vcmp.le.f32.partialorder %v4092_v48, 0.7853982 }
 0x245   : > { %v4067_v61 = vadd.f32 0.041655596, %v4066_v41  ;;  %v4074_v59 = vadd.f32 0.008332121, %v4073_v15  ;;  %v4194_v27 = vsub.s32 %v4190_v21, %v4193_v17  ;;  %v4216_v33 = vsub.s32 4, %v4192_v13 }
 0x246   : > { %v7776_v46 = vsel %vm4596_vm8, %v4603_v53, %v4605_v54  ;;  %v4620_v14 = vshll.u32 %v7762_v5, 16  ;;  %v4622_v1 = vshll.u32 %v7765_v28, 16  ;;  %vm4084_vm13 = vcmp.eq.s32.totalorder %v7758_v22, 0 }
 0x247   : > { %v4068_v37 = vmul.f32 %v4067_v61, %v4065_v23  ;;  %v4075_v49 = vmul.f32 %v4074_v59, %v4065_v23  ;;  %vm4195_vm12 = vcmp.lt.s32.totalorder %v4194_v27, 0  ;;  %v4196_v40 = vsub.s32 0, %v4194_v27 }
 0x248   : > { %v4579_v48 = vshrl.u32 %v5636_v34, %v7657_v26  ;;  %vm4624_vm0 = vc.u32 %v4616_v62, %v4620_v14  ;;  %v4626_v18 = vadd.s32 %v4620_v14, %v4616_v62  ;;  %vm4083_vm14 = vcmp.lt.s32.totalorder %v7758_v22, 2 }
 0x249   : > { %v4069_v6 = vadd.f32 -0.4999988, %v4068_v37  ;;  %v4076_v2 = vadd.f32 -0.16666654, %v4075_v49  ;;  %v4197_v29 = vsel %vm4195_vm12, %v4196_v40, %v4194_v27  ;;  %v4619_v21 = vmul.u32 %v4615_v7, %v7753_v58 }
 0x24a   : > { %vm4080_vm1 = vweird.f32 %v7391_v42  ;;  %vm4087_vm15 = vcmp.eq.s32.totalorder %v7758_v22, 2  ;;  %v4198_v63 = vclz %v4197_v29  ;;  %v4625_v10 = vsel %vm4624_vm0, 1, %v5642_v51 }
 0x24b   : > { %v4637_v31 = vshrl.u32 %v7776_v46, 16  ;;  %v4070_v12 = vmul.f32 %v4069_v6, %v4065_v23  ;;  %v4077_v26 = vmul.f32 %v4076_v2, %v4065_v23  ;;  %v4217_v16 = vsel %vm4094_vm9, %v4216_v33, %v4192_v13 }
 0x24c   : > { %vm4628_vm4 = vc.u32 %v4626_v18, %v4622_v1  ;;  %v4186_v25 = vadd.s32 %v7673_v56, %v7671_v32  ;;  %v5413_v20 = vadd.s32 4294967294, %v4198_v63  ;;  %v4599_v53 = vsel %vm4595_vm10, %v4579_v48, %v7713_v24 }
 0x24d   : > { %v4600_v45 = vsel %vm4598_vm11, %v7705_v30, 2102212464  ;;  %v4071_v4 = vadd.f32 1.0, %v4070_v12  ;;  %v4078_v7 = vadd.f32 1.0, %v4077_v26  ;;  %v4627_v41 = vadd.s32 %v4625_v10, %v4619_v21 }
 0x24e   : > { %v4636_v23 = vand.u32 65535, %v7776_v46  ;;  %vm5414_vm7 = vcmp.lt.s32.totalorder %v5413_v20, 0  ;;  %v7802_v13 = vsel %vm7769_vm6, 0, %v4217_v16  ;;  %v4629_v32 = vsel %vm4628_vm4, 1, %v5642_v51 }
 0x24f   : > { %v7806_v56 = vmul.u32 %v4637_v31, %v7750_v57  ;;  %v4079_v24 = vmul.f32 %v4078_v7, %v7733_v39  ;;  %v4088_v15 = vxor.u32 2147483648, %v4071_v4  ;;  %v4201_v17 = vsel %vm5414_vm7, 0, %v5413_v20 }
 0x250   : > { %v4621_v30 = vshrl.u32 %v7762_v5, 16  ;;  %v4202_v54 = vsub.s32 32, %v4201_v17  ;;  %v4203_v62 = vshll.u32 %v4194_v27, %v4201_v17  ;;  %v4206_v61 = vsub.s32 4294967266, %v4201_v17 }
 0x251   : > { %v4394_v59 = vand.u32 3, %v7711_v60  ;;  %v4085_v33 = vxor.u32 2147483648, %v4079_v24  ;;  %v4089_v46 = vsel %vm4087_vm15, %v4088_v15, %v4079_v24  ;;  %v4631_v14 = vadd.s32 %v4629_v32, %v4627_v41 }
 0x252   : > { %v4638_v1 = vmul.u32 %v4636_v23, %v7750_v57  ;;  %v4204_v37 = vshrl.u32 %v4186_v25, %v4202_v54  ;;  %v4207_v49 = vadd.s32 127, %v4206_v61  ;;  %v4640_v39 = vmul.u32 %v4636_v23, %v7753_v58 }
 0x253   : > { %v4642_v40 = vshll.u32 %v7806_v56, 16  ;;  %v4086_v5 = vsel %vm4084_vm13, %v4071_v4, %v4085_v33  ;;  %vm4395_vm2 = vcmp.lt.s32.totalorder %v4394_v59, 2  ;;  %vm4396_vm3 = vcmp.eq.s32.totalorder %v4394_v59, 0 }
 0x254   : > { %vm4399_vm10 = vcmp.eq.s32.totalorder %v4394_v59, 2  ;;  %v4090_v60 = vsel %vm4083_vm14, %v4086_v5, %v4089_v46  ;;  %v4205_v27 = vor.u32 %v4204_v37, %v4203_v62  ;;  %v4208_v48 = vshll.u32 %v4207_v49, 23 }
 0x255   : > { %v4398_v57 = vsel %vm4396_vm3, %v4071_v4, %v4085_v33  ;;  %v4091_v18 = vsel %vm4080_vm1, nan, %v4090_v60  ;;  %v4401_v6 = vsel %vm4399_vm10, %v4088_v15, %v4079_v24  ;;  %v4601_v2 = vsel %vm4597_vm5, %v7703_v43, %v4600_v45 }
 0x256   : > { %v4641_v29 = vmul.u32 %v4637_v31, %v7753_v58  ;;  %5415 = vst [vmem:[%s5742_s17 + $0xa0] sm:$0xff] %v4091_v18  ;;  %v4209_v21 = vor.u32 4788187, %v4208_v48  ;;  %v4212_v63 = vcvt.s32.f32 %v4205_v27  ;;  %v4236_v22 = vadd.s32 3, %v7802_v13 }
 0x257   : > { %v4402_v10 = vsel %vm4395_vm2, %v4398_v57, %v4401_v6  ;;  %v4623_v26 = vshrl.u32 %v7765_v28, 16  ;;  %v4632_v16 = vadd.s32 %v4631_v14, %v4621_v30  ;;  %v4644_v25 = vshll.u32 %v4640_v39, 16 }
 0x258   : > { %v4403_v12 = vsel %vm4080_vm1, nan, %v4402_v10  ;;  %v4210_v20 = vand.u32 2147483647, %v4209_v21  ;;  %v4602_v43 = vsel %vm4596_vm8, %v4599_v53, %v4601_v2  ;;  %vm4646_vm11 = vc.u32 %v4638_v1, %v4642_v40 }
 0x259   : > { %5423 = vst [vmem:[%s5742_s17 + $0x120] sm:$0xff] %v4403_v12  ;;  %v4648_v58 = vadd.s32 %v4642_v40, %v4638_v1  ;;  %v7835_v31 = vsub.s32 32, %v7725_v55  ;;  %v4643_v45 = vshrl.u32 %v7806_v56, 16  ;;  %v4647_v4 = vsel %vm4646_vm11, 1, %v5642_v51 }
 0x25a   : > { %v4718_v42 = vand.u32 2147483647, %v7425_v19  ;;  %v4213_v7 = vmul.f32 %v4212_v63, %v4210_v20  ;;  %v7840_v28 = vand.u32 3, %v4236_v22  ;;  %v4649_v41 = vadd.s32 %v4647_v4, %v4641_v29 }
 0x25b   : > { %vm4650_vm5 = vc.u32 %v4648_v58, %v4644_v25  ;;  %v7842_v23 = vadd.s32 %v4632_v16, %v4623_v26  ;;  %v4645_v9 = vshrl.u32 %v4640_v39, 16  ;;  %v4656_v32 = vmul.u32 %v7739_v3, %v4602_v43 }
 0x25c   : > { %v4651_v53 = vsel %vm4650_vm5, 1, %v5642_v51  ;;  %v4214_v24 = vxor.u32 2147483648, %v4213_v7  ;;  %v7846_v15 = vadd.s32 %v4648_v58, %v4644_v25  ;;  %v4735_v17 = vshll.u32 %v5636_v34, %v7725_v55 }
 0x25d   : > { %v4653_v56 = vadd.s32 %v4651_v53, %v4649_v41  ;;  %v4725_v30 = vand.u32 8388607, %v4718_v42  ;;  %v4738_v54 = vshll.u32 %v5637_v36, %v7725_v55  ;;  %v4739_v62 = vshrl.u32 %v5638_v38, %v7835_v31 }
 0x25e   : > { %v4741_v61 = vshll.u32 %v5638_v38, %v7725_v55  ;;  %v4215_v3 = vsel %vm4094_vm9, %v4214_v24, %v4213_v7  ;;  %v4742_v33 = vshrl.u32 %v5639_v44, %v7835_v31  ;;  %v4744_v46 = vshll.u32 %v5639_v44, %v7725_v55 }
 0x25f   : > { %v4654_v59 = vadd.s32 %v4653_v56, %v4643_v45  ;;  %v4218_v14 = vsel %vm7769_vm6, %v7395_v0, %v4215_v3  ;;  %v4736_v1 = vshrl.u32 %v5637_v36, %v7835_v31  ;;  %v4745_v38 = vshrl.u32 %v5640_v47, %v7835_v31 }
 0x260   : > { %v4747_v37 = vshll.u32 %v5640_v47, %v7725_v55  ;;  %v4220_v49 = vmul.f32 %v4218_v14, %v4218_v14  ;;  %vm4658_vm8 = vc.u32 %v7842_v23, %v7846_v15  ;;  %v4748_v44 = vshrl.u32 %v5641_v52, %v7835_v31 }
 0x261   : > { %v4655_v39 = vadd.s32 %v4654_v59, %v4645_v9  ;;  %v7877_v40 = vor.u32 %v4739_v62, %v4738_v54  ;;  %v7879_v50 = vor.u32 %v4742_v33, %v4741_v61  ;;  %v4746_v5 = vor.u32 %v4745_v38, %v4744_v46 }
 0x262   : > { %vm4750_vm6 = vcmp.lt.s32.totalorder %v7716_v8, 1  ;;  %v4221_v36 = vmul.f32 -0.001358992, %v4220_v49  ;;  %v4228_v60 = vmul.f32 -0.00019511016, %v4220_v49  ;;  %v4749_v48 = vor.u32 %v4748_v44, %v4747_v37 }
 0x263   : > { %v4659_v27 = vadd.s32 1, %v4655_v39  ;;  %v4726_v47 = vor.u32 8388608, %v4725_v30  ;;  %v7882_v55 = vor.u32 %v4736_v1, %v4735_v17  ;;  %vm4751_vm9 = vcmp.lt.s32.totalorder %v7716_v8, 2 }
 0x264   : > { %vm4753_vm12 = vcmp.lt.s32.totalorder %v7716_v8, 4  ;;  %v4222_v57 = vadd.f32 0.041655596, %v4221_v36  ;;  %v4229_v52 = vadd.f32 0.008332121, %v4228_v60  ;;  %vm4752_vm13 = vcmp.lt.s32.totalorder %v7716_v8, 3 }
 0x265   : > { %v4660_v18 = vsel %vm4658_vm8, %v4659_v27, %v4655_v39  ;;  %v4759_v2 = vsel %vm4753_vm12, %v4746_v5, 920167782  ;;  %v4762_v29 = vsel %vm4750_vm6, %v7877_v40, %v7879_v50  ;;  %v4763_v21 = vsel %vm4753_vm12, %v4749_v48, 1326507024 }
 0x266   : > { %v4661_v6 = vadd.s32 %v4660_v18, %v4656_v32  ;;  %v4223_v63 = vmul.f32 %v4222_v57, %v4220_v49  ;;  %v4230_v22 = vmul.f32 %v4229_v52, %v4220_v49  ;;  %v4548_v10 = vand.u32 3, %v7802_v13 }
 0x267   : > { %v4758_v26 = vsel %vm4750_vm6, %v7882_v55, %v7877_v40  ;;  %v4764_v16 = vsel %vm4752_vm13, %v4746_v5, %v4763_v21  ;;  %v7905_v25 = vshll.u32 %v4726_v47, 8  ;;  %vm4238_vm0 = vcmp.lt.s32.totalorder %v7840_v28, 2 }
 0x268   : > { %v4662_v12 = vadd.s32 536870912, %v4661_v6  ;;  %v4224_v20 = vadd.f32 -0.4999988, %v4223_v63  ;;  %v4231_v43 = vadd.f32 -0.16666654, %v4230_v22  ;;  %v4760_v58 = vsel %vm4752_vm13, %v7879_v50, %v4759_v2 }
 0x269   : > { %v4765_v13 = vsel %vm4751_vm9, %v4762_v29, %v4764_v16  ;;  %vm4235_vm14 = vweird.f32 %v7395_v0  ;;  %v4767_v4 = vand.u32 65535, %v7905_v25  ;;  %v4768_v7 = vshrl.u32 %v7905_v25, 16 }
 0x26a   : > { %v7914_v45 = vshrl.u32 %v4662_v12, 30  ;;  %v4769_v41 = vand.u32 65535, %v4765_v13  ;;  %v4225_v9 = vmul.f32 %v4224_v20, %v4220_v49  ;;  %v4232_v53 = vmul.f32 %v4231_v43, %v4220_v49 }
 0x26b   : > { %vm4239_vm1 = vcmp.eq.s32.totalorder %v7840_v28, 0  ;;  %v4770_v32 = vshrl.u32 %v4765_v13, 16  ;;  %vm4242_vm15 = vcmp.eq.s32.totalorder %v7840_v28, 2  ;;  %v4761_v56 = vsel %vm4751_vm9, %v4758_v26, %v4760_v58 }
 0x26c   : > { %v4664_v24 = vshll.u32 %v7914_v45, 30  ;;  %v7923_v17 = vmul.u32 %v4769_v41, %v4768_v7  ;;  %v4226_v30 = vadd.f32 1.0, %v4225_v9  ;;  %v4233_v54 = vadd.f32 1.0, %v4232_v53 }
 0x26d   : > { %v4771_v62 = vmul.u32 %v4769_v41, %v4767_v4  ;;  %v4772_v61 = vmul.u32 %v4770_v32, %v4767_v4  ;;  %vm4549_vm4 = vcmp.lt.s32.totalorder %v4548_v10, 2  ;;  %vm4550_vm7 = vcmp.eq.s32.totalorder %v4548_v10, 0 }
 0x26e   : > { %vm4553_vm2 = vcmp.eq.s32.totalorder %v4548_v10, 2  ;;  %v4665_v3 = vsub.s32 %v4661_v6, %v4664_v24  ;;  %v4234_v59 = vmul.f32 %v4233_v54, %v4218_v14  ;;  %v4243_v33 = vxor.u32 2147483648, %v4226_v30 }
 0x26f   : > { %v4775_v46 = vshll.u32 %v4772_v61, 16  ;;  %v4792_v1 = vshrl.u32 %v4761_v56, 16  ;;  %v4774_v37 = vmul.u32 %v4770_v32, %v4768_v7  ;;  %v4777_v49 = vshll.u32 %v7923_v17, 16 }
 0x270   : > { %vm4666_vm3 = vcmp.lt.s32.totalorder %v4665_v3, 0  ;;  %v4667_v38 = vsub.s32 0, %v4665_v3  ;;  %v4240_v39 = vxor.u32 2147483648, %v4234_v59  ;;  %v4244_v44 = vsel %vm4242_vm15, %v4243_v33, %v4234_v59 }
 0x271   : > { %v4555_v5 = vsel %vm4553_vm2, %v4243_v33, %v4234_v59  ;;  %vm4779_vm10 = vc.u32 %v4771_v62, %v4775_v46  ;;  %v4781_v27 = vadd.s32 %v4775_v46, %v4771_v62  ;;  %v4791_v14 = vand.u32 65535, %v4761_v56 }
 0x272   : > { %v4668_v36 = vsel %vm4666_vm3, %v4667_v38, %v4665_v3  ;;  %v4780_v60 = vsel %vm4779_vm10, 1, %v5642_v51  ;;  %v4241_v48 = vsel %vm4239_vm1, %v4226_v30, %v4240_v39  ;;  %v4552_v47 = vsel %vm4550_vm7, %v4226_v30, %v4240_v39 }
 0x273   : > { %v4669_v57 = vclz %v4668_v36  ;;  %v4794_v52 = vmul.u32 %v4792_v1, %v4767_v4  ;;  %v4245_v18 = vsel %vm4238_vm0, %v4241_v48, %v4244_v44  ;;  %v4556_v6 = vsel %vm4549_vm4, %v4552_v47, %v4555_v5 }
 0x274   : > { %vm4783_vm11 = vc.u32 %v4781_v27, %v4777_v49  ;;  %v4246_v2 = vsel %vm4235_vm14, nan, %v4245_v18  ;;  %v4557_v29 = vsel %vm4235_vm14, nan, %v4556_v6  ;;  %v4782_v63 = vadd.s32 %v4780_v60, %v4774_v37 }
 0x275   : > { %v5426_v21 = vadd.s32 4294967294, %v4669_v57  ;;  %5416 = vst [vmem:[%s5742_s17 + $0xa8] sm:$0xff] %v4246_v2  ;;  %v4784_v22 = vsel %vm4783_vm11, 1, %v5642_v51  ;;  %v4795_v12 = vmul.u32 %v4791_v14, %v4768_v7  ;;  %v4657_v28 = vadd.s32 %v7846_v15, %v7842_v23 }
 0x276   : > { %5424 = vst [vmem:[%s5742_s17 + $0x128] sm:$0xff] %v4557_v29  ;;  %v4793_v10 = vmul.u32 %v4791_v14, %v4767_v4  ;;  %v4797_v26 = vshll.u32 %v4794_v52, 16  ;;  %v4776_v20 = vshrl.u32 %v4772_v61, 16  ;;  %v4796_v43 = vmul.u32 %v4792_v1, %v4768_v7 }
 0x277   : > { %vm5427_vm5 = vcmp.lt.s32.totalorder %v5426_v21, 0  ;;  %v4786_v41 = vadd.s32 %v4784_v22, %v4782_v63  ;;  %v4734_v9 = vshrl.u32 %v5636_v34, %v7835_v31  ;;  %v4799_v53 = vshll.u32 %v4795_v12, 16 }
 0x278   : > { %v4672_v16 = vsel %vm5427_vm5, 0, %v5426_v21  ;;  %vm4801_vm8 = vc.u32 %v4793_v10, %v4797_v26  ;;  %v4755_v23 = vsel %vm4753_vm12, %v7879_v50, 2102212464  ;;  %v4778_v15 = vshrl.u32 %v7923_v17, 16 }
 0x279   : > { %v4673_v58 = vsub.s32 32, %v4672_v16  ;;  %v4674_v13 = vshll.u32 %v4665_v3, %v4672_v16  ;;  %v4677_v0 = vsub.s32 4294967266, %v4672_v16  ;;  %v4802_v4 = vsel %vm4801_vm8, 1, %v5642_v51 }
 0x27a   : > { %v4803_v7 = vadd.s32 %v4797_v26, %v4793_v10  ;;  %v4787_v54 = vadd.s32 %v4786_v41, %v4776_v20  ;;  %v4804_v62 = vadd.s32 %v4802_v4, %v4796_v43  ;;  %v4754_v34 = vsel %vm4750_vm6, %v4734_v9, %v7882_v55 }
 0x27b   : > { %v4675_v32 = vshrl.u32 %v4657_v28, %v4673_v58  ;;  %v4678_v24 = vadd.s32 127, %v4677_v0  ;;  %v4798_v31 = vshrl.u32 %v4794_v52, 16  ;;  %v4756_v50 = vsel %vm4752_vm13, %v7877_v40, %v4755_v23 }
 0x27c   : > { %vm4805_vm0 = vc.u32 %v4803_v7, %v4799_v53  ;;  %v4800_v59 = vshrl.u32 %v4795_v12, 16  ;;  %v4788_v1 = vadd.s32 %v4787_v54, %v4778_v15  ;;  %v4807_v38 = vadd.s32 %v4803_v7, %v4799_v53 }
 0x27d   : > { %v4676_v56 = vor.u32 %v4675_v32, %v4674_v13  ;;  %v4679_v30 = vshll.u32 %v4678_v24, 23  ;;  %v4806_v17 = vsel %vm4805_vm0, 1, %v5642_v51  ;;  %v4757_v37 = vsel %vm4751_vm9, %v4754_v34, %v4756_v50 }
 0x27e   : > { %v4808_v33 = vadd.s32 %v4806_v17, %v4804_v62  ;;  %vm4565_vm6 = vcmp.lt.s32.totalorder %v7408_v11, 0  ;;  %v4687_v39 = vsub.s32 4, %v7914_v45  ;;  %vm4564_vm12 = vcmp.le.f32.partialorder %v4563_v35, 0.7853982 }
 0x27f   : > { %v4680_v61 = vor.u32 4788187, %v4679_v30  ;;  %v4683_v3 = vcvt.s32.f32 %v4676_v56  ;;  %v4811_v51 = vmul.u32 %v7905_v25, %v4757_v37  ;;  %vm4813_vm13 = vc.u32 %v4788_v1, %v4807_v38 }
 0x280   : > { %v4809_v49 = vadd.s32 %v4808_v33, %v4798_v31  ;;  %v4688_v60 = vsel %vm4565_vm6, %v4687_v39, %v7914_v45  ;;  %vm4706_vm4 = vweird.f32 %v7408_v11  ;;  %v4812_v24 = vadd.s32 %v4807_v38, %v4788_v1 }
 0x281   : > { %v4681_v46 = vand.u32 2147483647, %v4680_v61  ;;  %v4690_v47 = vsel %vm4564_vm12, 0, %v4688_v60  ;;  %vm4720_vm11 = vcmp.lt.s32.totalorder %v7425_v19, 0  ;;  %vm4719_vm5 = vcmp.le.f32.partialorder %v4718_v42, 0.7853982 }
 0x282   : > { %v4810_v44 = vadd.s32 %v4809_v49, %v4800_v59  ;;  %v4707_v29 = vadd.s32 3, %v4690_v47  ;;  %v5020_v4 = vand.u32 3, %v4690_v47 }
 0x283   : > { %v4684_v55 = vmul.f32 %v4683_v3, %v4681_v46 }
 0x284   : > { %v4814_v5 = vadd.s32 1, %v4810_v44  ;;  %v4708_v45 = vand.u32 3, %v4707_v29  ;;  %vm5021_vm2 = vcmp.lt.s32.totalorder %v5020_v4, 2  ;;  %vm5022_vm3 = vcmp.eq.s32.totalorder %v5020_v4, 0 }
 0x285   : > { %v4685_v40 = vxor.u32 2147483648, %v4684_v55  ;;  %vm5025_vm10 = vcmp.eq.s32.totalorder %v5020_v4, 2 }
 0x286   : > { %v4815_v27 = vsel %vm4813_vm13, %v4814_v5, %v4810_v44  ;;  %vm4713_vm14 = vcmp.eq.s32.totalorder %v4708_v45, 2  ;;  %vm4710_vm1 = vcmp.eq.s32.totalorder %v4708_v45, 0  ;;  %vm4709_vm15 = vcmp.lt.s32.totalorder %v4708_v45, 2 }
 0x287   : > { %v4686_v36 = vsel %vm4565_vm6, %v4685_v40, %v4684_v55  ;;  %v4816_v48 = vadd.s32 %v4815_v27, %v4811_v51 }
 0x288   : > { %v4689_v8 = vsel %vm4564_vm12, %v7408_v11, %v4686_v36 }
 0x289   : > { %v4691_v14 = vmul.f32 %v4689_v8, %v4689_v8  ;;  %v4817_v18 = vadd.s32 536870912, %v4816_v48 }
 0x28b   : > { %v4692_v57 = vmul.f32 -0.001358992, %v4691_v14  ;;  %v4699_v52 = vmul.f32 -0.00019511016, %v4691_v14  ;;  %v4818_v35 = vshrl.u32 %v4817_v18, 30 }
 0x28d   : > { %v4693_v6 = vadd.f32 0.041655596, %v4692_v57  ;;  %v4700_v2 = vadd.f32 0.008332121, %v4699_v52  ;;  %v4819_v63 = vshll.u32 %v4818_v35, 30  ;;  %v4842_v49 = vsub.s32 4, %v4818_v35 }
 0x28f   : > { %v4694_v21 = vmul.f32 %v4693_v6, %v4691_v14  ;;  %v4701_v25 = vmul.f32 %v4700_v2, %v4691_v14  ;;  %v4820_v28 = vsub.s32 %v4816_v48, %v4819_v63  ;;  %v4843_v44 = vsel %vm4720_vm11, %v4842_v49, %v4818_v35 }
 0x290   : > { %v4845_v5 = vsel %vm4719_vm5, 0, %v4843_v44 }
 0x291   : > { %v4695_v22 = vadd.f32 -0.4999988, %v4694_v21  ;;  %v4702_v12 = vadd.f32 -0.16666654, %v4701_v25  ;;  %vm4821_vm9 = vcmp.lt.s32.totalorder %v4820_v28, 0  ;;  %v4822_v16 = vsub.s32 0, %v4820_v28 }
 0x292   : > { %v4862_v27 = vadd.s32 3, %v4845_v5  ;;  %v5174_v18 = vand.u32 3, %v4845_v5 }
 0x293   : > { %v4696_v10 = vmul.f32 %v4695_v22, %v4691_v14  ;;  %v4703_v26 = vmul.f32 %v4702_v12, %v4691_v14  ;;  %v4823_v58 = vsel %vm4821_vm9, %v4822_v16, %v4820_v28 }
 0x294   : > { %v4824_v13 = vclz %v4823_v58  ;;  %v4863_v52 = vand.u32 3, %v4862_v27  ;;  %vm5179_vm0 = vcmp.eq.s32.totalorder %v5174_v18, 2  ;;  %vm5176_vm13 = vcmp.eq.s32.totalorder %v5174_v18, 0 }
 0x295   : > { %v4697_v20 = vadd.f32 1.0, %v4696_v10  ;;  %v4704_v43 = vadd.f32 1.0, %v4703_v26  ;;  %vm5175_vm9 = vcmp.lt.s32.totalorder %v5174_v18, 2 }
 0x296   : > { %v5429_v9 = vadd.s32 4294967294, %v4824_v13  ;;  %vm4868_vm8 = vcmp.eq.s32.totalorder %v4863_v52, 2  ;;  %vm4864_vm6 = vcmp.lt.s32.totalorder %v4863_v52, 2  ;;  %vm4865_vm12 = vcmp.eq.s32.totalorder %v4863_v52, 0 }
 0x297   : > { %v4705_v0 = vmul.f32 %v4704_v43, %v4689_v8  ;;  %v4714_v41 = vxor.u32 2147483648, %v4697_v20 }
 0x298   : > { %vm5430_vm7 = vcmp.lt.s32.totalorder %v5429_v9, 0 }
 0x299   : > { %v4711_v53 = vxor.u32 2147483648, %v4705_v0  ;;  %v4715_v32 = vsel %vm4713_vm14, %v4714_v41, %v4705_v0  ;;  %v4827_v15 = vsel %vm5430_vm7, 0, %v5429_v9  ;;  %v5027_v17 = vsel %vm5025_vm10, %v4714_v41, %v4705_v0 }
 0x29a   : > { %v4828_v56 = vsub.s32 32, %v4827_v15  ;;  %v4829_v30 = vshll.u32 %v4820_v28, %v4827_v15  ;;  %v4832_v54 = vsub.s32 4294967266, %v4827_v15  ;;  %vm4861_vm14 = vweird.f32 %v7425_v19 }
 0x29b   : > { %v4712_v23 = vsel %vm4710_vm1, %v4697_v20, %v4711_v53  ;;  %v5024_v61 = vsel %vm5022_vm3, %v4697_v20, %v4711_v53 }
 0x29c   : > { %v4716_v7 = vsel %vm4709_vm15, %v4712_v23, %v4715_v32  ;;  %v4830_v34 = vshrl.u32 %v4812_v24, %v4828_v56  ;;  %v4833_v31 = vadd.s32 127, %v4832_v54  ;;  %v5028_v59 = vsel %vm5021_vm2, %v5024_v61, %v5027_v17 }
 0x29d   : > { %v4717_v62 = vsel %vm4706_vm4, nan, %v4716_v7  ;;  %v5029_v1 = vsel %vm4706_vm4, nan, %v5028_v59 }
 0x29e   : > { %5431 = vst [vmem:[%s5742_s17 + $0xb0] sm:$0xff] %v4717_v62  ;;  %v4831_v3 = vor.u32 %v4830_v34, %v4829_v30  ;;  %v4834_v50 = vshll.u32 %v4833_v31, 23 }
 0x29f   : > { %5439 = vst [vmem:[%s5742_s17 + $0x130] sm:$0xff] %v5029_v1 }
 0x2a0   : > { %v4835_v33 = vor.u32 4788187, %v4834_v50  ;;  %v4838_v46 = vcvt.s32.f32 %v4831_v3 }
 0x2a2   : > { %v4836_v38 = vand.u32 2147483647, %v4835_v33 }
 0x2a4   : > { %v4839_v37 = vmul.f32 %v4838_v46, %v4836_v38 }
 0x2a6   : > { %v4840_v55 = vxor.u32 2147483648, %v4839_v37 }
 0x2a8   : > { %v4841_v39 = vsel %vm4720_vm11, %v4840_v55, %v4839_v37 }
 0x2a9   : > { %v4844_v40 = vsel %vm4719_vm5, %v7425_v19, %v4841_v39 }
 0x2aa   : > { %v4846_v51 = vmul.f32 %v4844_v40, %v4844_v40 }
 0x2ac   : > { %v4847_v36 = vmul.f32 -0.001358992, %v4846_v51  ;;  %v4854_v11 = vmul.f32 -0.00019511016, %v4846_v51 }
 0x2ae   : > { %v4848_v60 = vadd.f32 0.041655596, %v4847_v36  ;;  %v4855_v8 = vadd.f32 0.008332121, %v4854_v11 }
 0x2b0   : > { %v4849_v14 = vmul.f32 %v4848_v60, %v4846_v51  ;;  %v4856_v48 = vmul.f32 %v4855_v8, %v4846_v51 }
 0x2b2   : > { %v4850_v47 = vadd.f32 -0.4999988, %v4849_v14  ;;  %v4857_v57 = vadd.f32 -0.16666654, %v4856_v48 }
 0x2b4   : > { %v4851_v42 = vmul.f32 %v4850_v47, %v4846_v51  ;;  %v4858_v6 = vmul.f32 %v4857_v57, %v4846_v51 }
 0x2b6   : > { %v4852_v2 = vadd.f32 1.0, %v4851_v42  ;;  %v4859_v35 = vadd.f32 1.0, %v4858_v6 }
 0x2b8   : > { %v4860_v29 = vmul.f32 %v4859_v35, %v4844_v40  ;;  %v4869_v21 = vxor.u32 2147483648, %v4852_v2 }
 0x2ba   : > { %v4866_v25 = vxor.u32 2147483648, %v4860_v29  ;;  %v4870_v63 = vsel %vm4868_vm8, %v4869_v21, %v4860_v29  ;;  %v5181_v22 = vsel %vm5179_vm0, %v4869_v21, %v4860_v29 }
 0x2bc   : > { %v4867_v12 = vsel %vm4865_vm12, %v4852_v2, %v4866_v25  ;;  %v5178_v28 = vsel %vm5176_vm13, %v4852_v2, %v4866_v25 }
 0x2bd   : > { %v4871_v45 = vsel %vm4864_vm6, %v4867_v12, %v4870_v63  ;;  %v5182_v10 = vsel %vm5175_vm9, %v5178_v28, %v5181_v22 }
 0x2be   : > { %v4872_v26 = vsel %vm4861_vm14, nan, %v4871_v45  ;;  %v5183_v16 = vsel %vm4861_vm14, nan, %v5182_v10 }
 0x2bf   : > { %5432 = vst [vmem:[%s5742_s17 + $0xb8] sm:$0xff] %v4872_v26 }
 0x2c0   : > { %5440 = vst [vmem:[%s5742_s17 + $0x138] sm:$0xff] %v5183_v16 }
 0x2c1   : > { %5577 = shalt.err (!%p5574_p13)
}
 0x2c2   : > { %s5643_s5 = smov 128   ;;  %s5644_s12 = smov 8  }
 0x2c3   : > { %5449 = dma.vmem_to_hbm [thread:$0]  (%p5706_p9), %s5203_s9, 5120, %s5205_s25, %s5188_s26, %s5643_s5, %s5643_s5, %s5644_s12  }
 0x2c4 PF: > { %s5219_s13 = sand.u32 1, %s5612_s6   ;;  %p5456_p0 = pnand %p5295_p12, %p5713_p11 }
 0x2c5   : > { %s5220_s15 = scalar_lea.sflag [#allocation4], %s5219_s13 }
 0x2c6   : > { %p5457_p1 = pneg %p5456_p0 }
 0x2c8   : > { %5607 = dma.done.wait (%p5457_p1), %s5220_s15, 5120  }
 0x2c9   : > { %5609 = vsyncadd (%p5457_p1), %s5220_s15, 4294962176  ;;  %s17_s11 = sadd.s32 1, %s5632_s11   ;;  %s8052_s6 = smov %s5616_s7 }
 0x2ca   : > { %p14_p2 = scmp.ge.s32.totalorder %s17_s11, 4   ;;  %s8053_s7 = smov %s5620_s8 }
 0x2cb   : > { %s8054_s8 = smov %s5711_s20  ;;  %s8055_s9 = smov %s5628_s10 }
 0x2cc   : > { %s8056_s10 = smov %s8058_s14  ;;  %16 = sbr.rel (!%p14_p2) target bundleno = 6 (0x6), region = 91 }
 0x2d1   :  { %5226 = vsyncpa [#allocation3], 1 }
 0x2d2   :  { %5228 = vsyncpa [#allocation3 + $0x1], 1 }
 0x2d3   :  { %5229 = vsyncpa [#allocation4], 1 }
 0x2d4   :  { %5231 = vsyncpa [#allocation4 + $0x1], 1 }

</bundles_post_ra>
